<compile_context>
chip_gen: v7x
topology: tpu7x:2x2x1
jax: 0.10.0
libtpu: 0.0.40
codegen_flags: <defaults>
</compile_context>

<pallas_src>
import functools

import jax
import jax.numpy as jnp
from jax.experimental import pallas as pl
from jax.experimental.pallas import tpu as pltpu

IN_FEATURES = 100608          # hard-coded by the PyTorch module (= 6 * 131 * 128)
DEFAULT_TK = 16768            # lane-aligned K tile (131 * 128) -> 6 grid steps


def _num_tensorcores_per_chip():
    """2 on v7x (dual TensorCore), 1 on v5e/v6e; conservative default 1."""
    try:
        kind = jax.devices()[0].device_kind.lower()
    except Exception:
        return 1
    return 2 if ("v7" in kind or "7x" in kind) else 1


def _round_up(v, m):
    return -(-v // m) * m


def _vmem_limit_bytes(B, tk, H2, w1_dtype):
    """Scoped-VMEM budget: double-buffered, (8,128)-padded W1 and x tiles + slack."""
    w1_tile = tk * _round_up(H2, 128) * jnp.dtype(w1_dtype).itemsize
    x_tile = _round_up(B, 8) * tk * 4
    return int(2 * (w1_tile + x_tile) + (8 << 20))


# ---------------------------------------------------------------------------
# Kernels
# ---------------------------------------------------------------------------
def _fused_classifier_kernel(x_ref, w1_ref, b1_ref, w2_ref, b2_ref, w3_ref,
                             b3_ref, o_ref, acc_ref):
    """Single-TC path: stream x@W1 (HBM-bound); fuse the tiny epilogue into the
    last K step (bias+ReLU, layers 2/3, softmax)."""
    k = pl.program_id(0)

    @pl.when(k == 0)
    def _():
        acc_ref[...] = jnp.zeros_like(acc_ref)

    # bf16 x bf16 MXU matmul with f32 accumulation (x tile cast on the VPU).
    acc_ref[...] += jnp.dot(
        x_ref[...].astype(jnp.bfloat16),
        w1_ref[...].astype(jnp.bfloat16),
        preferred_element_type=jnp.float32)

    @pl.when(k == pl.num_programs(0) - 1)
    def _():
        h1 = jnp.maximum(acc_ref[...] + b1_ref[...], 0.0)
        h2 = jnp.dot(h1, w2_ref[...], preferred_element_type=jnp.float32) + b2_ref[...]
        h2 = jnp.maximum(h2, 0.0)
        logits = jnp.dot(h2, w3_ref[...],
                         preferred_element_type=jnp.float32) + b3_ref[...]
        m = jnp.max(logits, axis=-1, keepdims=True)
        e = jnp.exp(logits - m)
        o_ref[...] = (e / jnp.sum(e, axis=-1, keepdims=True)).astype(o_ref.dtype)


def _layer1_partial_kernel(x_ref, w1_ref, part_ref):
    """Dual-TC path (v7x): each 'parallel' split streams half of W1 and
    accumulates its partial x@W1 directly into the (VMEM-resident) output block."""
    k = pl.program_id(1)

    @pl.when(k == 0)
    def _():
        part_ref[...] = jnp.zeros_like(part_ref)

    part_ref[...] += jnp.dot(
        x_ref[...].astype(jnp.bfloat16),
        w1_ref[...].astype(jnp.bfloat16),
        preferred_element_type=jnp.float32)


# ---------------------------------------------------------------------------
# Forward pass
# ---------------------------------------------------------------------------
@functools.partial(jax.jit, static_argnames=("tk", "nsplit"))
def classifier_forward(x, params, *, tk=DEFAULT_TK, nsplit=None):
    """x: array with batch leading; flattened to (B, 100608). params as in
    init_params()/prepare_params() (W1 ideally already bf16)."""
    w1, b1, w2, b2, w3, b3 = params
    x = x.astype(jnp.float32)
    B = x.shape[0]
    xf = x.reshape(B, -1)                      # Flatten(start_dim=1)
    K = xf.shape[1]
    assert K == IN_FEATURES and K % tk == 0 and tk % 128 == 0
    total_steps = K // tk
    H2 = w1.shape[1]
    H = w2.shape[1]
    OUT = w3.shape[1]

    if nsplit is None:
        nsplit = _num_tensorcores_per_chip()

    vmem_limit = _vmem_limit_bytes(B, tk, H2, w1.dtype)
    w1_bytes = w1.size * w1.dtype.itemsize
    x_bytes = xf.size * 4
    small_bytes = 4 * (H2 + H2 * H + H + H * OUT + OUT + B * OUT)

    if nsplit == 1:
        # ---- v5e / v6e: one fused kernel, no partials, no second launch. ----
        return pl.pallas_call(
            _fused_classifier_kernel,
            out_shape=jax.ShapeDtypeStruct((B, OUT), jnp.float32),
            grid_spec=pltpu.PrefetchScalarGridSpec(
                num_scalar_prefetch=0,
                grid=(total_steps,),
                in_specs=[
                    pl.BlockSpec((B, tk), lambda k: (0, k)),      # x K-tile
                    pl.BlockSpec((tk, H2), lambda k: (k, 0)),     # W1 K-tile (bf16)
                    pl.BlockSpec((1, H2), lambda k: (0, 0)),      # b1
                    pl.BlockSpec((H2, H), lambda k: (0, 0)),      # W2
                    pl.BlockSpec((1, H), lambda k: (0, 0)),       # b2
                    pl.BlockSpec((H, OUT), lambda k: (0, 0)),     # W3
                    pl.BlockSpec((1, OUT), lambda k: (0, 0)),     # b3
                ],
                out_specs=pl.BlockSpec((B, OUT), lambda k: (0, 0)),
                scratch_shapes=[pltpu.VMEM((B, H2), jnp.float32)],
            ),
            compiler_params=pltpu.CompilerParams(
                dimension_semantics=("arbitrary",),
                vmem_limit_bytes=vmem_limit,
            ),
            cost_estimate=pl.CostEstimate(
                flops=2 * B * (K * H2 + H2 * H + H * OUT),
                transcendentals=B * OUT,
                bytes_accessed=w1_bytes + x_bytes + small_bytes,
            ),
        )(xf, w1, b1, w2, b2, w3, b3)

    # ---- v7x: split the K reduction across the 2 TensorCores. ----
    assert total_steps % nsplit == 0
    kps = total_steps // nsplit
    partials = pl.pallas_call(
        _layer1_partial_kernel,
        out_shape=jax.ShapeDtypeStruct((nsplit, B, H2), jnp.float32),
        grid_spec=pltpu.PrefetchScalarGridSpec(
            num_scalar_prefetch=0,
            grid=(nsplit, kps),
            in_specs=[
                pl.BlockSpec((B, tk), lambda s, k: (0, s * kps + k)),
                pl.BlockSpec((tk, H2), lambda s, k: (s * kps + k, 0)),
            ],
            out_specs=pl.BlockSpec((None, B, H2), lambda s, k: (s, 0, 0)),
        ),
        compiler_params=pltpu.CompilerParams(
            dimension_semantics=("parallel", "arbitrary"),
            vmem_limit_bytes=vmem_limit,
        ),
        cost_estimate=pl.CostEstimate(
            flops=2 * B * K * H2,
            transcendentals=0,
            bytes_accessed=w1_bytes + x_bytes + 4 * nsplit * B * H2,
        ),
    )(xf, w1)

    # Epilogue inputs total ~1 KB: plain jnp so XLA fuses it -- avoids the
    # fixed cost of a second pallas_call (dominant overhead at v7x's 3.2 TB/s).
    h1 = jnp.maximum(jnp.sum(partials, axis=0) + b1, 0.0)
    h2 = jnp.maximum(
        jnp.dot(h1, w2, precision=jax.lax.Precision.HIGHEST) + b2, 0.0)
    logits = jnp.dot(h2, w3, precision=jax.lax.Precision.HIGHEST) + b3
    return jax.nn.softmax(logits, axis=1)


# ---------------------------------------------------------------------------
# Params
# ---------------------------------------------------------------------------
def init_params(key, hidden_shape, output_clf_shape):
    """PyTorch-faithful f32 init mimicking nn.Linear's U(-1/sqrt(fan_in), +)."""
    def linear(k, fan_in, fan_out):
        kw, kb = jax.random.split(k)
        bound = 1.0 / jnp.sqrt(jnp.float32(fan_in))
        w = jax.random.uniform(kw, (fan_in, fan_out), jnp.float32, -bound, bound)
        b = jax.random.uniform(kb, (1, fan_out), jnp.float32, -bound, bound)
        return w, b

    k1, k2, k3 = jax.random.split(key, 3)
    w1, b1 = linear(k1, IN_FEATURES, hidden_shape * 2)
    w2, b2 = linear(k2, hidden_shape * 2, hidden_shape)
    w3, b3 = linear(k3, hidden_shape, output_clf_shape)
    return (w1, b1, w2, b2, w3, b3)


def prepare_params(params):
    """One-time, offline inference prep: store the 25.8 MB W1 in bf16 so the
    HBM-bound W1 stream is halved. Everything else stays f32."""
    w1, b1, w2, b2, w3, b3 = params
    return (w1.astype(jnp.bfloat16), b1, w2, b2, w3, b3)


# ---------------------------------------------------------------------------
# References
# ---------------------------------------------------------------------------
def _reference(x, params, quantize_like_kernel=False):
    w1, b1, w2, b2, w3, b3 = params
    xf = x.astype(jnp.float32).reshape(x.shape[0], -1)
    if quantize_like_kernel:
        # Same bf16 quantization / f32 accumulation as the kernel's layer 1.
        h1 = jax.lax.dot_general(
            xf.astype(jnp.bfloat16), w1.astype(jnp.bfloat16),
            (((1,), (0,)), ((), ())), preferred_element_type=jnp.float32)
    else:
        h1 = jnp.dot(xf, w1.astype(jnp.float32),
                     precision=jax.lax.Precision.HIGHEST)
    h1 = jnp.maximum(h1 + b1, 0.0)
    h2 = jnp.maximum(
        jnp.dot(h1, w2, precision=jax.lax.Precision.HIGHEST) + b2, 0.0)
    logits = jnp.dot(h2, w3, precision=jax.lax.Precision.HIGHEST) + b3
    return jax.nn.softmax(logits, axis=1)


if __name__ == "__main__":
    key = jax.random.PRNGKey(0)
    kx, kp = jax.random.split(key)

    # (B, C, H, W) with C*H*W == 100608, as required by the module's first Linear.
    B, C, Hs, Ws = 2, 3, 131, 256
    assert C * Hs * Ws == IN_FEATURES
    x = jax.random.normal(kx, (B, C, Hs, Ws), dtype=jnp.float32)

    hidden_shape, output_clf_shape = 32, 4
    params_f32 = init_params(kp, hidden_shape, output_clf_shape)   # f32 (PyTorch)
    params = prepare_params(params_f32)                            # W1 -> bf16 (offline)

    out = jax.block_until_ready(classifier_forward(x, params))

    ref_q = _reference(x, params, quantize_like_kernel=True)   # same bf16 W1
    ref_f = _reference(x, params_f32)                           # full-f32 module math

    assert out.shape == (B, output_clf_shape)
    assert jnp.allclose(jnp.sum(out, axis=1), 1.0, atol=1e-5)
    assert jnp.allclose(out, ref_q, atol=1e-3, rtol=1e-3), "mismatch vs bf16-W1 reference"
    assert jnp.allclose(out, ref_f, atol=2e-2, rtol=2e-2), "mismatch vs f32 reference"

    print("KERNEL_OK")
</pallas_src>

<mosaic_0001>
module attributes {stable_mosaic.version = 11 : i64} {
  func.func @_fused_classifier_kernel(%arg0: i32, %arg1: memref<2x16768xf32, #tpu.memory_space<vmem>>, %arg2: memref<16768x64xbf16, #tpu.memory_space<vmem>>, %arg3: memref<1x64xf32, #tpu.memory_space<vmem>>, %arg4: memref<64x32xf32, #tpu.memory_space<vmem>>, %arg5: memref<1x32xf32, #tpu.memory_space<vmem>>, %arg6: memref<32x4xf32, #tpu.memory_space<vmem>>, %arg7: memref<1x4xf32, #tpu.memory_space<vmem>>, %arg8: memref<2x4xf32, #tpu.memory_space<vmem>>, %arg9: memref<2x64xf32, #tpu.memory_space<vmem>>) attributes {dimension_semantics = [#tpu.dimension_semantics<arbitrary>], iteration_bounds = array<i64: 6>, scalar_prefetch = 0 : i64, scratch_operands = 1 : i64, tpu.core_type = #tpu.core_type<tc>, window_params = [{transform_indices = @transform_0, window_bounds = array<i64: 2, 16768>}, {transform_indices = @transform_1, window_bounds = array<i64: 16768, 64>}, {pipeline_mode = #tpu.pipeline_mode<synchronous>, transform_indices = @transform_2, window_bounds = array<i64: 1, 64>}, {pipeline_mode = #tpu.pipeline_mode<synchronous>, transform_indices = @transform_3, window_bounds = array<i64: 64, 32>}, {pipeline_mode = #tpu.pipeline_mode<synchronous>, transform_indices = @transform_4, window_bounds = array<i64: 1, 32>}, {pipeline_mode = #tpu.pipeline_mode<synchronous>, transform_indices = @transform_5, window_bounds = array<i64: 32, 4>}, {pipeline_mode = #tpu.pipeline_mode<synchronous>, transform_indices = @transform_6, window_bounds = array<i64: 1, 4>}, {pipeline_mode = #tpu.pipeline_mode<synchronous>, transform_indices = @transform_7, window_bounds = array<i64: 2, 4>}]} {
    %c0_i32 = arith.constant 0 : i32
    %0 = arith.cmpi eq, %arg0, %c0_i32 : i32
    %1 = arith.extui %0 : i1 to i32
    %c0_i32_0 = arith.constant 0 : i32
    %2 = arith.cmpi ne, %1, %c0_i32_0 : i32
    scf.if %2 {
      %cst_9 = arith.constant 0.000000e+00 : f32
      %13 = vector.broadcast %cst_9 : f32 to vector<2x64xf32>
      %c0_10 = arith.constant 0 : index
      %c0_11 = arith.constant 0 : index
      %14 = vector.load %arg9[%c0_10, %c0_11] : memref<2x64xf32, #tpu.memory_space<vmem>>, vector<2x64xf32>
      tpu.vector_store %arg9[%c0_10, %c0_11], %13 {strides = array<i32>} : memref<2x64xf32, #tpu.memory_space<vmem>>, vector<2x64xf32>,
    } else {
    }
    %c0 = arith.constant 0 : index
    %c0_1 = arith.constant 0 : index
    %3 = vector.load %arg9[%c0, %c0_1] : memref<2x64xf32, #tpu.memory_space<vmem>>, vector<2x64xf32>
    %c0_2 = arith.constant 0 : index
    %c0_3 = arith.constant 0 : index
    %4 = vector.load %arg1[%c0_2, %c0_3] : memref<2x16768xf32, #tpu.memory_space<vmem>>, vector<2x16768xf32>
    %5 = arith.truncf %4 : vector<2x16768xf32> to vector<2x16768xbf16>
    %c0_4 = arith.constant 0 : index
    %c0_5 = arith.constant 0 : index
    %6 = vector.load %arg2[%c0_4, %c0_5] : memref<16768x64xbf16, #tpu.memory_space<vmem>>, vector<16768x64xbf16>
    %cst = arith.constant dense<0.000000e+00> : vector<2x64xf32>
    %7 = tpu.matmul %5, %6, %cst {dimension_numbers = #tpu.dot_dimension_numbers<[1], [0], [0], [1], [0, 0, 1, 1], [], []>} : vector<2x16768xbf16>, vector<16768x64xbf16>, vector<2x64xf32> -> vector<2x64xf32>
    %8 = arith.addf %3, %7 : vector<2x64xf32>
    %c0_6 = arith.constant 0 : index
    %c0_7 = arith.constant 0 : index
    %9 = vector.load %arg9[%c0_6, %c0_7] : memref<2x64xf32, #tpu.memory_space<vmem>>, vector<2x64xf32>
    tpu.vector_store %arg9[%c0_6, %c0_7], %8 {strides = array<i32>} : memref<2x64xf32, #tpu.memory_space<vmem>>, vector<2x64xf32>,
    %c5_i32 = arith.constant 5 : i32
    %10 = arith.cmpi eq, %arg0, %c5_i32 : i32
    %11 = arith.extui %10 : i1 to i32
    %c0_i32_8 = arith.constant 0 : i32
    %12 = arith.cmpi ne, %11, %c0_i32_8 : i32
    scf.if %12 {
      %c0_9 = arith.constant 0 : index
      %c0_10 = arith.constant 0 : index
      %13 = vector.load %arg9[%c0_9, %c0_10] : memref<2x64xf32, #tpu.memory_space<vmem>>, vector<2x64xf32>
      %c0_11 = arith.constant 0 : index
      %c0_12 = arith.constant 0 : index
      %14 = vector.load %arg3[%c0_11, %c0_12] : memref<1x64xf32, #tpu.memory_space<vmem>>, vector<1x64xf32>
      %15 = vector.broadcast %14 : vector<1x64xf32> to vector<2x64xf32>
      %16 = arith.addf %13, %15 : vector<2x64xf32>
      %cst_13 = arith.constant 0.000000e+00 : f32
      %17 = vector.broadcast %cst_13 : f32 to vector<2x64xf32>
      %18 = arith.maximumf %16, %17 : vector<2x64xf32>
      %c0_14 = arith.constant 0 : index
      %c0_15 = arith.constant 0 : index
      %19 = vector.load %arg4[%c0_14, %c0_15] : memref<64x32xf32, #tpu.memory_space<vmem>>, vector<64x32xf32>
      %cst_16 = arith.constant dense<0.000000e+00> : vector<2x32xf32>
      %20 = tpu.matmul %18, %19, %cst_16 {dimension_numbers = #tpu.dot_dimension_numbers<[1], [0], [0], [1], [0, 0, 1, 1], [], []>} : vector<2x64xf32>, vector<64x32xf32>, vector<2x32xf32> -> vector<2x32xf32>
      %c0_17 = arith.constant 0 : index
      %c0_18 = arith.constant 0 : index
      %21 = vector.load %arg5[%c0_17, %c0_18] : memref<1x32xf32, #tpu.memory_space<vmem>>, vector<1x32xf32>
      %22 = vector.broadcast %21 : vector<1x32xf32> to vector<2x32xf32>
      %23 = arith.addf %20, %22 : vector<2x32xf32>
      %cst_19 = arith.constant 0.000000e+00 : f32
      %24 = vector.broadcast %cst_19 : f32 to vector<2x32xf32>
      %25 = arith.maximumf %23, %24 : vector<2x32xf32>
      %c0_20 = arith.constant 0 : index
      %c0_21 = arith.constant 0 : index
      %26 = vector.load %arg6[%c0_20, %c0_21] : memref<32x4xf32, #tpu.memory_space<vmem>>, vector<32x4xf32>
      %cst_22 = arith.constant dense<0.000000e+00> : vector<2x4xf32>
      %27 = tpu.matmul %25, %26, %cst_22 {dimension_numbers = #tpu.dot_dimension_numbers<[1], [0], [0], [1], [0, 0, 1, 1], [], []>} : vector<2x32xf32>, vector<32x4xf32>, vector<2x4xf32> -> vector<2x4xf32>
      %c0_23 = arith.constant 0 : index
      %c0_24 = arith.constant 0 : index
      %28 = vector.load %arg7[%c0_23, %c0_24] : memref<1x4xf32, #tpu.memory_space<vmem>>, vector<1x4xf32>
      %29 = vector.broadcast %28 : vector<1x4xf32> to vector<2x4xf32>
      %30 = arith.addf %27, %29 : vector<2x4xf32>
      %cst_25 = arith.constant dense<0xFF800000> : vector<2xf32>
      %31 = vector.multi_reduction <maximumf>, %30, %cst_25 [1] : vector<2x4xf32> to vector<2xf32>
      %32 = vector.shape_cast %31 : vector<2xf32> to vector<2x1xf32>
      %33 = vector.broadcast %32 : vector<2x1xf32> to vector<2x4xf32>
      %34 = arith.subf %30, %33 : vector<2x4xf32>
      %35 = math.exp %34 : vector<2x4xf32>
      %cst_26 = arith.constant dense<0.000000e+00> : vector<2xf32>
      %36 = vector.multi_reduction <add>, %35, %cst_26 [1] : vector<2x4xf32> to vector<2xf32>
      %37 = vector.shape_cast %36 : vector<2xf32> to vector<2x1xf32>
      %38 = vector.broadcast %37 : vector<2x1xf32> to vector<2x4xf32>
      %39 = arith.divf %35, %38 : vector<2x4xf32>
      %c0_27 = arith.constant 0 : index
      %c0_28 = arith.constant 0 : index
      %40 = vector.load %arg8[%c0_27, %c0_28] : memref<2x4xf32, #tpu.memory_space<vmem>>, vector<2x4xf32>
      tpu.vector_store %arg8[%c0_27, %c0_28], %39 {strides = array<i32>} : memref<2x4xf32, #tpu.memory_space<vmem>>, vector<2x4xf32>,
    } else {
    }
    return
  }
  func.func @transform_0(%arg0: i32) -> (i32, i32) {
    %c0_i32 = arith.constant 0 : i32
    %c0_i32_0 = arith.constant 0 : i32
    return %c0_i32, %arg0 : i32, i32
  }
  func.func @transform_1(%arg0: i32) -> (i32, i32) {
    %c0_i32 = arith.constant 0 : i32
    %c0_i32_0 = arith.constant 0 : i32
    return %arg0, %c0_i32 : i32, i32
  }
  func.func @transform_2(%arg0: i32) -> (i32, i32) {
    %c0_i32 = arith.constant 0 : i32
    %c0_i32_0 = arith.constant 0 : i32
    %c0_i32_1 = arith.constant 0 : i32
    return %c0_i32, %c0_i32_0 : i32, i32
  }
  func.func @transform_3(%arg0: i32) -> (i32, i32) {
    %c0_i32 = arith.constant 0 : i32
    %c0_i32_0 = arith.constant 0 : i32
    %c0_i32_1 = arith.constant 0 : i32
    return %c0_i32, %c0_i32_0 : i32, i32
  }
  func.func @transform_4(%arg0: i32) -> (i32, i32) {
    %c0_i32 = arith.constant 0 : i32
    %c0_i32_0 = arith.constant 0 : i32
    %c0_i32_1 = arith.constant 0 : i32
    return %c0_i32, %c0_i32_0 : i32, i32
  }
  func.func @transform_5(%arg0: i32) -> (i32, i32) {
    %c0_i32 = arith.constant 0 : i32
    %c0_i32_0 = arith.constant 0 : i32
    %c0_i32_1 = arith.constant 0 : i32
    return %c0_i32, %c0_i32_0 : i32, i32
  }
  func.func @transform_6(%arg0: i32) -> (i32, i32) {
    %c0_i32 = arith.constant 0 : i32
    %c0_i32_0 = arith.constant 0 : i32
    %c0_i32_1 = arith.constant 0 : i32
    return %c0_i32, %c0_i32_0 : i32, i32
  }
  func.func @transform_7(%arg0: i32) -> (i32, i32) {
    %c0_i32 = arith.constant 0 : i32
    %c0_i32_0 = arith.constant 0 : i32
    %c0_i32_1 = arith.constant 0 : i32
    return %c0_i32, %c0_i32_0 : i32, i32
  }
}

</mosaic_0001>

<bundles_post_ra>
// kernel: classifier_forward.1
= control target key start
LH: loop header
LB: loop body
LE: loop exit
PB: predicated region body
PF: predicated region fallthrough
CT: control target
= control target key end

     0   :  { %12 = vsyncpa [#allocation4], 0  ;;  %s16251_s24 = smov 0   ;;  %s17582_s0 = inlined_call_operand.vmem [shape: f32[2,100608], index: 0, kind: input, shape index: {}]   ;;  %s17583_s1 = inlined_call_operand.vmem [shape: bf16[100608,64], index: 1, kind: input, shape index: {}]   ;;  %s17584_s2 = inlined_call_operand.vmem [shape: f32[1,64], index: 2, kind: input, shape index: {}]   ;;  %s17585_s3 = inlined_call_operand.vmem [shape: f32[64,32], index: 3, kind: input, shape index: {}]   ;;  %s17586_s4 = inlined_call_operand.vmem [shape: f32[1,32], index: 4, kind: input, shape index: {}]   ;;  %s17587_s5 = inlined_call_operand.vmem [shape: f32[32,4], index: 5, kind: input, shape index: {}]   ;;  %s17588_s6 = inlined_call_operand.vmem [shape: f32[1,4], index: 6, kind: input, shape index: {}]   ;;  %s17589_s7 = inlined_call_operand.hbm [shape: f32[2,4], index: 7, kind: output, shape index: {}]  }
   0x1 LB: > { %s16257_s25 = sadd.s32 4294967295, %s16201_s24   ;;  %p12475_p0 = scmp.ge.s32.totalorder %s16201_s24, 1  ;;  %s16201_s24 = sphi %s16251_s24, %s18_s24  }
   0x2   : > { %p245_p1 = scmp.lt.s32.totalorder %s16201_s24, 7 }
   0x4   : > { %p246_p2 = pnand %p12475_p0, %p245_p1 }
   0x5   : > { %s277_s26 = smul.u32 (!%p246_p2), 131, %s16257_s25  ;;  %p12478_p5 = scmp.ne.s32.totalorder (!%p246_p2), %s16257_s25, 0 }
   0x6   : > { %249 = sbr.rel (%p246_p2) target bundleno = 2084 (0x824), region = 48 }
   0x7   : > { %s283_s27 = smul.u32 (!%p246_p2), 2096, %s16257_s25  ;;  %p278_p3 = scmp.lt.s32.totalorder (!%p246_p2), %s277_s26, 785 }
   0x9   : > { %p284_p4 = scmp.lt.s32.totalorder (!%p246_p2), %s283_s27, 12575 }
   0xd   : > { %s17591_s26 = smov (!%p278_p3, %s277_s26), 785  ;;  %s17593_s27 = smov (!%p284_p4, %s283_s27), 12575 }
   0xe   : > { %s12476_s28 = sshll.u32 %s17591_s26, 1  ;;  %s12477_s9 = sshll.u32 %s17593_s27, 2  ;;  %vm294_vm0 = vcmask (!%p12478_p5), 517120   ;;  %v16203_v0 = vmov (!%p12478_p5), 0.0  }
   0xf   : > { %s16266_s8 = scalar_lea.vmem %s17582_s0, %s12476_s28  ;;  %s16271_s12 = scalar_lea.vmem %s17583_s1, %s12477_s9  ;;  %295 = vst.msk [vmem:[#allocation2] sm:$0x3] (!%p12478_p5), %vm294_vm0, %v16203_v0 }
  0x10   : > { %293 = sbr.rel (%p12478_p5) target bundleno = 23 (0x17), region = 52 }
  0x17 PF: > { %v15080_v1 = vld [vmem:[%s16271_s12 + $0x40] sm:$0xff]   ;;  %v15084_v5 = vld [vmem:[%s16271_s12 + $0x48] sm:$0xff]   ;;  %v15088_v9 = vld [vmem:[%s16271_s12 + $0x50] sm:$0xff]   ;;  %v367_v29 = vlaneseq  ;;  %v16204_v37 = vmov 1983009808   ;;  %vm16206_vm1 = vmmov 0  }
  0x18   : > { %v15081_v2 = vld [vmem:[%s16271_s12 + $0xc0] sm:$0xff]   ;;  %13537 = vmatprep.subr.bf16.mxu0 %v15080_v1  ;;  %v15085_v6 = vld [vmem:[%s16271_s12 + $0xc8] sm:$0xff]   ;;  %v15089_v10 = vld [vmem:[%s16271_s12 + $0xd0] sm:$0xff]   ;;  %v365_v38 = vunpack.c.l.s4 %v16204_v37  ;;  %vm12210_vm2 = vcmask 517120   ;;  %p13527_p6 = scmp.ne.s32.totalorder %s16257_s25, 5 }
  0x19   : > { %v15082_v3 = vld [vmem:[%s16271_s12] sm:$0xff]   ;;  %13559 = vmatprep.subr.bf16.mxu1 %v15081_v2  ;;  %v15086_v7 = vld [vmem:[%s16271_s12 + $0x8] sm:$0xff]   ;;  %v15090_v11 = vld [vmem:[%s16271_s12 + $0x10] sm:$0xff]   ;;  %v368_v34 = vshrl.u32 %v367_v29, 7  ;;  %vm16208_vm3 = vmmov (!%p13527_p6), 0   ;;  %vm12241_vm4 = vcmask (!%p13527_p6), 523264  }
  0x1a   : > { %v15083_v4 = vld [vmem:[%s16271_s12 + $0x80] sm:$0xff]   ;;  %13538 = vmatpush3.bf16.msra.mxu0 %v15082_v3  ;;  %v15087_v8 = vld [vmem:[%s16271_s12 + $0x88] sm:$0xff]   ;;  %v15091_v12 = vld [vmem:[%s16271_s12 + $0x90] sm:$0xff]   ;;  %v366_v39 = vunpack.c.0.s8 %v365_v38  ;;  %vm12327_vm5 = vcmask (!%p13527_p6), 261120   ;;  %vm12401_vm6 = vcmask (!%p13527_p6), 25600  }
  0x1b   : > { %13560 = vmatpush3.bf16.msra.mxu1 %v15083_v4  ;;  %13539 = vmatprep.subr.bf16.mxu0 %v15084_v5  ;;  %v15092_v13 = vld [vmem:[%s16271_s12 + $0x58] sm:$0xff]   ;;  %v15096_v17 = vld [vmem:[%s16271_s12 + $0x60] sm:$0xff]   ;;  %v15100_v21 = vld [vmem:[%s16271_s12 + $0x68] sm:$0xff]  }
  0x1c   : > { %13561 = vmatprep.subr.bf16.mxu1 %v15085_v6  ;;  %v15093_v14 = vld [vmem:[%s16271_s12 + $0xd8] sm:$0xff]   ;;  %v15097_v18 = vld [vmem:[%s16271_s12 + $0xe0] sm:$0xff]   ;;  %v15101_v22 = vld [vmem:[%s16271_s12 + $0xe8] sm:$0xff]   ;;  %v16309_v42 = vsub.s32 %v366_v39, %v368_v34 }
  0x1d   : > { %v15094_v15 = vld [vmem:[%s16271_s12 + $0x18] sm:$0xff]   ;;  %v15098_v19 = vld [vmem:[%s16271_s12 + $0x20] sm:$0xff]   ;;  %v15102_v23 = vld [vmem:[%s16271_s12 + $0x28] sm:$0xff]  }
  0x1e   : > { %13540 = vmatpush3.bf16.msra.mxu0 %v15086_v7  ;;  %v15095_v16 = vld [vmem:[%s16271_s12 + $0x98] sm:$0xff]   ;;  %v15099_v20 = vld [vmem:[%s16271_s12 + $0xa0] sm:$0xff]   ;;  %v15103_v24 = vld [vmem:[%s16271_s12 + $0xa8] sm:$0xff]  }
  0x1f   : > { %13562 = vmatpush3.bf16.msra.mxu1 %v15087_v8  ;;  %13541 = vmatprep.subr.bf16.mxu0 %v15088_v9  ;;  %v15104_v25 = vld [vmem:[%s16271_s12 + $0x70] sm:$0xff]   ;;  %v15108_v30 = vld [vmem:[%s16271_s12 + $0x78] sm:$0xff]   ;;  %v297_v35 = vld [vmem:[%s16266_s8] sm:$0xff] }
  0x20   : > { %13563 = vmatprep.subr.bf16.mxu1 %v15089_v10  ;;  %v15105_v26 = vld [vmem:[%s16271_s12 + $0xf0] sm:$0xff]   ;;  %v15109_v31 = vld [vmem:[%s16271_s12 + $0xf8] sm:$0xff]   ;;  %v15113_v36 = vld [vmem:[%s16271_s12 + $0x140] sm:$0xff]   ;;  %v363_v40 = vcombine.high %v297_v35, %v297_v35  ;;  %v370_v43 = vrot.slane %v297_v35, %v16309_v42 }
  0x21   : > { %v15106_v27 = vld [vmem:[%s16271_s12 + $0x30] sm:$0xff]   ;;  %v15110_v32 = vld [vmem:[%s16271_s12 + $0x38] sm:$0xff]   ;;  %v15115_v41 = vld [vmem:[%s16271_s12 + $0x1c0] sm:$0xff]  }
  0x22   : > { %13542 = vmatpush3.bf16.msra.mxu0 %v15090_v11  ;;  %v15107_v28 = vld [vmem:[%s16271_s12 + $0xb0] sm:$0xff]   ;;  %v15111_v33 = vld [vmem:[%s16271_s12 + $0xb8] sm:$0xff]   ;;  %v377_v44 = vrot.slane %v363_v40, %v16309_v42  ;;  %v378_v45 = vcombine.high %v370_v43, %v370_v43  ;;  %v15114_v47 = vld [vmem:[%s16271_s12 + $0x100] sm:$0xff]   ;;  %v1054_v48 = vpack.c.bf16 %v370_v43, %v370_v43 }
  0x23   : > { %13564 = vmatpush3.bf16.msra.mxu1 %v15091_v12  ;;  %13543 = vmatprep.subr.bf16.mxu0 %v15092_v13  ;;  %v15116_v50 = vld [vmem:[%s16271_s12 + $0x180] sm:$0xff]   ;;  %v15117_v53 = vld [vmem:[%s16271_s12 + $0x148] sm:$0xff]   ;;  %v15121_v57 = vld [vmem:[%s16271_s12 + $0x150] sm:$0xff]  }
  0x24   : > { %13565 = vmatprep.subr.bf16.mxu1 %v15093_v14  ;;  %v379_v46 = vcombine.high %v377_v44, %v377_v44  ;;  %v1056_v49 = vpack.c.bf16 %v377_v44, %v377_v44  ;;  %v1055_v51 = vpack.c.bf16 %v378_v45, %v378_v45  ;;  %v15119_v54 = vld [vmem:[%s16271_s12 + $0x1c8] sm:$0xff]   ;;  %v15123_v58 = vld [vmem:[%s16271_s12 + $0x1d0] sm:$0xff]   ;;  %v15125_v61 = vld [vmem:[%s16271_s12 + $0x158] sm:$0xff]  }
  0x25   : > { %v15118_v55 = vld [vmem:[%s16271_s12 + $0x108] sm:$0xff]   ;;  %v15122_v59 = vld [vmem:[%s16271_s12 + $0x110] sm:$0xff]   ;;  %v15127_v62 = vld [vmem:[%s16271_s12 + $0x1d8] sm:$0xff]  }
  0x26   : > { %13544 = vmatpush3.bf16.msra.mxu0 %v15094_v15  ;;  %v1057_v52 = vpack.c.bf16 %v379_v46, %v379_v46  ;;  %9601 = vmatprep.mubr.bf16.mxu0 %v1055_v51  ;;  %v15120_v56 = vld [vmem:[%s16271_s12 + $0x188] sm:$0xff]   ;;  %v15124_v60 = vld [vmem:[%s16271_s12 + $0x190] sm:$0xff]   ;;  %v15126_v63 = vld [vmem:[%s16271_s12 + $0x118] sm:$0xff]  }
  0x27   : > { %13566 = vmatpush3.bf16.msra.mxu1 %v15095_v16  ;;  %13545 = vmatprep.subr.bf16.mxu0 %v15096_v17  ;;  %v15128_v0 = vld [vmem:[%s16271_s12 + $0x198] sm:$0xff]   ;;  %v15129_v1 = vld [vmem:[%s16271_s12 + $0x160] sm:$0xff]   ;;  %v15133_v5 = vld [vmem:[%s16271_s12 + $0x168] sm:$0xff]  }
  0x28   : > { %13567 = vmatprep.subr.bf16.mxu1 %v15097_v18  ;;  %9641 = vmatprep.mubr.bf16.mxu1 %v1057_v52  ;;  %v15131_v2 = vld [vmem:[%s16271_s12 + $0x1e0] sm:$0xff]   ;;  %v15135_v6 = vld [vmem:[%s16271_s12 + $0x1e8] sm:$0xff]   ;;  %v15137_v9 = vld [vmem:[%s16271_s12 + $0x170] sm:$0xff]  }
  0x29   : > { %v15130_v3 = vld [vmem:[%s16271_s12 + $0x120] sm:$0xff]   ;;  %v15134_v7 = vld [vmem:[%s16271_s12 + $0x128] sm:$0xff]   ;;  %v15139_v11 = vld [vmem:[%s16271_s12 + $0x1f0] sm:$0xff]  }
  0x2a   : > { %13546 = vmatpush3.bf16.msra.mxu0 %v15098_v19  ;;  %v15132_v4 = vld [vmem:[%s16271_s12 + $0x1a0] sm:$0xff]   ;;  %v15136_v8 = vld [vmem:[%s16271_s12 + $0x1a8] sm:$0xff]   ;;  %v15138_v14 = vld [vmem:[%s16271_s12 + $0x130] sm:$0xff]  }
  0x2b   : > { %13568 = vmatpush3.bf16.msra.mxu1 %v15099_v20  ;;  %13547 = vmatprep.subr.bf16.mxu0 %v15100_v21  ;;  %v298_v10 = vld [vmem:[%s16266_s8 + $0x8] sm:$0xff]  ;;  %v15140_v15 = vld [vmem:[%s16271_s12 + $0x1b0] sm:$0xff]   ;;  %v15141_v18 = vld [vmem:[%s16271_s12 + $0x178] sm:$0xff]  }
  0x2c   : > { %13569 = vmatprep.subr.bf16.mxu1 %v15101_v22  ;;  %v387_v12 = vrot.slane %v298_v10, %v16309_v42  ;;  %v380_v13 = vcombine.high %v298_v10, %v298_v10  ;;  %v15143_v19 = vld [vmem:[%s16271_s12 + $0x1f8] sm:$0xff]   ;;  %v15153_v34 = vld [vmem:[%s16271_s12 + $0x288] sm:$0xff]   ;;  %v15154_v35 = vld [vmem:[%s16271_s12 + $0x250] sm:$0xff]  }
  0x2d   : > { %v15142_v22 = vld [vmem:[%s16271_s12 + $0x138] sm:$0xff]   ;;  %v15155_v37 = vld [vmem:[%s16271_s12 + $0x210] sm:$0xff]   ;;  %v15162_v44 = vld [vmem:[%s16271_s12 + $0x260] sm:$0xff]  }
  0x2e   : > { %13548 = vmatpush3.bf16.msra.mxu0 %v15102_v23  ;;  %v395_v16 = vcombine.high %v387_v12, %v387_v12  ;;  %v394_v17 = vrot.slane %v380_v13, %v16309_v42  ;;  %v15144_v23 = vld [vmem:[%s16271_s12 + $0x1b8] sm:$0xff]   ;;  %v15157_v38 = vld [vmem:[%s16271_s12 + $0x290] sm:$0xff]   ;;  %v15164_v45 = vld [vmem:[%s16271_s12 + $0x2e0] sm:$0xff]  }
  0x2f   : > { %13570 = vmatpush3.bf16.msra.mxu1 %v15103_v24  ;;  %13549 = vmatprep.subr.bf16.mxu0 %v15104_v25  ;;  %v15145_v25 = vld [vmem:[%s16271_s12 + $0x240] sm:$0xff]   ;;  %v15158_v39 = vld [vmem:[%s16271_s12 + $0x258] sm:$0xff]   ;;  %v15169_v51 = vld [vmem:[%s16271_s12 + $0x2a8] sm:$0xff]  }
  0x30   : > { %13571 = vmatprep.subr.bf16.mxu1 %v15105_v26  ;;  %v1059_v20 = vpack.c.bf16 %v395_v16, %v395_v16  ;;  %v396_v21 = vcombine.high %v394_v17, %v394_v17  ;;  %v15148_v26 = vld [vmem:[%s16271_s12 + $0x2c0] sm:$0xff]   ;;  %v1060_v29 = vpack.c.bf16 %v394_v17, %v394_v17  ;;  %v15160_v40 = vld [vmem:[%s16271_s12 + $0x2d8] sm:$0xff]   ;;  %v15170_v52 = vld [vmem:[%s16271_s12 + $0x270] sm:$0xff]  }
  0x31   : > { %v15161_v43 = vld [vmem:[%s16271_s12 + $0x298] sm:$0xff]   ;;  %v15163_v46 = vld [vmem:[%s16271_s12 + $0x220] sm:$0xff]   ;;  %v15183_v10 = vld [vmem:[%s16271_s12 + $0x348] sm:$0xff]  }
  0x32   : > { %13550 = vmatpush3.bf16.msra.mxu0 %v15106_v27  ;;  %v1061_v24 = vpack.c.bf16 %v396_v21, %v396_v21  ;;  %v15147_v27 = vld [vmem:[%s16271_s12 + $0x200] sm:$0xff]   ;;  %v15186_v13 = vld [vmem:[%s16271_s12 + $0x388] sm:$0xff]   ;;  %v15188_v16 = vld [vmem:[%s16271_s12 + $0x310] sm:$0xff]  }
  0x33   : > { %13572 = vmatpush3.bf16.msra.mxu1 %v15107_v28  ;;  %13551 = vmatprep.subr.bf16.mxu0 %v15108_v30  ;;  %v1058_v28 = vpack.c.bf16 %v387_v12, %v387_v12  ;;  %v15149_v30 = vld [vmem:[%s16271_s12 + $0x280] sm:$0xff]   ;;  %v15184_v12 = vld [vmem:[%s16271_s12 + $0x308] sm:$0xff]   ;;  %v15190_v17 = vld [vmem:[%s16271_s12 + $0x390] sm:$0xff]  }
  0x34   : > { %13573 = vmatprep.subr.bf16.mxu1 %v15109_v31  ;;  %v15150_v31 = vld [vmem:[%s16271_s12 + $0x248] sm:$0xff]   ;;  %v15194_v21 = vld [vmem:[%s16271_s12 + $0x398] sm:$0xff]  }
  0x36   : > { %13552 = vmatpush3.bf16.msra.mxu0 %v15110_v32  ;;  %v15152_v32 = vld [vmem:[%s16271_s12 + $0x2c8] sm:$0xff]  }
  0x37   : > { %13574 = vmatpush3.bf16.msra.mxu1 %v15111_v33  ;;  %13581 = vmatprep.subr.bf16.mxu0 %v15113_v36  ;;  %v15151_v33 = vld [vmem:[%s16271_s12 + $0x208] sm:$0xff]   ;;  %v15156_v36 = vld [vmem:[%s16271_s12 + $0x2d0] sm:$0xff]  }
  0x38   : > { %13603 = vmatprep.subr.bf16.mxu1 %v15115_v41  ;;  %v15159_v41 = vld [vmem:[%s16271_s12 + $0x218] sm:$0xff]  }
  0x39   : > { %9602 = vmatmul.mubr.bf16.vlgmr.msra.gmra.mrb[0].mxu0 %v1054_v48  ;;  %v15166_v48 = vld [vmem:[%s16271_s12 + $0x268] sm:$0xff]  }
  0x3a   : > { %9642 = vmatmul.mubr.bf16.vlgmr.msra.gmra.mrb[0].mxu1 %v1056_v49  ;;  %13582 = vmatpush3.bf16.msra.mxu0 %v15114_v47  ;;  %v15165_v47 = vld [vmem:[%s16271_s12 + $0x2a0] sm:$0xff]   ;;  %v15168_v49 = vld [vmem:[%s16271_s12 + $0x2e8] sm:$0xff]  }
  0x3b   : > { %13604 = vmatpush3.bf16.msra.mxu1 %v15116_v50  ;;  %13583 = vmatprep.subr.bf16.mxu0 %v15117_v53  ;;  %v15167_v50 = vld [vmem:[%s16271_s12 + $0x228] sm:$0xff]   ;;  %v299_v53 = vld [vmem:[%s16266_s8 + $0x10] sm:$0xff] }
  0x3c   : > { %13605 = vmatprep.subr.bf16.mxu1 %v15119_v54  ;;  %9681 = vmatprep.mubr.bf16.mxu0 %v1059_v20  ;;  %v15172_v54 = vld [vmem:[%s16271_s12 + $0x2f0] sm:$0xff]   ;;  %v15192_v20 = vld [vmem:[%s16271_s12 + $0x318] sm:$0xff]  }
  0x3d   : > { %9721 = vmatprep.mubr.bf16.mxu1 %v1061_v24  ;;  %v15196_v24 = vld [vmem:[%s16271_s12 + $0x320] sm:$0xff]  }
  0x3e   : > { %13584 = vmatpush3.bf16.msra.mxu0 %v15118_v55  ;;  %v404_v55 = vrot.slane %v299_v53, %v16309_v42 }
  0x3f   : > { %13606 = vmatpush3.bf16.msra.mxu1 %v15120_v56  ;;  %13585 = vmatprep.subr.bf16.mxu0 %v15121_v57  ;;  %v397_v56 = vcombine.high %v299_v53, %v299_v53  ;;  %v15171_v57 = vld [vmem:[%s16271_s12 + $0x230] sm:$0xff]   ;;  %v15216_v53 = vld [vmem:[%s16271_s12 + $0x448] sm:$0xff]  }
  0x40   : > { %13607 = vmatprep.subr.bf16.mxu1 %v15123_v58  ;;  %v15173_v58 = vld [vmem:[%s16271_s12 + $0x2b0] sm:$0xff]  }
  0x42   : > { %13586 = vmatpush3.bf16.msra.mxu0 %v15122_v59  ;;  %v412_v59 = vcombine.high %v404_v55, %v404_v55 }
  0x43   : > { %13608 = vmatpush3.bf16.msra.mxu1 %v15124_v60  ;;  %13587 = vmatprep.subr.bf16.mxu0 %v15125_v61  ;;  %v411_v60 = vrot.slane %v397_v56, %v16309_v42  ;;  %v15174_v61 = vld [vmem:[%s16271_s12 + $0x278] sm:$0xff]   ;;  %v15219_v56 = vld [vmem:[%s16271_s12 + $0x488] sm:$0xff]  }
  0x44   : > { %13609 = vmatprep.subr.bf16.mxu1 %v15127_v62  ;;  %v15176_v62 = vld [vmem:[%s16271_s12 + $0x2f8] sm:$0xff]  }
  0x46   : > { %13588 = vmatpush3.bf16.msra.mxu0 %v15126_v63  ;;  %v1063_v63 = vpack.c.bf16 %v412_v59, %v412_v59  ;;  %v15221_v59 = vld [vmem:[%s16271_s12 + $0x410] sm:$0xff]  }
  0x47   : > { %13610 = vmatpush3.bf16.msra.mxu1 %v15128_v0  ;;  %13589 = vmatprep.subr.bf16.mxu0 %v15129_v1  ;;  %v413_v0 = vcombine.high %v411_v60, %v411_v60  ;;  %v15175_v1 = vld [vmem:[%s16271_s12 + $0x238] sm:$0xff]  }
  0x48   : > { %13611 = vmatprep.subr.bf16.mxu1 %v15131_v2  ;;  %v15177_v2 = vld [vmem:[%s16271_s12 + $0x2b8] sm:$0xff]  }
  0x4a   : > { %13590 = vmatpush3.bf16.msra.mxu0 %v15130_v3  ;;  %v1065_v3 = vpack.c.bf16 %v413_v0, %v413_v0  ;;  %v15227_v0 = vld [vmem:[%s16271_s12 + $0x498] sm:$0xff]  }
  0x4b   : > { %13612 = vmatpush3.bf16.msra.mxu1 %v15132_v4  ;;  %13591 = vmatprep.subr.bf16.mxu0 %v15133_v5  ;;  %v15178_v4 = vld [vmem:[%s16271_s12 + $0x340] sm:$0xff]  }
  0x4c   : > { %13613 = vmatprep.subr.bf16.mxu1 %v15135_v6  ;;  %v15181_v5 = vld [vmem:[%s16271_s12 + $0x3c0] sm:$0xff]  }
  0x4d   : > { %v15180_v6 = vld [vmem:[%s16271_s12 + $0x300] sm:$0xff]  }
  0x4e   : > { %13592 = vmatpush3.bf16.msra.mxu0 %v15134_v7  ;;  %v1062_v7 = vpack.c.bf16 %v404_v55, %v404_v55  ;;  %v15217_v55 = vld [vmem:[%s16271_s12 + $0x408] sm:$0xff]  }
  0x4f   : > { %13614 = vmatpush3.bf16.msra.mxu1 %v15136_v8  ;;  %13593 = vmatprep.subr.bf16.mxu0 %v15137_v9  ;;  %v1064_v8 = vpack.c.bf16 %v411_v60, %v411_v60  ;;  %v15182_v9 = vld [vmem:[%s16271_s12 + $0x380] sm:$0xff]   ;;  %v15223_v60 = vld [vmem:[%s16271_s12 + $0x490] sm:$0xff]  }
  0x50   : > { %13615 = vmatprep.subr.bf16.mxu1 %v15139_v11  ;;  %v15185_v11 = vld [vmem:[%s16271_s12 + $0x3c8] sm:$0xff]  }
  0x52   : > { %13594 = vmatpush3.bf16.msra.mxu0 %v15138_v14  ;;  %v15187_v14 = vld [vmem:[%s16271_s12 + $0x350] sm:$0xff]  }
  0x53   : > { %13616 = vmatpush3.bf16.msra.mxu1 %v15140_v15  ;;  %13595 = vmatprep.subr.bf16.mxu0 %v15141_v18  ;;  %v15189_v15 = vld [vmem:[%s16271_s12 + $0x3d0] sm:$0xff]   ;;  %v15191_v18 = vld [vmem:[%s16271_s12 + $0x358] sm:$0xff]  }
  0x54   : > { %13617 = vmatprep.subr.bf16.mxu1 %v15143_v19  ;;  %v15193_v19 = vld [vmem:[%s16271_s12 + $0x3d8] sm:$0xff]  }
  0x56   : > { %13596 = vmatpush3.bf16.msra.mxu0 %v15142_v22  ;;  %v15195_v22 = vld [vmem:[%s16271_s12 + $0x360] sm:$0xff]  }
  0x57   : > { %13618 = vmatpush3.bf16.msra.mxu1 %v15144_v23  ;;  %13625 = vmatprep.subr.bf16.mxu0 %v15145_v25  ;;  %v15197_v23 = vld [vmem:[%s16271_s12 + $0x3e0] sm:$0xff]  }
  0x58   : > { %13647 = vmatprep.subr.bf16.mxu1 %v15148_v26  ;;  %v15198_v25 = vld [vmem:[%s16271_s12 + $0x3a0] sm:$0xff]   ;;  %v15199_v26 = vld [vmem:[%s16271_s12 + $0x368] sm:$0xff]  }
  0x59   : > { %9682 = vmatmul.mubr.bf16.vlgmr.msra.gmra.mrb[4].mxu0 %v1058_v28  ;;  %v15200_v28 = vld [vmem:[%s16271_s12 + $0x328] sm:$0xff]  }
  0x5a   : > { %9722 = vmatmul.mubr.bf16.vlgmr.msra.gmra.mrb[4].mxu1 %v1060_v29  ;;  %13626 = vmatpush3.bf16.msra.mxu0 %v15147_v27  ;;  %v15201_v27 = vld [vmem:[%s16271_s12 + $0x3e8] sm:$0xff]  }
  0x5b   : > { %13648 = vmatpush3.bf16.msra.mxu1 %v15149_v30  ;;  %13627 = vmatprep.subr.bf16.mxu0 %v15150_v31  ;;  %v15202_v29 = vld [vmem:[%s16271_s12 + $0x3a8] sm:$0xff]   ;;  %v15203_v30 = vld [vmem:[%s16271_s12 + $0x370] sm:$0xff]  }
  0x5c   : > { %13649 = vmatprep.subr.bf16.mxu1 %v15152_v32  ;;  %9761 = vmatprep.mubr.bf16.mxu0 %v1063_v63  ;;  %v15205_v31 = vld [vmem:[%s16271_s12 + $0x3f0] sm:$0xff]   ;;  %v300_v32 = vld [vmem:[%s16266_s8 + $0x18] sm:$0xff] }
  0x5d   : > { %9801 = vmatprep.mubr.bf16.mxu1 %v1065_v3  ;;  %v15225_v63 = vld [vmem:[%s16271_s12 + $0x418] sm:$0xff]   ;;  %v15229_v3 = vld [vmem:[%s16271_s12 + $0x420] sm:$0xff]  }
  0x5e   : > { %13628 = vmatpush3.bf16.msra.mxu0 %v15151_v33  ;;  %v15204_v33 = vld [vmem:[%s16271_s12 + $0x330] sm:$0xff]  }
  0x5f   : > { %13650 = vmatpush3.bf16.msra.mxu1 %v15153_v34  ;;  %13629 = vmatprep.subr.bf16.mxu0 %v15154_v35  ;;  %v421_v34 = vrot.slane %v300_v32, %v16309_v42  ;;  %v414_v35 = vcombine.high %v300_v32, %v300_v32  ;;  %v15251_v32 = vld [vmem:[%s16271_s12 + $0x5c8] sm:$0xff]  }
  0x60   : > { %13651 = vmatprep.subr.bf16.mxu1 %v15156_v36  ;;  %v15206_v36 = vld [vmem:[%s16271_s12 + $0x3b0] sm:$0xff]  }
  0x62   : > { %13630 = vmatpush3.bf16.msra.mxu0 %v15155_v37  ;;  %v15207_v37 = vld [vmem:[%s16271_s12 + $0x378] sm:$0xff]  }
  0x63   : > { %13652 = vmatpush3.bf16.msra.mxu1 %v15157_v38  ;;  %13631 = vmatprep.subr.bf16.mxu0 %v15158_v39  ;;  %v429_v38 = vcombine.high %v421_v34, %v421_v34  ;;  %v428_v39 = vrot.slane %v414_v35, %v16309_v42  ;;  %v15253_v35 = vld [vmem:[%s16271_s12 + $0x550] sm:$0xff]  }
  0x64   : > { %13653 = vmatprep.subr.bf16.mxu1 %v15160_v40  ;;  %v15209_v40 = vld [vmem:[%s16271_s12 + $0x3f8] sm:$0xff]  }
  0x66   : > { %13632 = vmatpush3.bf16.msra.mxu0 %v15159_v41  ;;  %v15208_v41 = vld [vmem:[%s16271_s12 + $0x338] sm:$0xff]  }
  0x67   : > { %13654 = vmatpush3.bf16.msra.mxu1 %v15161_v43  ;;  %13633 = vmatprep.subr.bf16.mxu0 %v15162_v44  ;;  %v1067_v43 = vpack.c.bf16 %v429_v38, %v429_v38  ;;  %v430_v44 = vcombine.high %v428_v39, %v428_v39  ;;  %v15256_v38 = vld [vmem:[%s16271_s12 + $0x590] sm:$0xff]  }
  0x68   : > { %13655 = vmatprep.subr.bf16.mxu1 %v15164_v45  ;;  %v15210_v45 = vld [vmem:[%s16271_s12 + $0x3b8] sm:$0xff]  }
  0x6a   : > { %13634 = vmatpush3.bf16.msra.mxu0 %v15163_v46  ;;  %v15211_v46 = vld [vmem:[%s16271_s12 + $0x440] sm:$0xff]  }
  0x6b   : > { %13656 = vmatpush3.bf16.msra.mxu1 %v15165_v47  ;;  %13635 = vmatprep.subr.bf16.mxu0 %v15166_v48  ;;  %v1069_v47 = vpack.c.bf16 %v430_v44, %v430_v44  ;;  %v15214_v48 = vld [vmem:[%s16271_s12 + $0x4c0] sm:$0xff]  }
  0x6c   : > { %13657 = vmatprep.subr.bf16.mxu1 %v15168_v49  ;;  %v15213_v49 = vld [vmem:[%s16271_s12 + $0x400] sm:$0xff]  }
  0x6d   : > { %v15261_v44 = vld [vmem:[%s16271_s12 + $0x560] sm:$0xff]  }
  0x6e   : > { %13636 = vmatpush3.bf16.msra.mxu0 %v15167_v50  ;;  %v1066_v50 = vpack.c.bf16 %v421_v34, %v421_v34  ;;  %v15252_v34 = vld [vmem:[%s16271_s12 + $0x588] sm:$0xff]  }
  0x6f   : > { %13658 = vmatpush3.bf16.msra.mxu1 %v15169_v51  ;;  %13637 = vmatprep.subr.bf16.mxu0 %v15170_v52  ;;  %v1068_v51 = vpack.c.bf16 %v428_v39, %v428_v39  ;;  %v15215_v52 = vld [vmem:[%s16271_s12 + $0x480] sm:$0xff]   ;;  %v15257_v39 = vld [vmem:[%s16271_s12 + $0x558] sm:$0xff]  }
  0x70   : > { %13659 = vmatprep.subr.bf16.mxu1 %v15172_v54  ;;  %v15218_v54 = vld [vmem:[%s16271_s12 + $0x4c8] sm:$0xff]  }
  0x72   : > { %13638 = vmatpush3.bf16.msra.mxu0 %v15171_v57  ;;  %v15220_v57 = vld [vmem:[%s16271_s12 + $0x450] sm:$0xff]  }
  0x73   : > { %13660 = vmatpush3.bf16.msra.mxu1 %v15173_v58  ;;  %13639 = vmatprep.subr.bf16.mxu0 %v15174_v61  ;;  %v15222_v58 = vld [vmem:[%s16271_s12 + $0x4d0] sm:$0xff]   ;;  %v15224_v61 = vld [vmem:[%s16271_s12 + $0x458] sm:$0xff]  }
  0x74   : > { %13661 = vmatprep.subr.bf16.mxu1 %v15176_v62  ;;  %v15226_v62 = vld [vmem:[%s16271_s12 + $0x4d8] sm:$0xff]  }
  0x76   : > { %13640 = vmatpush3.bf16.msra.mxu0 %v15175_v1  ;;  %v15228_v1 = vld [vmem:[%s16271_s12 + $0x460] sm:$0xff]  }
  0x77   : > { %13662 = vmatpush3.bf16.msra.mxu1 %v15177_v2  ;;  %13669 = vmatprep.subr.bf16.mxu0 %v15178_v4  ;;  %v15230_v2 = vld [vmem:[%s16271_s12 + $0x4e0] sm:$0xff]  }
  0x78   : > { %13691 = vmatprep.subr.bf16.mxu1 %v15181_v5  ;;  %v15231_v4 = vld [vmem:[%s16271_s12 + $0x4a0] sm:$0xff]   ;;  %v15232_v5 = vld [vmem:[%s16271_s12 + $0x468] sm:$0xff]  }
  0x79   : > { %9762 = vmatmul.mubr.bf16.vlgmr.msra.gmra.mrb[8].mxu0 %v1062_v7  ;;  %v15233_v7 = vld [vmem:[%s16271_s12 + $0x428] sm:$0xff]  }
  0x7a   : > { %9802 = vmatmul.mubr.bf16.vlgmr.msra.gmra.mrb[8].mxu1 %v1064_v8  ;;  %13670 = vmatpush3.bf16.msra.mxu0 %v15180_v6  ;;  %v15234_v6 = vld [vmem:[%s16271_s12 + $0x4e8] sm:$0xff]  }
  0x7b   : > { %13692 = vmatpush3.bf16.msra.mxu1 %v15182_v9  ;;  %13671 = vmatprep.subr.bf16.mxu0 %v15183_v10  ;;  %v15235_v8 = vld [vmem:[%s16271_s12 + $0x4a8] sm:$0xff]   ;;  %v15236_v9 = vld [vmem:[%s16271_s12 + $0x470] sm:$0xff]  }
  0x7c   : > { %13693 = vmatprep.subr.bf16.mxu1 %v15185_v11  ;;  %9841 = vmatprep.mubr.bf16.mxu0 %v1067_v43  ;;  %v15238_v10 = vld [vmem:[%s16271_s12 + $0x4f0] sm:$0xff]   ;;  %v301_v11 = vld [vmem:[%s16266_s8 + $0x20] sm:$0xff]  ;;  %v15260_v43 = vld [vmem:[%s16271_s12 + $0x598] sm:$0xff]  }
  0x7d   : > { %9881 = vmatprep.mubr.bf16.mxu1 %v1069_v47  ;;  %v15264_v47 = vld [vmem:[%s16271_s12 + $0x5a0] sm:$0xff]  }
  0x7e   : > { %13672 = vmatpush3.bf16.msra.mxu0 %v15184_v12  ;;  %v15237_v12 = vld [vmem:[%s16271_s12 + $0x430] sm:$0xff]  }
  0x7f   : > { %13694 = vmatpush3.bf16.msra.mxu1 %v15186_v13  ;;  %13673 = vmatprep.subr.bf16.mxu0 %v15187_v14  ;;  %v438_v13 = vrot.slane %v301_v11, %v16309_v42  ;;  %v431_v14 = vcombine.high %v301_v11, %v301_v11  ;;  %v15284_v11 = vld [vmem:[%s16271_s12 + $0x6c8] sm:$0xff]  }
  0x80   : > { %13695 = vmatprep.subr.bf16.mxu1 %v15189_v15  ;;  %v15239_v15 = vld [vmem:[%s16271_s12 + $0x4b0] sm:$0xff]  }
  0x82   : > { %13674 = vmatpush3.bf16.msra.mxu0 %v15188_v16  ;;  %v15240_v16 = vld [vmem:[%s16271_s12 + $0x478] sm:$0xff]  }
  0x83   : > { %13696 = vmatpush3.bf16.msra.mxu1 %v15190_v17  ;;  %13675 = vmatprep.subr.bf16.mxu0 %v15191_v18  ;;  %v446_v17 = vcombine.high %v438_v13, %v438_v13  ;;  %v445_v18 = vrot.slane %v431_v14, %v16309_v42  ;;  %v15286_v14 = vld [vmem:[%s16271_s12 + $0x650] sm:$0xff]  }
  0x84   : > { %13697 = vmatprep.subr.bf16.mxu1 %v15193_v19  ;;  %v15242_v19 = vld [vmem:[%s16271_s12 + $0x4f8] sm:$0xff]  }
  0x86   : > { %13676 = vmatpush3.bf16.msra.mxu0 %v15192_v20  ;;  %v15241_v20 = vld [vmem:[%s16271_s12 + $0x438] sm:$0xff]  }
  0x87   : > { %13698 = vmatpush3.bf16.msra.mxu1 %v15194_v21  ;;  %13677 = vmatprep.subr.bf16.mxu0 %v15195_v22  ;;  %v1071_v21 = vpack.c.bf16 %v446_v17, %v446_v17  ;;  %v447_v22 = vcombine.high %v445_v18, %v445_v18  ;;  %v15289_v17 = vld [vmem:[%s16271_s12 + $0x690] sm:$0xff]  }
  0x88   : > { %13699 = vmatprep.subr.bf16.mxu1 %v15197_v23  ;;  %v15243_v23 = vld [vmem:[%s16271_s12 + $0x4b8] sm:$0xff]  }
  0x8a   : > { %13678 = vmatpush3.bf16.msra.mxu0 %v15196_v24  ;;  %v15244_v24 = vld [vmem:[%s16271_s12 + $0x540] sm:$0xff]  }
  0x8b   : > { %13700 = vmatpush3.bf16.msra.mxu1 %v15198_v25  ;;  %13679 = vmatprep.subr.bf16.mxu0 %v15199_v26  ;;  %v1073_v25 = vpack.c.bf16 %v447_v22, %v447_v22  ;;  %v15247_v26 = vld [vmem:[%s16271_s12 + $0x5c0] sm:$0xff]  }
  0x8c   : > { %13701 = vmatprep.subr.bf16.mxu1 %v15201_v27  ;;  %v15246_v27 = vld [vmem:[%s16271_s12 + $0x500] sm:$0xff]  }
  0x8d   : > { %v15294_v22 = vld [vmem:[%s16271_s12 + $0x660] sm:$0xff]  }
  0x8e   : > { %13680 = vmatpush3.bf16.msra.mxu0 %v15200_v28  ;;  %v1070_v28 = vpack.c.bf16 %v438_v13, %v438_v13  ;;  %v15285_v13 = vld [vmem:[%s16271_s12 + $0x688] sm:$0xff]  }
  0x8f   : > { %13702 = vmatpush3.bf16.msra.mxu1 %v15202_v29  ;;  %13681 = vmatprep.subr.bf16.mxu0 %v15203_v30  ;;  %v1072_v29 = vpack.c.bf16 %v445_v18, %v445_v18  ;;  %v15248_v30 = vld [vmem:[%s16271_s12 + $0x580] sm:$0xff]   ;;  %v15290_v18 = vld [vmem:[%s16271_s12 + $0x658] sm:$0xff]  }
  0x90   : > { %13703 = vmatprep.subr.bf16.mxu1 %v15205_v31  ;;  %v15249_v31 = vld [vmem:[%s16271_s12 + $0x548] sm:$0xff]  }
  0x92   : > { %13682 = vmatpush3.bf16.msra.mxu0 %v15204_v33  ;;  %v15250_v33 = vld [vmem:[%s16271_s12 + $0x508] sm:$0xff]  }
  0x93   : > { %13704 = vmatpush3.bf16.msra.mxu1 %v15206_v36  ;;  %13683 = vmatprep.subr.bf16.mxu0 %v15207_v37  ;;  %v15255_v36 = vld [vmem:[%s16271_s12 + $0x5d0] sm:$0xff]  }
  0x94   : > { %13705 = vmatprep.subr.bf16.mxu1 %v15209_v40  ;;  %v15254_v37 = vld [vmem:[%s16271_s12 + $0x510] sm:$0xff]   ;;  %v15259_v40 = vld [vmem:[%s16271_s12 + $0x5d8] sm:$0xff]  }
  0x96   : > { %13684 = vmatpush3.bf16.msra.mxu0 %v15208_v41  ;;  %v15258_v41 = vld [vmem:[%s16271_s12 + $0x518] sm:$0xff]  }
  0x97   : > { %13706 = vmatpush3.bf16.msra.mxu1 %v15210_v45  ;;  %13713 = vmatprep.subr.bf16.mxu0 %v15211_v46  ;;  %v15263_v45 = vld [vmem:[%s16271_s12 + $0x5e0] sm:$0xff]  }
  0x98   : > { %13735 = vmatprep.subr.bf16.mxu1 %v15214_v48  ;;  %v15262_v46 = vld [vmem:[%s16271_s12 + $0x520] sm:$0xff]   ;;  %v15265_v48 = vld [vmem:[%s16271_s12 + $0x568] sm:$0xff]  }
  0x99   : > { %9842 = vmatmul.mubr.bf16.vlgmr.msra.gmra.mrb[12].mxu0 %v1066_v50  ;;  %v15266_v50 = vld [vmem:[%s16271_s12 + $0x528] sm:$0xff]  }
  0x9a   : > { %9882 = vmatmul.mubr.bf16.vlgmr.msra.gmra.mrb[12].mxu1 %v1068_v51  ;;  %13714 = vmatpush3.bf16.msra.mxu0 %v15213_v49  ;;  %v15267_v49 = vld [vmem:[%s16271_s12 + $0x5e8] sm:$0xff]  }
  0x9b   : > { %13736 = vmatpush3.bf16.msra.mxu1 %v15215_v52  ;;  %13715 = vmatprep.subr.bf16.mxu0 %v15216_v53  ;;  %v15268_v51 = vld [vmem:[%s16271_s12 + $0x5a8] sm:$0xff]   ;;  %v15269_v52 = vld [vmem:[%s16271_s12 + $0x570] sm:$0xff]  }
  0x9c   : > { %13737 = vmatprep.subr.bf16.mxu1 %v15218_v54  ;;  %9921 = vmatprep.mubr.bf16.mxu0 %v1071_v21  ;;  %v15271_v53 = vld [vmem:[%s16271_s12 + $0x5f0] sm:$0xff]   ;;  %v302_v54 = vld [vmem:[%s16266_s8 + $0x28] sm:$0xff]  ;;  %v15293_v21 = vld [vmem:[%s16271_s12 + $0x698] sm:$0xff]  }
  0x9d   : > { %9961 = vmatprep.mubr.bf16.mxu1 %v1073_v25  ;;  %v15297_v25 = vld [vmem:[%s16271_s12 + $0x6a0] sm:$0xff]  }
  0x9e   : > { %13716 = vmatpush3.bf16.msra.mxu0 %v15217_v55  ;;  %v15270_v55 = vld [vmem:[%s16271_s12 + $0x530] sm:$0xff]  }
  0x9f   : > { %13738 = vmatpush3.bf16.msra.mxu1 %v15219_v56  ;;  %13717 = vmatprep.subr.bf16.mxu0 %v15220_v57  ;;  %v455_v56 = vrot.slane %v302_v54, %v16309_v42  ;;  %v448_v57 = vcombine.high %v302_v54, %v302_v54  ;;  %v15317_v54 = vld [vmem:[%s16271_s12 + $0x7c8] sm:$0xff]  }
  0xa0   : > { %13739 = vmatprep.subr.bf16.mxu1 %v15222_v58  ;;  %v15272_v58 = vld [vmem:[%s16271_s12 + $0x5b0] sm:$0xff]  }
  0xa2   : > { %13718 = vmatpush3.bf16.msra.mxu0 %v15221_v59  ;;  %v15273_v59 = vld [vmem:[%s16271_s12 + $0x578] sm:$0xff]  }
  0xa3   : > { %13740 = vmatpush3.bf16.msra.mxu1 %v15223_v60  ;;  %13719 = vmatprep.subr.bf16.mxu0 %v15224_v61  ;;  %v463_v60 = vcombine.high %v455_v56, %v455_v56  ;;  %v462_v61 = vrot.slane %v448_v57, %v16309_v42  ;;  %v15319_v57 = vld [vmem:[%s16271_s12 + $0x750] sm:$0xff]  }
  0xa4   : > { %13741 = vmatprep.subr.bf16.mxu1 %v15226_v62  ;;  %v15275_v62 = vld [vmem:[%s16271_s12 + $0x5f8] sm:$0xff]  }
  0xa6   : > { %13720 = vmatpush3.bf16.msra.mxu0 %v15225_v63  ;;  %v15274_v63 = vld [vmem:[%s16271_s12 + $0x538] sm:$0xff]  }
  0xa7   : > { %13742 = vmatpush3.bf16.msra.mxu1 %v15227_v0  ;;  %13721 = vmatprep.subr.bf16.mxu0 %v15228_v1  ;;  %v1075_v0 = vpack.c.bf16 %v463_v60, %v463_v60  ;;  %v464_v1 = vcombine.high %v462_v61, %v462_v61  ;;  %v15322_v60 = vld [vmem:[%s16271_s12 + $0x790] sm:$0xff]  }
  0xa8   : > { %13743 = vmatprep.subr.bf16.mxu1 %v15230_v2  ;;  %v15276_v2 = vld [vmem:[%s16271_s12 + $0x5b8] sm:$0xff]  }
  0xaa   : > { %13722 = vmatpush3.bf16.msra.mxu0 %v15229_v3  ;;  %v15277_v3 = vld [vmem:[%s16271_s12 + $0x640] sm:$0xff]  }
  0xab   : > { %13744 = vmatpush3.bf16.msra.mxu1 %v15231_v4  ;;  %13723 = vmatprep.subr.bf16.mxu0 %v15232_v5  ;;  %v1077_v4 = vpack.c.bf16 %v464_v1, %v464_v1  ;;  %v15280_v5 = vld [vmem:[%s16271_s12 + $0x6c0] sm:$0xff]  }
  0xac   : > { %13745 = vmatprep.subr.bf16.mxu1 %v15234_v6  ;;  %v15279_v6 = vld [vmem:[%s16271_s12 + $0x600] sm:$0xff]  }
  0xad   : > { %v15327_v1 = vld [vmem:[%s16271_s12 + $0x760] sm:$0xff]  }
  0xae   : > { %13724 = vmatpush3.bf16.msra.mxu0 %v15233_v7  ;;  %v1074_v7 = vpack.c.bf16 %v455_v56, %v455_v56  ;;  %v15318_v56 = vld [vmem:[%s16271_s12 + $0x788] sm:$0xff]  }
  0xaf   : > { %13746 = vmatpush3.bf16.msra.mxu1 %v15235_v8  ;;  %13725 = vmatprep.subr.bf16.mxu0 %v15236_v9  ;;  %v1076_v8 = vpack.c.bf16 %v462_v61, %v462_v61  ;;  %v15281_v9 = vld [vmem:[%s16271_s12 + $0x680] sm:$0xff]   ;;  %v15323_v61 = vld [vmem:[%s16271_s12 + $0x758] sm:$0xff]  }
  0xb0   : > { %13747 = vmatprep.subr.bf16.mxu1 %v15238_v10  ;;  %v15282_v10 = vld [vmem:[%s16271_s12 + $0x648] sm:$0xff]  }
  0xb2   : > { %13726 = vmatpush3.bf16.msra.mxu0 %v15237_v12  ;;  %v15283_v12 = vld [vmem:[%s16271_s12 + $0x608] sm:$0xff]  }
  0xb3   : > { %13748 = vmatpush3.bf16.msra.mxu1 %v15239_v15  ;;  %13727 = vmatprep.subr.bf16.mxu0 %v15240_v16  ;;  %v15288_v15 = vld [vmem:[%s16271_s12 + $0x6d0] sm:$0xff]  }
  0xb4   : > { %13749 = vmatprep.subr.bf16.mxu1 %v15242_v19  ;;  %v15287_v16 = vld [vmem:[%s16271_s12 + $0x610] sm:$0xff]   ;;  %v15292_v19 = vld [vmem:[%s16271_s12 + $0x6d8] sm:$0xff]  }
  0xb6   : > { %13728 = vmatpush3.bf16.msra.mxu0 %v15241_v20  ;;  %v15291_v20 = vld [vmem:[%s16271_s12 + $0x618] sm:$0xff]  }
  0xb7   : > { %13750 = vmatpush3.bf16.msra.mxu1 %v15243_v23  ;;  %13757 = vmatprep.subr.bf16.mxu0 %v15244_v24  ;;  %v15296_v23 = vld [vmem:[%s16271_s12 + $0x6e0] sm:$0xff]  }
  0xb8   : > { %13779 = vmatprep.subr.bf16.mxu1 %v15247_v26  ;;  %v15295_v24 = vld [vmem:[%s16271_s12 + $0x620] sm:$0xff]   ;;  %v15298_v26 = vld [vmem:[%s16271_s12 + $0x668] sm:$0xff]  }
  0xb9   : > { %9922 = vmatmul.mubr.bf16.vlgmr.msra.gmra.mrb[16].mxu0 %v1070_v28  ;;  %v15299_v28 = vld [vmem:[%s16271_s12 + $0x628] sm:$0xff]  }
  0xba   : > { %9962 = vmatmul.mubr.bf16.vlgmr.msra.gmra.mrb[16].mxu1 %v1072_v29  ;;  %13758 = vmatpush3.bf16.msra.mxu0 %v15246_v27  ;;  %v15300_v27 = vld [vmem:[%s16271_s12 + $0x6e8] sm:$0xff]  }
  0xbb   : > { %13780 = vmatpush3.bf16.msra.mxu1 %v15248_v30  ;;  %13759 = vmatprep.subr.bf16.mxu0 %v15249_v31  ;;  %v15301_v29 = vld [vmem:[%s16271_s12 + $0x6a8] sm:$0xff]   ;;  %v15302_v30 = vld [vmem:[%s16271_s12 + $0x670] sm:$0xff]  }
  0xbc   : > { %13781 = vmatprep.subr.bf16.mxu1 %v15251_v32  ;;  %10001 = vmatprep.mubr.bf16.mxu0 %v1075_v0  ;;  %v15304_v31 = vld [vmem:[%s16271_s12 + $0x6f0] sm:$0xff]   ;;  %v15326_v0 = vld [vmem:[%s16271_s12 + $0x798] sm:$0xff]  }
  0xbd   : > { %10041 = vmatprep.mubr.bf16.mxu1 %v1077_v4  ;;  %v15303_v32 = vld [vmem:[%s16271_s12 + $0x630] sm:$0xff]   ;;  %v15330_v4 = vld [vmem:[%s16271_s12 + $0x7a0] sm:$0xff]  }
  0xbe   : > { %13760 = vmatpush3.bf16.msra.mxu0 %v15250_v33  ;;  %v303_v33 = vld [vmem:[%s16266_s8 + $0x30] sm:$0xff] }
  0xbf   : > { %13782 = vmatpush3.bf16.msra.mxu1 %v15252_v34  ;;  %13761 = vmatprep.subr.bf16.mxu0 %v15253_v35  ;;  %v15305_v34 = vld [vmem:[%s16271_s12 + $0x6b0] sm:$0xff]   ;;  %v472_v35 = vrot.slane %v303_v33, %v16309_v42 }
  0xc0   : > { %13783 = vmatprep.subr.bf16.mxu1 %v15255_v36  ;;  %v465_v36 = vcombine.high %v303_v33, %v303_v33  ;;  %v15342_v33 = vld [vmem:[%s16271_s12 + $0x7b8] sm:$0xff]  }
  0xc2   : > { %13762 = vmatpush3.bf16.msra.mxu0 %v15254_v37  ;;  %v15306_v37 = vld [vmem:[%s16271_s12 + $0x678] sm:$0xff]  }
  0xc3   : > { %13784 = vmatpush3.bf16.msra.mxu1 %v15256_v38  ;;  %13763 = vmatprep.subr.bf16.mxu0 %v15257_v39  ;;  %v15308_v38 = vld [vmem:[%s16271_s12 + $0x6f8] sm:$0xff]   ;;  %v480_v39 = vcombine.high %v472_v35, %v472_v35 }
  0xc4   : > { %13785 = vmatprep.subr.bf16.mxu1 %v15259_v40  ;;  %v479_v40 = vrot.slane %v465_v36, %v16309_v42 }
  0xc6   : > { %13764 = vmatpush3.bf16.msra.mxu0 %v15258_v41  ;;  %v15307_v41 = vld [vmem:[%s16271_s12 + $0x638] sm:$0xff]  }
  0xc7   : > { %13786 = vmatpush3.bf16.msra.mxu1 %v15260_v43  ;;  %13765 = vmatprep.subr.bf16.mxu0 %v15261_v44  ;;  %v1079_v43 = vpack.c.bf16 %v480_v39, %v480_v39  ;;  %v15309_v44 = vld [vmem:[%s16271_s12 + $0x6b8] sm:$0xff]  }
  0xc8   : > { %13787 = vmatprep.subr.bf16.mxu1 %v15263_v45  ;;  %v481_v45 = vcombine.high %v479_v40, %v479_v40 }
  0xca   : > { %13766 = vmatpush3.bf16.msra.mxu0 %v15262_v46  ;;  %v15310_v46 = vld [vmem:[%s16271_s12 + $0x740] sm:$0xff]  }
  0xcb   : > { %13788 = vmatpush3.bf16.msra.mxu1 %v15264_v47  ;;  %13767 = vmatprep.subr.bf16.mxu0 %v15265_v48  ;;  %v1081_v47 = vpack.c.bf16 %v481_v45, %v481_v45  ;;  %v15313_v48 = vld [vmem:[%s16271_s12 + $0x7c0] sm:$0xff]   ;;  %v15349_v45 = vld [vmem:[%s16271_s12 + $0x808] sm:$0xff]  }
  0xcc   : > { %13789 = vmatprep.subr.bf16.mxu1 %v15267_v49  ;;  %v15312_v49 = vld [vmem:[%s16271_s12 + $0x700] sm:$0xff]  }
  0xce   : > { %13768 = vmatpush3.bf16.msra.mxu0 %v15266_v50  ;;  %v1078_v50 = vpack.c.bf16 %v472_v35, %v472_v35  ;;  %v15343_v35 = vld [vmem:[%s16271_s12 + $0x840] sm:$0xff]  }
  0xcf   : > { %13790 = vmatpush3.bf16.msra.mxu1 %v15268_v51  ;;  %13769 = vmatprep.subr.bf16.mxu0 %v15269_v52  ;;  %v1080_v51 = vpack.c.bf16 %v479_v40, %v479_v40  ;;  %v15314_v52 = vld [vmem:[%s16271_s12 + $0x780] sm:$0xff]  }
  0xd0   : > { %13791 = vmatprep.subr.bf16.mxu1 %v15271_v53  ;;  %v15315_v53 = vld [vmem:[%s16271_s12 + $0x748] sm:$0xff]  }
  0xd2   : > { %13770 = vmatpush3.bf16.msra.mxu0 %v15270_v55  ;;  %v15316_v55 = vld [vmem:[%s16271_s12 + $0x708] sm:$0xff]  }
  0xd3   : > { %13792 = vmatpush3.bf16.msra.mxu1 %v15272_v58  ;;  %13771 = vmatprep.subr.bf16.mxu0 %v15273_v59  ;;  %v15321_v58 = vld [vmem:[%s16271_s12 + $0x7d0] sm:$0xff]  }
  0xd4   : > { %13793 = vmatprep.subr.bf16.mxu1 %v15275_v62  ;;  %v15320_v59 = vld [vmem:[%s16271_s12 + $0x710] sm:$0xff]   ;;  %v15325_v62 = vld [vmem:[%s16271_s12 + $0x7d8] sm:$0xff]  }
  0xd6   : > { %13772 = vmatpush3.bf16.msra.mxu0 %v15274_v63  ;;  %v15324_v63 = vld [vmem:[%s16271_s12 + $0x718] sm:$0xff]  }
  0xd7   : > { %13794 = vmatpush3.bf16.msra.mxu1 %v15276_v2  ;;  %13801 = vmatprep.subr.bf16.mxu0 %v15277_v3  ;;  %v15329_v2 = vld [vmem:[%s16271_s12 + $0x7e0] sm:$0xff]  }
  0xd8   : > { %13823 = vmatprep.subr.bf16.mxu1 %v15280_v5  ;;  %v15328_v3 = vld [vmem:[%s16271_s12 + $0x720] sm:$0xff]   ;;  %v15331_v5 = vld [vmem:[%s16271_s12 + $0x768] sm:$0xff]  }
  0xd9   : > { %10002 = vmatmul.mubr.bf16.vlgmr.msra.gmra.mrb[20].mxu0 %v1074_v7  ;;  %v15332_v7 = vld [vmem:[%s16271_s12 + $0x728] sm:$0xff]  }
  0xda   : > { %10042 = vmatmul.mubr.bf16.vlgmr.msra.gmra.mrb[20].mxu1 %v1076_v8  ;;  %13802 = vmatpush3.bf16.msra.mxu0 %v15279_v6  ;;  %v15333_v6 = vld [vmem:[%s16271_s12 + $0x7e8] sm:$0xff]  }
  0xdb   : > { %13824 = vmatpush3.bf16.msra.mxu1 %v15281_v9  ;;  %13803 = vmatprep.subr.bf16.mxu0 %v15282_v10  ;;  %v15334_v8 = vld [vmem:[%s16271_s12 + $0x7a8] sm:$0xff]   ;;  %v15335_v9 = vld [vmem:[%s16271_s12 + $0x770] sm:$0xff]  }
  0xdc   : > { %13825 = vmatprep.subr.bf16.mxu1 %v15284_v11  ;;  %10081 = vmatprep.mubr.bf16.mxu0 %v1079_v43  ;;  %v15337_v10 = vld [vmem:[%s16271_s12 + $0x7f0] sm:$0xff]   ;;  %v15348_v43 = vld [vmem:[%s16271_s12 + $0x848] sm:$0xff]  }
  0xdd   : > { %10121 = vmatprep.mubr.bf16.mxu1 %v1081_v47  ;;  %v15352_v47 = vld [vmem:[%s16271_s12 + $0x850] sm:$0xff]  }
  0xde   : > { %13804 = vmatpush3.bf16.msra.mxu0 %v15283_v12 }
  0xdf   : > { %13826 = vmatpush3.bf16.msra.mxu1 %v15285_v13  ;;  %13805 = vmatprep.subr.bf16.mxu0 %v15286_v14  ;;  %v15336_v13 = vld [vmem:[%s16271_s12 + $0x730] sm:$0xff]  }
  0xe0   : > { %13827 = vmatprep.subr.bf16.mxu1 %v15288_v15  ;;  %v15338_v14 = vld [vmem:[%s16271_s12 + $0x7b0] sm:$0xff]   ;;  %v304_v15 = vld [vmem:[%s16266_s8 + $0x38] sm:$0xff] }
  0xe2   : > { %13806 = vmatpush3.bf16.msra.mxu0 %v15287_v16 }
  0xe3   : > { %13828 = vmatpush3.bf16.msra.mxu1 %v15289_v17  ;;  %13807 = vmatprep.subr.bf16.mxu0 %v15290_v18  ;;  %v15339_v18 = vld [vmem:[%s16271_s12 + $0x778] sm:$0xff]  }
  0xe4   : > { %13829 = vmatprep.subr.bf16.mxu1 %v15292_v19  ;;  %v15341_v19 = vld [vmem:[%s16271_s12 + $0x7f8] sm:$0xff]  }
  0xe6   : > { %13808 = vmatpush3.bf16.msra.mxu0 %v15291_v20  ;;  %v489_v20 = vrot.slane %v304_v15, %v16309_v42 }
  0xe7   : > { %13830 = vmatpush3.bf16.msra.mxu1 %v15293_v21  ;;  %13809 = vmatprep.subr.bf16.mxu0 %v15294_v22  ;;  %v482_v21 = vcombine.high %v304_v15, %v304_v15 }
  0xe8   : > { %13831 = vmatprep.subr.bf16.mxu1 %v15296_v23  ;;  %v1082_v39 = vpack.c.bf16 %v489_v20, %v489_v20 }
  0xea   : > { %13810 = vmatpush3.bf16.msra.mxu0 %v15295_v24 }
  0xeb   : > { %13832 = vmatpush3.bf16.msra.mxu1 %v15297_v25  ;;  %13811 = vmatprep.subr.bf16.mxu0 %v15298_v26 }
  0xec   : > { %13833 = vmatprep.subr.bf16.mxu1 %v15300_v27 }
  0xee   : > { %13812 = vmatpush3.bf16.msra.mxu0 %v15299_v28  ;;  %v497_v28 = vcombine.high %v489_v20, %v489_v20  ;;  %v15373_v20 = vld [vmem:[%s16271_s12 + $0x838] sm:$0xff]  }
  0xef   : > { %13834 = vmatpush3.bf16.msra.mxu1 %v15301_v29  ;;  %13813 = vmatprep.subr.bf16.mxu0 %v15302_v30  ;;  %v496_v29 = vrot.slane %v482_v21, %v16309_v42 }
  0xf0   : > { %13835 = vmatprep.subr.bf16.mxu1 %v15304_v31  ;;  %v15340_v31 = vld [vmem:[%s16271_s12 + $0x738] sm:$0xff]  }
  0xf1   : > { %v1084_v40 = vpack.c.bf16 %v496_v29, %v496_v29 }
  0xf2   : > { %13814 = vmatpush3.bf16.msra.mxu0 %v15303_v32  ;;  %v1083_v32 = vpack.c.bf16 %v497_v28, %v497_v28  ;;  %v15379_v28 = vld [vmem:[%s16271_s12 + $0x9c0] sm:$0xff]  }
  0xf3   : > { %13836 = vmatpush3.bf16.msra.mxu1 %v15305_v34  ;;  %13815 = vmatprep.subr.bf16.mxu0 %v15306_v37  ;;  %v498_v34 = vcombine.high %v496_v29, %v496_v29  ;;  %v15346_v37 = vld [vmem:[%s16271_s12 + $0x8c0] sm:$0xff]  }
  0xf4   : > { %13837 = vmatprep.subr.bf16.mxu1 %v15308_v38  ;;  %v15345_v38 = vld [vmem:[%s16271_s12 + $0x800] sm:$0xff]  }
  0xf5   : > { %v1085_v36 = vpack.c.bf16 %v498_v34, %v498_v34  ;;  %v15383_v34 = vld [vmem:[%s16271_s12 + $0x9c8] sm:$0xff]  }
  0xf6   : > { %13816 = vmatpush3.bf16.msra.mxu0 %v15307_v41  ;;  %v15347_v41 = vld [vmem:[%s16271_s12 + $0x880] sm:$0xff]  }
  0xf7   : > { %13838 = vmatpush3.bf16.msra.mxu1 %v15309_v44  ;;  %13845 = vmatprep.subr.bf16.mxu0 %v15310_v46  ;;  %v15350_v44 = vld [vmem:[%s16271_s12 + $0x8c8] sm:$0xff]  }
  0xf8   : > { %13867 = vmatprep.subr.bf16.mxu1 %v15313_v48  ;;  %v15351_v46 = vld [vmem:[%s16271_s12 + $0x888] sm:$0xff]   ;;  %v15354_v48 = vld [vmem:[%s16271_s12 + $0x8d0] sm:$0xff]  }
  0xf9   : > { %10082 = vmatmul.mubr.bf16.vlgmr.msra.gmra.mrb[24].mxu0 %v1078_v50  ;;  %v15355_v50 = vld [vmem:[%s16271_s12 + $0x890] sm:$0xff]  }
  0xfa   : > { %10122 = vmatmul.mubr.bf16.vlgmr.msra.gmra.mrb[24].mxu1 %v1080_v51  ;;  %13846 = vmatpush3.bf16.msra.mxu0 %v15312_v49  ;;  %v15353_v49 = vld [vmem:[%s16271_s12 + $0x810] sm:$0xff]   ;;  %v15356_v51 = vld [vmem:[%s16271_s12 + $0x858] sm:$0xff]  }
  0xfb   : > { %13868 = vmatpush3.bf16.msra.mxu1 %v15314_v52  ;;  %13847 = vmatprep.subr.bf16.mxu0 %v15315_v53  ;;  %v15358_v52 = vld [vmem:[%s16271_s12 + $0x8d8] sm:$0xff]  }
  0xfc   : > { %13869 = vmatprep.subr.bf16.mxu1 %v15317_v54  ;;  %10161 = vmatprep.mubr.bf16.mxu0 %v1083_v32  ;;  %v15357_v53 = vld [vmem:[%s16271_s12 + $0x818] sm:$0xff]   ;;  %v15380_v32 = vld [vmem:[%s16271_s12 + $0x980] sm:$0xff]  }
  0xfd   : > { %10201 = vmatprep.mubr.bf16.mxu1 %v1085_v36  ;;  %v15359_v54 = vld [vmem:[%s16271_s12 + $0x898] sm:$0xff]   ;;  %v15384_v36 = vld [vmem:[%s16271_s12 + $0x988] sm:$0xff]  }
  0xfe   : > { %13848 = vmatpush3.bf16.msra.mxu0 %v15316_v55  ;;  %v15360_v55 = vld [vmem:[%s16271_s12 + $0x860] sm:$0xff]  }
  0xff   : > { %13870 = vmatpush3.bf16.msra.mxu1 %v15318_v56  ;;  %13849 = vmatprep.subr.bf16.mxu0 %v15319_v57  ;;  %v15362_v56 = vld [vmem:[%s16271_s12 + $0x8e0] sm:$0xff]  }
 0x100   : > { %13871 = vmatprep.subr.bf16.mxu1 %v15321_v58  ;;  %v15361_v57 = vld [vmem:[%s16271_s12 + $0x820] sm:$0xff]  }
 0x101   : > { %v15363_v58 = vld [vmem:[%s16271_s12 + $0x8a0] sm:$0xff]  }
 0x102   : > { %13850 = vmatpush3.bf16.msra.mxu0 %v15320_v59  ;;  %v15364_v59 = vld [vmem:[%s16271_s12 + $0x868] sm:$0xff]  }
 0x103   : > { %13872 = vmatpush3.bf16.msra.mxu1 %v15322_v60  ;;  %13851 = vmatprep.subr.bf16.mxu0 %v15323_v61  ;;  %v15366_v60 = vld [vmem:[%s16271_s12 + $0x8e8] sm:$0xff]  }
 0x104   : > { %13873 = vmatprep.subr.bf16.mxu1 %v15325_v62  ;;  %v15365_v61 = vld [vmem:[%s16271_s12 + $0x828] sm:$0xff]  }
 0x105   : > { %v15367_v62 = vld [vmem:[%s16271_s12 + $0x8a8] sm:$0xff]  }
 0x106   : > { %13852 = vmatpush3.bf16.msra.mxu0 %v15324_v63  ;;  %v15368_v63 = vld [vmem:[%s16271_s12 + $0x870] sm:$0xff]  }
 0x107   : > { %13874 = vmatpush3.bf16.msra.mxu1 %v15326_v0  ;;  %13853 = vmatprep.subr.bf16.mxu0 %v15327_v1  ;;  %v15370_v0 = vld [vmem:[%s16271_s12 + $0x8f0] sm:$0xff]  }
 0x108   : > { %13875 = vmatprep.subr.bf16.mxu1 %v15329_v2 }
 0x10a   : > { %13854 = vmatpush3.bf16.msra.mxu0 %v15328_v3  ;;  %v15369_v3 = vld [vmem:[%s16271_s12 + $0x830] sm:$0xff]  }
 0x10b   : > { %13876 = vmatpush3.bf16.msra.mxu1 %v15330_v4  ;;  %13855 = vmatprep.subr.bf16.mxu0 %v15331_v5  ;;  %v15371_v4 = vld [vmem:[%s16271_s12 + $0x8b0] sm:$0xff]  }
 0x10c   : > { %13877 = vmatprep.subr.bf16.mxu1 %v15333_v6  ;;  %v13553_v11 = vpop.f32.mrb[0].mxu0 }
 0x10d   : > { %v13575_v12 = vpop.f32.mrb[0].mxu1  ;;  %v13554_v16 = vpop.f32.mrb[1].mxu0 }
 0x10e   : > { %v13576_v17 = vpop.f32.mrb[1].mxu1  ;;  %v13555_v22 = vadd.f32 %v13554_v16, %v13553_v11  ;;  %v13556_v24 = vpop.f32.mrb[2].mxu0  ;;  %13856 = vmatpush3.bf16.msra.mxu0 %v15332_v7  ;;  %v15372_v7 = vld [vmem:[%s16271_s12 + $0x878] sm:$0xff]  }
 0x10f   : > { %v13577_v23 = vadd.f32 %v13576_v17, %v13575_v12  ;;  %13878 = vmatpush3.bf16.msra.mxu1 %v15334_v8  ;;  %v13578_v25 = vpop.f32.mrb[2].mxu1  ;;  %v13557_v26 = vpop.f32.mrb[3].mxu0  ;;  %13857 = vmatprep.subr.bf16.mxu0 %v15335_v9  ;;  %v15374_v8 = vld [vmem:[%s16271_s12 + $0x8f8] sm:$0xff]   ;;  %v305_v9 = vld [vmem:[%s16266_s8 + $0x40] sm:$0xff] }
 0x110   : > { %v13579_v27 = vpop.f32.mrb[3].mxu1  ;;  %13879 = vmatprep.subr.bf16.mxu1 %v15337_v10  ;;  %v499_v17 = vcombine.high %v305_v9, %v305_v9  ;;  %v15375_v24 = vld [vmem:[%s16271_s12 + $0x8b8] sm:$0xff]   ;;  %v15376_v25 = vld [vmem:[%s16271_s12 + $0x940] sm:$0xff]  }
 0x111   : > { %v16554_v30 = vadd.f32 %v13577_v23, %v13555_v22  ;;  %v15378_v27 = vld [vmem:[%s16271_s12 + $0x900] sm:$0xff]  }
 0x112   : > { %13858 = vmatpush3.bf16.msra.mxu0 %v15336_v13  ;;  %v513_v21 = vrot.slane %v499_v17, %v16309_v42 }
 0x113   : > { %13880 = vmatpush3.bf16.msra.mxu1 %v15338_v14  ;;  %13859 = vmatprep.subr.bf16.mxu0 %v15339_v18  ;;  %v506_v14 = vrot.slane %v305_v9, %v16309_v42 }
 0x114   : > { %13881 = vmatprep.subr.bf16.mxu1 %v15341_v19  ;;  %v515_v26 = vcombine.high %v513_v21, %v513_v21 }
 0x115   : > { %v514_v19 = vcombine.high %v506_v14, %v506_v14  ;;  %v1086_v29 = vpack.c.bf16 %v506_v14, %v506_v14  ;;  %v15408_v14 = vld [vmem:[%s16271_s12 + $0x9b8] sm:$0xff]  }
 0x116   : > { %13860 = vmatpush3.bf16.msra.mxu0 %v15340_v31  ;;  %v1088_v31 = vpack.c.bf16 %v513_v21, %v513_v21 }
 0x117   : > { %13882 = vmatpush3.bf16.msra.mxu1 %v15342_v33  ;;  %13889 = vmatprep.subr.bf16.mxu0 %v15343_v35  ;;  %v1087_v23 = vpack.c.bf16 %v514_v19, %v514_v19  ;;  %v15381_v33 = vld [vmem:[%s16271_s12 + $0x948] sm:$0xff]   ;;  %v15412_v19 = vld [vmem:[%s16271_s12 + $0xac0] sm:$0xff]  }
 0x118   : > { %13911 = vmatprep.subr.bf16.mxu1 %v15346_v37  ;;  %v15382_v35 = vld [vmem:[%s16271_s12 + $0x908] sm:$0xff]   ;;  %v15385_v37 = vld [vmem:[%s16271_s12 + $0x950] sm:$0xff]  }
 0x119   : > { %10162 = vmatmul.mubr.bf16.vlgmr.msra.gmra.mrb[28].mxu0 %v1082_v39  ;;  %v15386_v39 = vld [vmem:[%s16271_s12 + $0x910] sm:$0xff]  }
 0x11a   : > { %10202 = vmatmul.mubr.bf16.vlgmr.msra.gmra.mrb[28].mxu1 %v1084_v40  ;;  %13890 = vmatpush3.bf16.msra.mxu0 %v15345_v38  ;;  %v15387_v38 = vld [vmem:[%s16271_s12 + $0x9d0] sm:$0xff]  }
 0x11b   : > { %13912 = vmatpush3.bf16.msra.mxu1 %v15347_v41  ;;  %13891 = vmatprep.subr.bf16.mxu0 %v15348_v43  ;;  %v15388_v40 = vld [vmem:[%s16271_s12 + $0x990] sm:$0xff]   ;;  %v15389_v41 = vld [vmem:[%s16271_s12 + $0x958] sm:$0xff]  }
 0x11c   : > { %13913 = vmatprep.subr.bf16.mxu1 %v15350_v44  ;;  %10241 = vmatprep.mubr.bf16.mxu0 %v1087_v23  ;;  %v15391_v43 = vld [vmem:[%s16271_s12 + $0x9d8] sm:$0xff]   ;;  %v15413_v23 = vld [vmem:[%s16271_s12 + $0xa80] sm:$0xff]  }
 0x11d   : > { %v15390_v44 = vld [vmem:[%s16271_s12 + $0x918] sm:$0xff]  }
 0x11e   : > { %13892 = vmatpush3.bf16.msra.mxu0 %v15349_v45  ;;  %v15392_v45 = vld [vmem:[%s16271_s12 + $0x998] sm:$0xff]  }
 0x11f   : > { %13914 = vmatpush3.bf16.msra.mxu1 %v15351_v46  ;;  %13893 = vmatprep.subr.bf16.mxu0 %v15352_v47  ;;  %v15393_v46 = vld [vmem:[%s16271_s12 + $0x960] sm:$0xff]  }
 0x120   : > { %13915 = vmatprep.subr.bf16.mxu1 %v15354_v48  ;;  %v15395_v47 = vld [vmem:[%s16271_s12 + $0x9e0] sm:$0xff]  }
 0x121   : > { %v15394_v48 = vld [vmem:[%s16271_s12 + $0x920] sm:$0xff]  }
 0x122   : > { %13894 = vmatpush3.bf16.msra.mxu0 %v15353_v49  ;;  %v15396_v49 = vld [vmem:[%s16271_s12 + $0x9a0] sm:$0xff]  }
 0x123   : > { %13916 = vmatpush3.bf16.msra.mxu1 %v15355_v50  ;;  %13895 = vmatprep.subr.bf16.mxu0 %v15356_v51  ;;  %v15397_v50 = vld [vmem:[%s16271_s12 + $0x968] sm:$0xff]  }
 0x124   : > { %13917 = vmatprep.subr.bf16.mxu1 %v15358_v52  ;;  %v15399_v51 = vld [vmem:[%s16271_s12 + $0x9e8] sm:$0xff]  }
 0x125   : > { %v15398_v52 = vld [vmem:[%s16271_s12 + $0x928] sm:$0xff]  }
 0x126   : > { %13896 = vmatpush3.bf16.msra.mxu0 %v15357_v53  ;;  %v15400_v53 = vld [vmem:[%s16271_s12 + $0x9a8] sm:$0xff]  }
 0x127   : > { %13918 = vmatpush3.bf16.msra.mxu1 %v15359_v54  ;;  %13897 = vmatprep.subr.bf16.mxu0 %v15360_v55  ;;  %v15401_v54 = vld [vmem:[%s16271_s12 + $0x970] sm:$0xff]  }
 0x128   : > { %13919 = vmatprep.subr.bf16.mxu1 %v15362_v56  ;;  %v15403_v55 = vld [vmem:[%s16271_s12 + $0x9f0] sm:$0xff]  }
 0x12a   : > { %13898 = vmatpush3.bf16.msra.mxu0 %v15361_v57 }
 0x12b   : > { %13920 = vmatpush3.bf16.msra.mxu1 %v15363_v58  ;;  %13899 = vmatprep.subr.bf16.mxu0 %v15364_v59  ;;  %v15402_v58 = vld [vmem:[%s16271_s12 + $0x930] sm:$0xff]  }
 0x12c   : > { %13921 = vmatprep.subr.bf16.mxu1 %v15366_v60  ;;  %v13597_v1 = vpop.f32.mrb[4].mxu0  ;;  %v15404_v59 = vld [vmem:[%s16271_s12 + $0x9b0] sm:$0xff]  }
 0x12d   : > { %v13619_v2 = vpop.f32.mrb[4].mxu1  ;;  %v13598_v5 = vpop.f32.mrb[5].mxu0 }
 0x12e   : > { %v13620_v6 = vpop.f32.mrb[5].mxu1  ;;  %v13599_v10 = vadd.f32 %v13598_v5, %v13597_v1  ;;  %v13600_v11 = vpop.f32.mrb[6].mxu0  ;;  %13900 = vmatpush3.bf16.msra.mxu0 %v15365_v61 }
 0x12f   : > { %v13621_v12 = vadd.f32 %v13620_v6, %v13619_v2  ;;  %13922 = vmatpush3.bf16.msra.mxu1 %v15367_v62  ;;  %v13622_v13 = vpop.f32.mrb[6].mxu1  ;;  %v13601_v15 = vpop.f32.mrb[7].mxu0  ;;  %13901 = vmatprep.subr.bf16.mxu0 %v15368_v63  ;;  %v15405_v62 = vld [vmem:[%s16271_s12 + $0x978] sm:$0xff]  }
 0x130   : > { %v13623_v16 = vpop.f32.mrb[7].mxu1  ;;  %13923 = vmatprep.subr.bf16.mxu1 %v15370_v0  ;;  %v9684_v18 = vadd.f32 %v13599_v10, %v16554_v30  ;;  %v1089_v30 = vpack.c.bf16 %v515_v26, %v515_v26  ;;  %v15406_v10 = vld [vmem:[%s16271_s12 + $0x938] sm:$0xff]   ;;  %v15415_v26 = vld [vmem:[%s16271_s12 + $0xa08] sm:$0xff]  }
 0x131   : > { %v15409_v16 = vld [vmem:[%s16271_s12 + $0xa40] sm:$0xff]  }
 0x132   : > { %v16593_v22 = vadd.f32 %v13621_v12, %v9684_v18  ;;  %13902 = vmatpush3.bf16.msra.mxu0 %v15369_v3  ;;  %10281 = vmatprep.mubr.bf16.mxu1 %v1089_v30  ;;  %v15407_v3 = vld [vmem:[%s16271_s12 + $0x9f8] sm:$0xff]   ;;  %v15411_v18 = vld [vmem:[%s16271_s12 + $0xa00] sm:$0xff]   ;;  %v15419_v30 = vld [vmem:[%s16271_s12 + $0xa10] sm:$0xff]  }
 0x133   : > { %13924 = vmatpush3.bf16.msra.mxu1 %v15371_v4  ;;  %13903 = vmatprep.subr.bf16.mxu0 %v15372_v7  ;;  %v306_v4 = vld [vmem:[%s16266_s8 + $0x48] sm:$0xff] }
 0x134   : > { %13925 = vmatprep.subr.bf16.mxu1 %v15374_v8  ;;  %v523_v7 = vrot.slane %v306_v4, %v16309_v42  ;;  %v516_v8 = vcombine.high %v306_v4, %v306_v4 }
 0x136   : > { %13904 = vmatpush3.bf16.msra.mxu0 %v15373_v20  ;;  %v531_v11 = vcombine.high %v523_v7, %v523_v7  ;;  %v530_v12 = vrot.slane %v516_v8, %v16309_v42  ;;  %v1090_v20 = vpack.c.bf16 %v523_v7, %v523_v7  ;;  %v15445_v7 = vld [vmem:[%s16271_s12 + $0xbc0] sm:$0xff]  }
 0x137   : > { %13926 = vmatpush3.bf16.msra.mxu1 %v15375_v24  ;;  %13933 = vmatprep.subr.bf16.mxu0 %v15376_v25  ;;  %v15414_v24 = vld [vmem:[%s16271_s12 + $0xa48] sm:$0xff]  }
 0x138   : > { %13955 = vmatprep.subr.bf16.mxu1 %v15379_v28  ;;  %v1091_v15 = vpack.c.bf16 %v531_v11, %v531_v11  ;;  %v532_v17 = vcombine.high %v530_v12, %v530_v12  ;;  %v15416_v25 = vld [vmem:[%s16271_s12 + $0xac8] sm:$0xff]   ;;  %v15418_v28 = vld [vmem:[%s16271_s12 + $0xa50] sm:$0xff]   ;;  %v15444_v11 = vld [vmem:[%s16271_s12 + $0xb00] sm:$0xff]  }
 0x139   : > { %10242 = vmatmul.mubr.bf16.vlgmr.msra.gmra.mrb[32].mxu0 %v1086_v29  ;;  %v15420_v29 = vld [vmem:[%s16271_s12 + $0xad0] sm:$0xff]  }
 0x13a   : > { %10282 = vmatmul.mubr.bf16.vlgmr.msra.gmra.mrb[32].mxu1 %v1088_v31  ;;  %13934 = vmatpush3.bf16.msra.mxu0 %v15378_v27  ;;  %v1093_v21 = vpack.c.bf16 %v532_v17, %v532_v17  ;;  %v15417_v27 = vld [vmem:[%s16271_s12 + $0xa88] sm:$0xff]   ;;  %v15421_v31 = vld [vmem:[%s16271_s12 + $0xa90] sm:$0xff]  }
 0x13b   : > { %13956 = vmatpush3.bf16.msra.mxu1 %v15380_v32  ;;  %13935 = vmatprep.subr.bf16.mxu0 %v15381_v33  ;;  %v15422_v32 = vld [vmem:[%s16271_s12 + $0xa58] sm:$0xff]   ;;  %v15448_v17 = vld [vmem:[%s16271_s12 + $0xb08] sm:$0xff]  }
 0x13c   : > { %13957 = vmatprep.subr.bf16.mxu1 %v15383_v34  ;;  %10321 = vmatprep.mubr.bf16.mxu0 %v1091_v15  ;;  %v15424_v33 = vld [vmem:[%s16271_s12 + $0xad8] sm:$0xff]   ;;  %v15447_v15 = vld [vmem:[%s16271_s12 + $0xb48] sm:$0xff]  }
 0x13d   : > { %10361 = vmatprep.mubr.bf16.mxu1 %v1093_v21  ;;  %v15423_v34 = vld [vmem:[%s16271_s12 + $0xa18] sm:$0xff]   ;;  %v15452_v21 = vld [vmem:[%s16271_s12 + $0xb10] sm:$0xff]  }
 0x13e   : > { %13936 = vmatpush3.bf16.msra.mxu0 %v15382_v35  ;;  %v15425_v35 = vld [vmem:[%s16271_s12 + $0xa98] sm:$0xff]  }
 0x13f   : > { %13958 = vmatpush3.bf16.msra.mxu1 %v15384_v36  ;;  %13937 = vmatprep.subr.bf16.mxu0 %v15385_v37  ;;  %v15426_v36 = vld [vmem:[%s16271_s12 + $0xa60] sm:$0xff]  }
 0x140   : > { %13959 = vmatprep.subr.bf16.mxu1 %v15387_v38  ;;  %v15428_v37 = vld [vmem:[%s16271_s12 + $0xae0] sm:$0xff]  }
 0x141   : > { %v15427_v38 = vld [vmem:[%s16271_s12 + $0xa20] sm:$0xff]  }
 0x142   : > { %13938 = vmatpush3.bf16.msra.mxu0 %v15386_v39  ;;  %v15429_v39 = vld [vmem:[%s16271_s12 + $0xaa0] sm:$0xff]  }
 0x143   : > { %13960 = vmatpush3.bf16.msra.mxu1 %v15388_v40  ;;  %13939 = vmatprep.subr.bf16.mxu0 %v15389_v41  ;;  %v15430_v40 = vld [vmem:[%s16271_s12 + $0xa68] sm:$0xff]  }
 0x144   : > { %13961 = vmatprep.subr.bf16.mxu1 %v15391_v43  ;;  %v15432_v41 = vld [vmem:[%s16271_s12 + $0xae8] sm:$0xff]  }
 0x145   : > { %v15431_v43 = vld [vmem:[%s16271_s12 + $0xa28] sm:$0xff]  }
 0x146   : > { %13940 = vmatpush3.bf16.msra.mxu0 %v15390_v44  ;;  %v15433_v44 = vld [vmem:[%s16271_s12 + $0xaa8] sm:$0xff]  }
 0x147   : > { %13962 = vmatpush3.bf16.msra.mxu1 %v15392_v45  ;;  %13941 = vmatprep.subr.bf16.mxu0 %v15393_v46  ;;  %v15434_v45 = vld [vmem:[%s16271_s12 + $0xa70] sm:$0xff]  }
 0x148   : > { %13963 = vmatprep.subr.bf16.mxu1 %v15395_v47  ;;  %v15436_v46 = vld [vmem:[%s16271_s12 + $0xaf0] sm:$0xff]  }
 0x14a   : > { %13942 = vmatpush3.bf16.msra.mxu0 %v15394_v48 }
 0x14b   : > { %13964 = vmatpush3.bf16.msra.mxu1 %v15396_v49  ;;  %13943 = vmatprep.subr.bf16.mxu0 %v15397_v50  ;;  %v15435_v49 = vld [vmem:[%s16271_s12 + $0xa30] sm:$0xff]  }
 0x14c   : > { %13965 = vmatprep.subr.bf16.mxu1 %v15399_v51  ;;  %v13641_v56 = vpop.f32.mrb[8].mxu0  ;;  %v15437_v50 = vld [vmem:[%s16271_s12 + $0xab0] sm:$0xff]  }
 0x14d   : > { %v13663_v57 = vpop.f32.mrb[8].mxu1  ;;  %v13642_v60 = vpop.f32.mrb[9].mxu0 }
 0x14e   : > { %v13664_v61 = vpop.f32.mrb[9].mxu1  ;;  %v13643_v63 = vadd.f32 %v13642_v60, %v13641_v56  ;;  %v13644_v0 = vpop.f32.mrb[10].mxu0  ;;  %13944 = vmatpush3.bf16.msra.mxu0 %v15398_v52 }
 0x14f   : > { %v13665_v1 = vadd.f32 %v13664_v61, %v13663_v57  ;;  %13966 = vmatpush3.bf16.msra.mxu1 %v15400_v53  ;;  %v13666_v2 = vpop.f32.mrb[10].mxu1  ;;  %v13645_v5 = vpop.f32.mrb[11].mxu0  ;;  %13945 = vmatprep.subr.bf16.mxu0 %v15401_v54  ;;  %v15438_v57 = vld [vmem:[%s16271_s12 + $0xa78] sm:$0xff]  }
 0x150   : > { %v13667_v6 = vpop.f32.mrb[11].mxu1  ;;  %13967 = vmatprep.subr.bf16.mxu1 %v15403_v55  ;;  %v9764_v9 = vadd.f32 %v13643_v63, %v16593_v22  ;;  %v1092_v22 = vpack.c.bf16 %v530_v12, %v530_v12  ;;  %v15439_v63 = vld [vmem:[%s16271_s12 + $0xa38] sm:$0xff]   ;;  %v15442_v5 = vld [vmem:[%s16271_s12 + $0xb40] sm:$0xff]  }
 0x152   : > { %v16631_v13 = vadd.f32 %v13665_v1, %v9764_v9  ;;  %13946 = vmatpush3.bf16.msra.mxu0 %v15402_v58  ;;  %v15440_v58 = vld [vmem:[%s16271_s12 + $0xaf8] sm:$0xff]  }
 0x153   : > { %13968 = vmatpush3.bf16.msra.mxu1 %v15404_v59  ;;  %13947 = vmatprep.subr.bf16.mxu0 %v15405_v62  ;;  %v307_v62 = vld [vmem:[%s16266_s8 + $0x50] sm:$0xff] }
 0x154   : > { %13969 = vmatprep.subr.bf16.mxu1 %v15407_v3  ;;  %v540_v0 = vrot.slane %v307_v62, %v16309_v42  ;;  %v533_v1 = vcombine.high %v307_v62, %v307_v62  ;;  %v15441_v3 = vld [vmem:[%s16271_s12 + $0xab8] sm:$0xff]   ;;  %v15477_v62 = vld [vmem:[%s16271_s12 + $0xc00] sm:$0xff]  }
 0x156   : > { %13948 = vmatpush3.bf16.msra.mxu0 %v15406_v10  ;;  %v548_v4 = vcombine.high %v540_v0, %v540_v0  ;;  %v547_v6 = vrot.slane %v533_v1, %v16309_v42  ;;  %v1094_v9 = vpack.c.bf16 %v540_v0, %v540_v0  ;;  %v15478_v0 = vld [vmem:[%s16271_s12 + $0xcc0] sm:$0xff]  }
 0x157   : > { %13970 = vmatpush3.bf16.msra.mxu1 %v15408_v14  ;;  %13977 = vmatprep.subr.bf16.mxu0 %v15409_v16  ;;  %v15449_v16 = vld [vmem:[%s16271_s12 + $0xbc8] sm:$0xff]  }
 0x158   : > { %13999 = vmatprep.subr.bf16.mxu1 %v15412_v19  ;;  %v1095_v8 = vpack.c.bf16 %v548_v4, %v548_v4  ;;  %v549_v10 = vcombine.high %v547_v6, %v547_v6  ;;  %v1096_v12 = vpack.c.bf16 %v547_v6, %v547_v6  ;;  %v15451_v19 = vld [vmem:[%s16271_s12 + $0xb50] sm:$0xff]  }
 0x159   : > { %10322 = vmatmul.mubr.bf16.vlgmr.msra.gmra.mrb[36].mxu0 %v1090_v20  ;;  %v15453_v20 = vld [vmem:[%s16271_s12 + $0xbd0] sm:$0xff]  }
 0x15a   : > { %10362 = vmatmul.mubr.bf16.vlgmr.msra.gmra.mrb[36].mxu1 %v1092_v22  ;;  %13978 = vmatpush3.bf16.msra.mxu0 %v15411_v18  ;;  %v1097_v14 = vpack.c.bf16 %v549_v10, %v549_v10  ;;  %v15450_v18 = vld [vmem:[%s16271_s12 + $0xb88] sm:$0xff]   ;;  %v15454_v22 = vld [vmem:[%s16271_s12 + $0xb90] sm:$0xff]  }
 0x15b   : > { %14000 = vmatpush3.bf16.msra.mxu1 %v15413_v23  ;;  %13979 = vmatprep.subr.bf16.mxu0 %v15414_v24  ;;  %v15455_v23 = vld [vmem:[%s16271_s12 + $0xb58] sm:$0xff]   ;;  %v15484_v10 = vld [vmem:[%s16271_s12 + $0xc50] sm:$0xff]  }
 0x15c   : > { %14001 = vmatprep.subr.bf16.mxu1 %v15416_v25  ;;  %10401 = vmatprep.mubr.bf16.mxu0 %v1095_v8  ;;  %v15457_v24 = vld [vmem:[%s16271_s12 + $0xbd8] sm:$0xff]   ;;  %v15482_v8 = vld [vmem:[%s16271_s12 + $0xcc8] sm:$0xff]  }
 0x15d   : > { %10441 = vmatprep.mubr.bf16.mxu1 %v1097_v14  ;;  %v15456_v25 = vld [vmem:[%s16271_s12 + $0xb18] sm:$0xff]  }
 0x15e   : > { %13980 = vmatpush3.bf16.msra.mxu0 %v15415_v26  ;;  %v15458_v26 = vld [vmem:[%s16271_s12 + $0xb98] sm:$0xff]  }
 0x15f   : > { %14002 = vmatpush3.bf16.msra.mxu1 %v15417_v27  ;;  %13981 = vmatprep.subr.bf16.mxu0 %v15418_v28  ;;  %v15459_v27 = vld [vmem:[%s16271_s12 + $0xb60] sm:$0xff]   ;;  %v15488_v14 = vld [vmem:[%s16271_s12 + $0xc58] sm:$0xff]  }
 0x160   : > { %14003 = vmatprep.subr.bf16.mxu1 %v15420_v29  ;;  %v15461_v28 = vld [vmem:[%s16271_s12 + $0xbe0] sm:$0xff]  }
 0x161   : > { %v15460_v29 = vld [vmem:[%s16271_s12 + $0xb20] sm:$0xff]  }
 0x162   : > { %13982 = vmatpush3.bf16.msra.mxu0 %v15419_v30  ;;  %v15462_v30 = vld [vmem:[%s16271_s12 + $0xba0] sm:$0xff]  }
 0x163   : > { %14004 = vmatpush3.bf16.msra.mxu1 %v15421_v31  ;;  %13983 = vmatprep.subr.bf16.mxu0 %v15422_v32  ;;  %v15463_v31 = vld [vmem:[%s16271_s12 + $0xb68] sm:$0xff]  }
 0x164   : > { %14005 = vmatprep.subr.bf16.mxu1 %v15424_v33  ;;  %v15465_v32 = vld [vmem:[%s16271_s12 + $0xbe8] sm:$0xff]  }
 0x165   : > { %v15464_v33 = vld [vmem:[%s16271_s12 + $0xb28] sm:$0xff]  }
 0x166   : > { %13984 = vmatpush3.bf16.msra.mxu0 %v15423_v34  ;;  %v15466_v34 = vld [vmem:[%s16271_s12 + $0xba8] sm:$0xff]  }
 0x167   : > { %14006 = vmatpush3.bf16.msra.mxu1 %v15425_v35  ;;  %13985 = vmatprep.subr.bf16.mxu0 %v15426_v36  ;;  %v15467_v35 = vld [vmem:[%s16271_s12 + $0xb70] sm:$0xff]  }
 0x168   : > { %14007 = vmatprep.subr.bf16.mxu1 %v15428_v37 }
 0x16a   : > { %13986 = vmatpush3.bf16.msra.mxu0 %v15427_v38  ;;  %v15468_v38 = vld [vmem:[%s16271_s12 + $0xb30] sm:$0xff]  }
 0x16b   : > { %14008 = vmatpush3.bf16.msra.mxu1 %v15429_v39  ;;  %13987 = vmatprep.subr.bf16.mxu0 %v15430_v40  ;;  %v15469_v39 = vld [vmem:[%s16271_s12 + $0xbf0] sm:$0xff]  }
 0x16c   : > { %14009 = vmatprep.subr.bf16.mxu1 %v15432_v41  ;;  %v13685_v47 = vpop.f32.mrb[12].mxu0 }
 0x16d   : > { %v13707_v48 = vpop.f32.mrb[12].mxu1  ;;  %v13686_v51 = vpop.f32.mrb[13].mxu0 }
 0x16e   : > { %v13708_v52 = vpop.f32.mrb[13].mxu1  ;;  %v13687_v53 = vadd.f32 %v13686_v51, %v13685_v47  ;;  %v13688_v54 = vpop.f32.mrb[14].mxu0  ;;  %13988 = vmatpush3.bf16.msra.mxu0 %v15431_v43  ;;  %v15470_v47 = vld [vmem:[%s16271_s12 + $0xbb0] sm:$0xff]  }
 0x16f   : > { %v13709_v55 = vadd.f32 %v13708_v52, %v13707_v48  ;;  %14010 = vmatpush3.bf16.msra.mxu1 %v15433_v44  ;;  %v13710_v56 = vpop.f32.mrb[14].mxu1  ;;  %v13689_v59 = vpop.f32.mrb[15].mxu0  ;;  %13989 = vmatprep.subr.bf16.mxu0 %v15434_v45  ;;  %v15471_v48 = vld [vmem:[%s16271_s12 + $0xb78] sm:$0xff]  }
 0x170   : > { %v13711_v60 = vpop.f32.mrb[15].mxu1  ;;  %14011 = vmatprep.subr.bf16.mxu1 %v15436_v46  ;;  %v9844_v61 = vadd.f32 %v13687_v53, %v16631_v13  ;;  %v15446_v13 = vld [vmem:[%s16271_s12 + $0xb80] sm:$0xff]   ;;  %v15472_v52 = vld [vmem:[%s16271_s12 + $0xb38] sm:$0xff]  }
 0x171   : > { %v15473_v53 = vld [vmem:[%s16271_s12 + $0xbf8] sm:$0xff]   ;;  %v15475_v59 = vld [vmem:[%s16271_s12 + $0xc40] sm:$0xff]  }
 0x172   : > { %v16668_v2 = vadd.f32 %v13709_v55, %v9844_v61  ;;  %13990 = vmatpush3.bf16.msra.mxu0 %v15435_v49  ;;  %v308_v54 = vld [vmem:[%s16266_s8 + $0x58] sm:$0xff] }
 0x173   : > { %14012 = vmatpush3.bf16.msra.mxu1 %v15437_v50  ;;  %13991 = vmatprep.subr.bf16.mxu0 %v15438_v57  ;;  %v557_v56 = vrot.slane %v308_v54, %v16309_v42  ;;  %v15474_v57 = vld [vmem:[%s16271_s12 + $0xbb8] sm:$0xff]  }
 0x174   : > { %14013 = vmatprep.subr.bf16.mxu1 %v15440_v58  ;;  %v550_v58 = vcombine.high %v308_v54, %v308_v54  ;;  %v15511_v54 = vld [vmem:[%s16271_s12 + $0xdc0] sm:$0xff]  }
 0x175   : > { %v565_v60 = vcombine.high %v557_v56, %v557_v56 }
 0x176   : > { %13992 = vmatpush3.bf16.msra.mxu0 %v15439_v63  ;;  %v564_v61 = vrot.slane %v550_v58, %v16309_v42  ;;  %v1098_v63 = vpack.c.bf16 %v557_v56, %v557_v56 }
 0x177   : > { %14014 = vmatpush3.bf16.msra.mxu1 %v15441_v3  ;;  %14021 = vmatprep.subr.bf16.mxu0 %v15442_v5  ;;  %v1099_v1 = vpack.c.bf16 %v565_v60, %v565_v60  ;;  %v15479_v3 = vld [vmem:[%s16271_s12 + $0xc80] sm:$0xff]   ;;  %v15480_v5 = vld [vmem:[%s16271_s12 + $0xc48] sm:$0xff]  }
 0x178   : > { %14043 = vmatprep.subr.bf16.mxu1 %v15445_v7  ;;  %v1100_v4 = vpack.c.bf16 %v564_v61, %v564_v61  ;;  %v15481_v7 = vld [vmem:[%s16271_s12 + $0xc08] sm:$0xff]  }
 0x179   : > { %10402 = vmatmul.mubr.bf16.vlgmr.msra.gmra.mrb[40].mxu0 %v1094_v9  ;;  %v15483_v9 = vld [vmem:[%s16271_s12 + $0xc88] sm:$0xff]  }
 0x17a   : > { %14022 = vmatpush3.bf16.msra.mxu0 %v15444_v11  ;;  %10442 = vmatmul.mubr.bf16.vlgmr.msra.gmra.mrb[40].mxu1 %v1096_v12  ;;  %v15485_v11 = vld [vmem:[%s16271_s12 + $0xc10] sm:$0xff]  }
 0x17b   : > { %14044 = vmatpush3.bf16.msra.mxu1 %v15446_v13  ;;  %14023 = vmatprep.subr.bf16.mxu0 %v15447_v15  ;;  %v15486_v12 = vld [vmem:[%s16271_s12 + $0xcd0] sm:$0xff]   ;;  %v15489_v15 = vld [vmem:[%s16271_s12 + $0xc18] sm:$0xff]  }
 0x17c   : > { %14045 = vmatprep.subr.bf16.mxu1 %v15449_v16  ;;  %10481 = vmatprep.mubr.bf16.mxu0 %v1099_v1  ;;  %v15487_v13 = vld [vmem:[%s16271_s12 + $0xc90] sm:$0xff]   ;;  %v15490_v16 = vld [vmem:[%s16271_s12 + $0xcd8] sm:$0xff]   ;;  %v15516_v1 = vld [vmem:[%s16271_s12 + $0xd88] sm:$0xff]  }
 0x17e   : > { %14024 = vmatpush3.bf16.msra.mxu0 %v15448_v17  ;;  %v15491_v17 = vld [vmem:[%s16271_s12 + $0xc98] sm:$0xff]  }
 0x17f   : > { %14046 = vmatpush3.bf16.msra.mxu1 %v15450_v18  ;;  %14025 = vmatprep.subr.bf16.mxu0 %v15451_v19  ;;  %v15492_v18 = vld [vmem:[%s16271_s12 + $0xc60] sm:$0xff]  }
 0x180   : > { %14047 = vmatprep.subr.bf16.mxu1 %v15453_v20  ;;  %v15493_v19 = vld [vmem:[%s16271_s12 + $0xc20] sm:$0xff]  }
 0x181   : > { %v15494_v20 = vld [vmem:[%s16271_s12 + $0xce0] sm:$0xff]  }
 0x182   : > { %14026 = vmatpush3.bf16.msra.mxu0 %v15452_v21  ;;  %v15495_v21 = vld [vmem:[%s16271_s12 + $0xca0] sm:$0xff]  }
 0x183   : > { %14048 = vmatpush3.bf16.msra.mxu1 %v15454_v22  ;;  %14027 = vmatprep.subr.bf16.mxu0 %v15455_v23  ;;  %v15496_v22 = vld [vmem:[%s16271_s12 + $0xc68] sm:$0xff]  }
 0x184   : > { %14049 = vmatprep.subr.bf16.mxu1 %v15457_v24  ;;  %v15497_v23 = vld [vmem:[%s16271_s12 + $0xc28] sm:$0xff]  }
 0x185   : > { %v15498_v24 = vld [vmem:[%s16271_s12 + $0xce8] sm:$0xff]  }
 0x186   : > { %14028 = vmatpush3.bf16.msra.mxu0 %v15456_v25  ;;  %v15499_v25 = vld [vmem:[%s16271_s12 + $0xca8] sm:$0xff]  }
 0x187   : > { %14050 = vmatpush3.bf16.msra.mxu1 %v15458_v26  ;;  %14029 = vmatprep.subr.bf16.mxu0 %v15459_v27  ;;  %v15500_v26 = vld [vmem:[%s16271_s12 + $0xc70] sm:$0xff]  }
 0x188   : > { %14051 = vmatprep.subr.bf16.mxu1 %v15461_v28 }
 0x18a   : > { %14030 = vmatpush3.bf16.msra.mxu0 %v15460_v29  ;;  %v15501_v29 = vld [vmem:[%s16271_s12 + $0xc30] sm:$0xff]  }
 0x18b   : > { %14052 = vmatpush3.bf16.msra.mxu1 %v15462_v30  ;;  %14031 = vmatprep.subr.bf16.mxu0 %v15463_v31  ;;  %v15502_v30 = vld [vmem:[%s16271_s12 + $0xcf0] sm:$0xff]  }
 0x18c   : > { %v13729_v36 = vpop.f32.mrb[16].mxu0  ;;  %14053 = vmatprep.subr.bf16.mxu1 %v15465_v32 }
 0x18d   : > { %v13751_v37 = vpop.f32.mrb[16].mxu1  ;;  %v13730_v40 = vpop.f32.mrb[17].mxu0 }
 0x18e   : > { %v13752_v41 = vpop.f32.mrb[17].mxu1  ;;  %v13731_v43 = vadd.f32 %v13730_v40, %v13729_v36  ;;  %v13732_v44 = vpop.f32.mrb[18].mxu0  ;;  %14032 = vmatpush3.bf16.msra.mxu0 %v15464_v33 }
 0x18f   : > { %v13753_v45 = vadd.f32 %v13752_v41, %v13751_v37  ;;  %v13754_v46 = vpop.f32.mrb[18].mxu1  ;;  %v13733_v49 = vpop.f32.mrb[19].mxu0  ;;  %14054 = vmatpush3.bf16.msra.mxu1 %v15466_v34  ;;  %14033 = vmatprep.subr.bf16.mxu0 %v15467_v35  ;;  %v15503_v37 = vld [vmem:[%s16271_s12 + $0xcb0] sm:$0xff]   ;;  %v15506_v44 = vld [vmem:[%s16271_s12 + $0xcf8] sm:$0xff]  }
 0x190   : > { %v13755_v50 = vpop.f32.mrb[19].mxu1  ;;  %v9924_v51 = vadd.f32 %v13731_v43, %v16668_v2  ;;  %14055 = vmatprep.subr.bf16.mxu1 %v15469_v39  ;;  %v566_v2 = vcombine.high %v564_v61, %v564_v61  ;;  %v15505_v43 = vld [vmem:[%s16271_s12 + $0xc38] sm:$0xff]   ;;  %v309_v46 = vld [vmem:[%s16266_s8 + $0x60] sm:$0xff] }
 0x191   : > { %v567_v49 = vcombine.high %v309_v46, %v309_v46  ;;  %v15508_v50 = vld [vmem:[%s16271_s12 + $0xd40] sm:$0xff]  }
 0x192   : > { %v16705_v55 = vadd.f32 %v13753_v45, %v9924_v51  ;;  %14034 = vmatpush3.bf16.msra.mxu0 %v15468_v38  ;;  %v1101_v6 = vpack.c.bf16 %v566_v2, %v566_v2  ;;  %v15504_v38 = vld [vmem:[%s16271_s12 + $0xc78] sm:$0xff]   ;;  %v15512_v61 = vld [vmem:[%s16271_s12 + $0xd80] sm:$0xff]   ;;  %v15519_v2 = vld [vmem:[%s16271_s12 + $0xdd0] sm:$0xff]  }
 0x193   : > { %14056 = vmatpush3.bf16.msra.mxu1 %v15470_v47  ;;  %14035 = vmatprep.subr.bf16.mxu0 %v15471_v48  ;;  %v574_v47 = vrot.slane %v309_v46, %v16309_v42  ;;  %v15507_v48 = vld [vmem:[%s16271_s12 + $0xcb8] sm:$0xff]   ;;  %v15544_v46 = vld [vmem:[%s16271_s12 + $0xec0] sm:$0xff]  }
 0x194   : > { %14057 = vmatprep.subr.bf16.mxu1 %v15473_v53  ;;  %10521 = vmatprep.mubr.bf16.mxu1 %v1101_v6  ;;  %v15523_v6 = vld [vmem:[%s16271_s12 + $0xdd8] sm:$0xff]  }
 0x195   : > { %v582_v51 = vcombine.high %v574_v47, %v574_v47  ;;  %v1102_v53 = vpack.c.bf16 %v574_v47, %v574_v47 }
 0x196   : > { %14036 = vmatpush3.bf16.msra.mxu0 %v15472_v52  ;;  %v581_v52 = vrot.slane %v567_v49, %v16309_v42  ;;  %v15545_v49 = vld [vmem:[%s16271_s12 + $0xe80] sm:$0xff]  }
 0x197   : > { %14058 = vmatpush3.bf16.msra.mxu1 %v15474_v57  ;;  %14065 = vmatprep.subr.bf16.mxu0 %v15475_v59  ;;  %v15510_v57 = vld [vmem:[%s16271_s12 + $0xd00] sm:$0xff]   ;;  %v15513_v59 = vld [vmem:[%s16271_s12 + $0xd48] sm:$0xff]  }
 0x198   : > { %14087 = vmatprep.subr.bf16.mxu1 %v15478_v0  ;;  %v583_v56 = vcombine.high %v581_v52, %v581_v52  ;;  %v1104_v58 = vpack.c.bf16 %v581_v52, %v581_v52  ;;  %v15517_v0 = vld [vmem:[%s16271_s12 + $0xd50] sm:$0xff]  }
 0x199   : > { %10482 = vmatmul.mubr.bf16.vlgmr.msra.gmra.mrb[44].mxu0 %v1098_v63  ;;  %v15514_v63 = vld [vmem:[%s16271_s12 + $0xd08] sm:$0xff]  }
 0x19a   : > { %14066 = vmatpush3.bf16.msra.mxu0 %v15477_v62  ;;  %10522 = vmatmul.mubr.bf16.vlgmr.msra.gmra.mrb[44].mxu1 %v1100_v4  ;;  %v1105_v60 = vpack.c.bf16 %v583_v56, %v583_v56  ;;  %v15515_v62 = vld [vmem:[%s16271_s12 + $0xdc8] sm:$0xff]   ;;  %v15521_v4 = vld [vmem:[%s16271_s12 + $0xd58] sm:$0xff]   ;;  %v15550_v56 = vld [vmem:[%s16271_s12 + $0xe50] sm:$0xff]  }
 0x19b   : > { %14067 = vmatprep.subr.bf16.mxu0 %v15480_v5  ;;  %14088 = vmatpush3.bf16.msra.mxu1 %v15479_v3  ;;  %v15518_v3 = vld [vmem:[%s16271_s12 + $0xd10] sm:$0xff]  }
 0x19c   : > { %14089 = vmatprep.subr.bf16.mxu1 %v15482_v8  ;;  %10601 = vmatprep.mubr.bf16.mxu1 %v1105_v60  ;;  %v15520_v5 = vld [vmem:[%s16271_s12 + $0xd90] sm:$0xff]   ;;  %v15525_v8 = vld [vmem:[%s16271_s12 + $0xd60] sm:$0xff]   ;;  %v15554_v60 = vld [vmem:[%s16271_s12 + $0xe58] sm:$0xff]  }
 0x19e   : > { %14068 = vmatpush3.bf16.msra.mxu0 %v15481_v7  ;;  %v15522_v7 = vld [vmem:[%s16271_s12 + $0xd18] sm:$0xff]  }
 0x19f   : > { %14069 = vmatprep.subr.bf16.mxu0 %v15484_v10  ;;  %14090 = vmatpush3.bf16.msra.mxu1 %v15483_v9  ;;  %v15524_v9 = vld [vmem:[%s16271_s12 + $0xd98] sm:$0xff]   ;;  %v15527_v10 = vld [vmem:[%s16271_s12 + $0xde0] sm:$0xff]  }
 0x1a0   : > { %14091 = vmatprep.subr.bf16.mxu1 %v15486_v12  ;;  %v15529_v12 = vld [vmem:[%s16271_s12 + $0xd68] sm:$0xff]  }
 0x1a2   : > { %14070 = vmatpush3.bf16.msra.mxu0 %v15485_v11  ;;  %v15526_v11 = vld [vmem:[%s16271_s12 + $0xd20] sm:$0xff]  }
 0x1a3   : > { %14071 = vmatprep.subr.bf16.mxu0 %v15488_v14  ;;  %14092 = vmatpush3.bf16.msra.mxu1 %v15487_v13  ;;  %v15528_v13 = vld [vmem:[%s16271_s12 + $0xda0] sm:$0xff]   ;;  %v15531_v14 = vld [vmem:[%s16271_s12 + $0xde8] sm:$0xff]  }
 0x1a4   : > { %14093 = vmatprep.subr.bf16.mxu1 %v15490_v16 }
 0x1a6   : > { %14072 = vmatpush3.bf16.msra.mxu0 %v15489_v15  ;;  %v15530_v15 = vld [vmem:[%s16271_s12 + $0xd28] sm:$0xff]  }
 0x1a7   : > { %14073 = vmatprep.subr.bf16.mxu0 %v15492_v18  ;;  %14094 = vmatpush3.bf16.msra.mxu1 %v15491_v17  ;;  %v15532_v18 = vld [vmem:[%s16271_s12 + $0xda8] sm:$0xff]  }
 0x1a8   : > { %14095 = vmatprep.subr.bf16.mxu1 %v15494_v20 }
 0x1aa   : > { %14074 = vmatpush3.bf16.msra.mxu0 %v15493_v19  ;;  %v15533_v19 = vld [vmem:[%s16271_s12 + $0xd70] sm:$0xff]  }
 0x1ab   : > { %14075 = vmatprep.subr.bf16.mxu0 %v15496_v22  ;;  %14096 = vmatpush3.bf16.msra.mxu1 %v15495_v21 }
 0x1ac   : > { %v13773_v27 = vpop.f32.mrb[20].mxu0  ;;  %14097 = vmatprep.subr.bf16.mxu1 %v15498_v24 }
 0x1ad   : > { %v13795_v28 = vpop.f32.mrb[20].mxu1  ;;  %v13774_v31 = vpop.f32.mrb[21].mxu0 }
 0x1ae   : > { %v13796_v32 = vpop.f32.mrb[21].mxu1  ;;  %v13775_v33 = vadd.f32 %v13774_v31, %v13773_v27  ;;  %v13776_v34 = vpop.f32.mrb[22].mxu0  ;;  %14076 = vmatpush3.bf16.msra.mxu0 %v15497_v23  ;;  %v15535_v27 = vld [vmem:[%s16271_s12 + $0xdf0] sm:$0xff]  }
 0x1af   : > { %v13797_v35 = vadd.f32 %v13796_v32, %v13795_v28  ;;  %v13798_v36 = vpop.f32.mrb[22].mxu1  ;;  %v13777_v39 = vpop.f32.mrb[23].mxu0  ;;  %14077 = vmatprep.subr.bf16.mxu0 %v15500_v26  ;;  %14098 = vmatpush3.bf16.msra.mxu1 %v15499_v25  ;;  %v15534_v26 = vld [vmem:[%s16271_s12 + $0xd30] sm:$0xff]   ;;  %v15537_v32 = vld [vmem:[%s16271_s12 + $0xd78] sm:$0xff]  }
 0x1b0   : > { %v13799_v40 = vpop.f32.mrb[23].mxu1  ;;  %v10004_v41 = vadd.f32 %v13775_v33, %v16705_v55  ;;  %14099 = vmatprep.subr.bf16.mxu1 %v15502_v30  ;;  %v1103_v55 = vpack.c.bf16 %v582_v51, %v582_v51  ;;  %v15536_v30 = vld [vmem:[%s16271_s12 + $0xdb0] sm:$0xff]   ;;  %v15538_v33 = vld [vmem:[%s16271_s12 + $0xd38] sm:$0xff]   ;;  %v310_v36 = vld [vmem:[%s16266_s8 + $0x68] sm:$0xff] }
 0x1b1   : > { %v584_v39 = vcombine.high %v310_v36, %v310_v36  ;;  %v15541_v40 = vld [vmem:[%s16271_s12 + $0xe40] sm:$0xff]   ;;  %v15546_v51 = vld [vmem:[%s16271_s12 + $0xe48] sm:$0xff]  }
 0x1b2   : > { %v16742_v45 = vadd.f32 %v13797_v35, %v10004_v41  ;;  %14078 = vmatpush3.bf16.msra.mxu0 %v15501_v29  ;;  %10561 = vmatprep.mubr.bf16.mxu0 %v1103_v55  ;;  %v15539_v35 = vld [vmem:[%s16271_s12 + $0xdf8] sm:$0xff]   ;;  %v15549_v55 = vld [vmem:[%s16271_s12 + $0xe88] sm:$0xff]  }
 0x1b3   : > { %14079 = vmatprep.subr.bf16.mxu0 %v15504_v38  ;;  %14100 = vmatpush3.bf16.msra.mxu1 %v15503_v37  ;;  %v591_v37 = vrot.slane %v310_v36, %v16309_v42  ;;  %v15540_v38 = vld [vmem:[%s16271_s12 + $0xdb8] sm:$0xff]  }
 0x1b4   : > { %14101 = vmatprep.subr.bf16.mxu1 %v15506_v44  ;;  %v15543_v44 = vld [vmem:[%s16271_s12 + $0xe00] sm:$0xff]  }
 0x1b5   : > { %v599_v41 = vcombine.high %v591_v37, %v591_v37 }
 0x1b6   : > { %14080 = vmatpush3.bf16.msra.mxu0 %v15505_v43  ;;  %v598_v43 = vrot.slane %v584_v39, %v16309_v42 }
 0x1b7   : > { %14109 = vmatprep.subr.bf16.mxu0 %v15508_v50  ;;  %14102 = vmatpush3.bf16.msra.mxu1 %v15507_v48  ;;  %v1107_v47 = vpack.c.bf16 %v599_v41, %v599_v41 }
 0x1b8   : > { %14131 = vmatprep.subr.bf16.mxu1 %v15511_v54  ;;  %v600_v48 = vcombine.high %v598_v43, %v598_v43  ;;  %v1108_v50 = vpack.c.bf16 %v598_v43, %v598_v43  ;;  %v15548_v54 = vld [vmem:[%s16271_s12 + $0xec8] sm:$0xff]   ;;  %v15578_v43 = vld [vmem:[%s16271_s12 + $0xf80] sm:$0xff]  }
 0x1b9   : > { %10562 = vmatmul.mubr.bf16.vlgmr.msra.gmra.mrb[48].mxu0 %v1102_v53  ;;  %v15547_v53 = vld [vmem:[%s16271_s12 + $0xe08] sm:$0xff]  }
 0x1ba   : > { %14110 = vmatpush3.bf16.msra.mxu0 %v15510_v57  ;;  %10602 = vmatmul.mubr.bf16.vlgmr.msra.gmra.mrb[48].mxu1 %v1104_v58  ;;  %v1109_v52 = vpack.c.bf16 %v600_v48, %v600_v48  ;;  %v15551_v57 = vld [vmem:[%s16271_s12 + $0xe10] sm:$0xff]  }
 0x1bb   : > { %14111 = vmatprep.subr.bf16.mxu0 %v15513_v59  ;;  %14132 = vmatpush3.bf16.msra.mxu1 %v15512_v61  ;;  %v15552_v58 = vld [vmem:[%s16271_s12 + $0xed0] sm:$0xff]   ;;  %v15555_v61 = vld [vmem:[%s16271_s12 + $0xe18] sm:$0xff]  }
 0x1bc   : > { %14133 = vmatprep.subr.bf16.mxu1 %v15515_v62  ;;  %10641 = vmatprep.mubr.bf16.mxu0 %v1107_v47  ;;  %v15553_v59 = vld [vmem:[%s16271_s12 + $0xe90] sm:$0xff]   ;;  %v15556_v62 = vld [vmem:[%s16271_s12 + $0xed8] sm:$0xff]   ;;  %v15582_v47 = vld [vmem:[%s16271_s12 + $0xf88] sm:$0xff]  }
 0x1bd   : > { %10681 = vmatprep.mubr.bf16.mxu1 %v1109_v52  ;;  %v15585_v48 = vld [vmem:[%s16271_s12 + $0xfd0] sm:$0xff]   ;;  %v15589_v52 = vld [vmem:[%s16271_s12 + $0xfd8] sm:$0xff]  }
 0x1be   : > { %14112 = vmatpush3.bf16.msra.mxu0 %v15514_v63  ;;  %v15557_v63 = vld [vmem:[%s16271_s12 + $0xe98] sm:$0xff]  }
 0x1bf   : > { %14113 = vmatprep.subr.bf16.mxu0 %v15517_v0  ;;  %14134 = vmatpush3.bf16.msra.mxu1 %v15516_v1  ;;  %v15558_v0 = vld [vmem:[%s16271_s12 + $0xe60] sm:$0xff]  }
 0x1c0   : > { %14135 = vmatprep.subr.bf16.mxu1 %v15519_v2  ;;  %v15559_v1 = vld [vmem:[%s16271_s12 + $0xe20] sm:$0xff]  }
 0x1c1   : > { %v15560_v2 = vld [vmem:[%s16271_s12 + $0xee0] sm:$0xff]  }
 0x1c2   : > { %14114 = vmatpush3.bf16.msra.mxu0 %v15518_v3  ;;  %v15561_v3 = vld [vmem:[%s16271_s12 + $0xea0] sm:$0xff]  }
 0x1c3   : > { %14115 = vmatprep.subr.bf16.mxu0 %v15521_v4  ;;  %14136 = vmatpush3.bf16.msra.mxu1 %v15520_v5  ;;  %v15562_v4 = vld [vmem:[%s16271_s12 + $0xe68] sm:$0xff]  }
 0x1c4   : > { %14137 = vmatprep.subr.bf16.mxu1 %v15523_v6  ;;  %v15563_v5 = vld [vmem:[%s16271_s12 + $0xe28] sm:$0xff]  }
 0x1c5   : > { %v15564_v6 = vld [vmem:[%s16271_s12 + $0xee8] sm:$0xff]  }
 0x1c6   : > { %14116 = vmatpush3.bf16.msra.mxu0 %v15522_v7 }
 0x1c7   : > { %14117 = vmatprep.subr.bf16.mxu0 %v15525_v8  ;;  %14138 = vmatpush3.bf16.msra.mxu1 %v15524_v9  ;;  %v15565_v9 = vld [vmem:[%s16271_s12 + $0xea8] sm:$0xff]  }
 0x1c8   : > { %14139 = vmatprep.subr.bf16.mxu1 %v15527_v10  ;;  %v15566_v10 = vld [vmem:[%s16271_s12 + $0xe70] sm:$0xff]  }
 0x1ca   : > { %14118 = vmatpush3.bf16.msra.mxu0 %v15526_v11 }
 0x1cb   : > { %14119 = vmatprep.subr.bf16.mxu0 %v15529_v12  ;;  %14140 = vmatpush3.bf16.msra.mxu1 %v15528_v13 }
 0x1cc   : > { %v13817_v16 = vpop.f32.mrb[24].mxu0  ;;  %14141 = vmatprep.subr.bf16.mxu1 %v15531_v14 }
 0x1cd   : > { %v13839_v17 = vpop.f32.mrb[24].mxu1  ;;  %v13818_v20 = vpop.f32.mrb[25].mxu0 }
 0x1ce   : > { %v13840_v21 = vpop.f32.mrb[25].mxu1  ;;  %v13819_v22 = vadd.f32 %v13818_v20, %v13817_v16  ;;  %v13820_v23 = vpop.f32.mrb[26].mxu0  ;;  %14120 = vmatpush3.bf16.msra.mxu0 %v15530_v15 }
 0x1cf   : > { %v13841_v24 = vadd.f32 %v13840_v21, %v13839_v17  ;;  %v13842_v25 = vpop.f32.mrb[26].mxu1  ;;  %v13821_v28 = vpop.f32.mrb[27].mxu0  ;;  %14121 = vmatprep.subr.bf16.mxu0 %v15533_v19  ;;  %14142 = vmatpush3.bf16.msra.mxu1 %v15532_v18  ;;  %v15567_v17 = vld [vmem:[%s16271_s12 + $0xe30] sm:$0xff]   ;;  %v15570_v23 = vld [vmem:[%s16271_s12 + $0xe78] sm:$0xff]  }
 0x1d0   : > { %v13843_v29 = vpop.f32.mrb[27].mxu1  ;;  %v10084_v31 = vadd.f32 %v13819_v22, %v16742_v45  ;;  %14143 = vmatprep.subr.bf16.mxu1 %v15535_v27  ;;  %v1106_v45 = vpack.c.bf16 %v591_v37, %v591_v37  ;;  %v15568_v18 = vld [vmem:[%s16271_s12 + $0xef0] sm:$0xff]   ;;  %v15571_v25 = vld [vmem:[%s16271_s12 + $0xe38] sm:$0xff]  }
 0x1d1   : > { %v15569_v22 = vld [vmem:[%s16271_s12 + $0xeb0] sm:$0xff]   ;;  %v15573_v29 = vld [vmem:[%s16271_s12 + $0xeb8] sm:$0xff]  }
 0x1d2   : > { %v16779_v34 = vadd.f32 %v13841_v24, %v10084_v31  ;;  %14122 = vmatpush3.bf16.msra.mxu0 %v15534_v26  ;;  %v15572_v26 = vld [vmem:[%s16271_s12 + $0xef8] sm:$0xff]   ;;  %v311_v27 = vld [vmem:[%s16266_s8 + $0x70] sm:$0xff]  ;;  %v15574_v31 = vld [vmem:[%s16271_s12 + $0xf40] sm:$0xff]  }
 0x1d3   : > { %14123 = vmatprep.subr.bf16.mxu0 %v15537_v32  ;;  %14144 = vmatpush3.bf16.msra.mxu1 %v15536_v30  ;;  %v608_v28 = vrot.slane %v311_v27, %v16309_v42  ;;  %v601_v30 = vcombine.high %v311_v27, %v311_v27  ;;  %v15610_v27 = vld [vmem:[%s16271_s12 + $0x10c0] sm:$0xff]  }
 0x1d4   : > { %14145 = vmatprep.subr.bf16.mxu1 %v15539_v35  ;;  %v15577_v35 = vld [vmem:[%s16271_s12 + $0xfc0] sm:$0xff]  }
 0x1d5   : > { %v616_v32 = vcombine.high %v608_v28, %v608_v28 }
 0x1d6   : > { %14124 = vmatpush3.bf16.msra.mxu0 %v15538_v33  ;;  %v615_v33 = vrot.slane %v601_v30, %v16309_v42  ;;  %v15611_v30 = vld [vmem:[%s16271_s12 + $0x1080] sm:$0xff]  }
 0x1d7   : > { %14153 = vmatprep.subr.bf16.mxu0 %v15541_v40  ;;  %14146 = vmatpush3.bf16.msra.mxu1 %v15540_v38  ;;  %v1111_v36 = vpack.c.bf16 %v616_v32, %v616_v32  ;;  %v15576_v38 = vld [vmem:[%s16271_s12 + $0xf00] sm:$0xff]   ;;  %v15579_v40 = vld [vmem:[%s16271_s12 + $0xf48] sm:$0xff]  }
 0x1d8   : > { %14175 = vmatprep.subr.bf16.mxu1 %v15544_v46  ;;  %v617_v37 = vcombine.high %v615_v33, %v615_v33  ;;  %v1112_v39 = vpack.c.bf16 %v615_v33, %v615_v33  ;;  %v15583_v46 = vld [vmem:[%s16271_s12 + $0xf50] sm:$0xff]   ;;  %v15612_v32 = vld [vmem:[%s16271_s12 + $0x1048] sm:$0xff]  }
 0x1d9   : > { %10642 = vmatmul.mubr.bf16.vlgmr.msra.gmra.mrb[52].mxu0 %v1106_v45  ;;  %v15580_v45 = vld [vmem:[%s16271_s12 + $0xf08] sm:$0xff]  }
 0x1da   : > { %14154 = vmatpush3.bf16.msra.mxu0 %v15543_v44  ;;  %10682 = vmatmul.mubr.bf16.vlgmr.msra.gmra.mrb[52].mxu1 %v1108_v50  ;;  %v1113_v41 = vpack.c.bf16 %v617_v37, %v617_v37  ;;  %v15581_v44 = vld [vmem:[%s16271_s12 + $0xfc8] sm:$0xff]   ;;  %v15587_v50 = vld [vmem:[%s16271_s12 + $0xf58] sm:$0xff]   ;;  %v15616_v37 = vld [vmem:[%s16271_s12 + $0x1050] sm:$0xff]  }
 0x1db   : > { %14155 = vmatprep.subr.bf16.mxu0 %v15546_v51  ;;  %14176 = vmatpush3.bf16.msra.mxu1 %v15545_v49  ;;  %v15584_v49 = vld [vmem:[%s16271_s12 + $0xf10] sm:$0xff]  }
 0x1dc   : > { %14177 = vmatprep.subr.bf16.mxu1 %v15548_v54  ;;  %10721 = vmatprep.mubr.bf16.mxu0 %v1111_v36  ;;  %v15586_v51 = vld [vmem:[%s16271_s12 + $0xf90] sm:$0xff]   ;;  %v15591_v54 = vld [vmem:[%s16271_s12 + $0xf60] sm:$0xff]   ;;  %v15615_v36 = vld [vmem:[%s16271_s12 + $0x1088] sm:$0xff]  }
 0x1dd   : > { %10761 = vmatprep.mubr.bf16.mxu1 %v1113_v41  ;;  %v15620_v41 = vld [vmem:[%s16271_s12 + $0x1058] sm:$0xff]  }
 0x1de   : > { %14156 = vmatpush3.bf16.msra.mxu0 %v15547_v53  ;;  %v15588_v53 = vld [vmem:[%s16271_s12 + $0xf18] sm:$0xff]  }
 0x1df   : > { %14157 = vmatprep.subr.bf16.mxu0 %v15550_v56  ;;  %14178 = vmatpush3.bf16.msra.mxu1 %v15549_v55  ;;  %v15590_v55 = vld [vmem:[%s16271_s12 + $0xf98] sm:$0xff]   ;;  %v15593_v56 = vld [vmem:[%s16271_s12 + $0xfe0] sm:$0xff]  }
 0x1e0   : > { %14179 = vmatprep.subr.bf16.mxu1 %v15552_v58  ;;  %v15595_v58 = vld [vmem:[%s16271_s12 + $0xf68] sm:$0xff]  }
 0x1e2   : > { %14158 = vmatpush3.bf16.msra.mxu0 %v15551_v57  ;;  %v15592_v57 = vld [vmem:[%s16271_s12 + $0xf20] sm:$0xff]  }
 0x1e3   : > { %14159 = vmatprep.subr.bf16.mxu0 %v15554_v60  ;;  %14180 = vmatpush3.bf16.msra.mxu1 %v15553_v59  ;;  %v15594_v59 = vld [vmem:[%s16271_s12 + $0xfa0] sm:$0xff]  }
 0x1e4   : > { %14181 = vmatprep.subr.bf16.mxu1 %v15556_v62  ;;  %v15596_v62 = vld [vmem:[%s16271_s12 + $0xf28] sm:$0xff]  }
 0x1e6   : > { %14160 = vmatpush3.bf16.msra.mxu0 %v15555_v61 }
 0x1e7   : > { %14161 = vmatprep.subr.bf16.mxu0 %v15558_v0  ;;  %14182 = vmatpush3.bf16.msra.mxu1 %v15557_v63  ;;  %v15597_v63 = vld [vmem:[%s16271_s12 + $0xfe8] sm:$0xff]  }
 0x1e8   : > { %14183 = vmatprep.subr.bf16.mxu1 %v15560_v2 }
 0x1ea   : > { %14162 = vmatpush3.bf16.msra.mxu0 %v15559_v1 }
 0x1eb   : > { %14163 = vmatprep.subr.bf16.mxu0 %v15562_v4  ;;  %14184 = vmatpush3.bf16.msra.mxu1 %v15561_v3 }
 0x1ec   : > { %v13861_v7 = vpop.f32.mrb[28].mxu0  ;;  %14185 = vmatprep.subr.bf16.mxu1 %v15564_v6 }
 0x1ed   : > { %v13883_v8 = vpop.f32.mrb[28].mxu1  ;;  %v13862_v11 = vpop.f32.mrb[29].mxu0 }
 0x1ee   : > { %v13884_v12 = vpop.f32.mrb[29].mxu1  ;;  %v13863_v13 = vadd.f32 %v13862_v11, %v13861_v7  ;;  %v13864_v14 = vpop.f32.mrb[30].mxu0  ;;  %14164 = vmatpush3.bf16.msra.mxu0 %v15563_v5  ;;  %v15598_v5 = vld [vmem:[%s16271_s12 + $0xfa8] sm:$0xff]   ;;  %v15599_v7 = vld [vmem:[%s16271_s12 + $0xf70] sm:$0xff]  }
 0x1ef   : > { %v13885_v15 = vadd.f32 %v13884_v12, %v13883_v8  ;;  %v13886_v16 = vpop.f32.mrb[30].mxu1  ;;  %v13865_v19 = vpop.f32.mrb[31].mxu0  ;;  %14165 = vmatprep.subr.bf16.mxu0 %v15566_v10  ;;  %14186 = vmatpush3.bf16.msra.mxu1 %v15565_v9  ;;  %v15600_v10 = vld [vmem:[%s16271_s12 + $0xf30] sm:$0xff]  }
 0x1f0   : > { %v13887_v20 = vpop.f32.mrb[31].mxu1  ;;  %v10164_v21 = vadd.f32 %v13863_v13, %v16779_v34  ;;  %14187 = vmatprep.subr.bf16.mxu1 %v15568_v18  ;;  %v1110_v34 = vpack.c.bf16 %v608_v28, %v608_v28  ;;  %v15601_v12 = vld [vmem:[%s16271_s12 + $0xff0] sm:$0xff]   ;;  %v15604_v16 = vld [vmem:[%s16271_s12 + $0xf38] sm:$0xff]  }
 0x1f1   : > { %v15602_v13 = vld [vmem:[%s16271_s12 + $0xfb0] sm:$0xff]   ;;  %v312_v18 = vld [vmem:[%s16266_s8 + $0x78] sm:$0xff] }
 0x1f2   : > { %v16816_v24 = vadd.f32 %v13885_v15, %v10164_v21  ;;  %14166 = vmatpush3.bf16.msra.mxu0 %v15567_v17  ;;  %v15603_v15 = vld [vmem:[%s16271_s12 + $0xf78] sm:$0xff]   ;;  %v625_v19 = vrot.slane %v312_v18, %v16309_v42  ;;  %v618_v21 = vcombine.high %v312_v18, %v312_v18 }
 0x1f3   : > { %14167 = vmatprep.subr.bf16.mxu0 %v15570_v23  ;;  %14188 = vmatpush3.bf16.msra.mxu1 %v15569_v22  ;;  %v15605_v17 = vld [vmem:[%s16271_s12 + $0xff8] sm:$0xff]   ;;  %v15607_v22 = vld [vmem:[%s16271_s12 + $0x1040] sm:$0xff]  }
 0x1f4   : > { %14189 = vmatprep.subr.bf16.mxu1 %v15572_v26  ;;  %v15606_v20 = vld [vmem:[%s16271_s12 + $0xfb8] sm:$0xff]   ;;  %v633_v23 = vcombine.high %v625_v19, %v625_v19  ;;  %v1114_v26 = vpack.c.bf16 %v625_v19, %v625_v19 }
 0x1f6   : > { %14168 = vmatpush3.bf16.msra.mxu0 %v15571_v25  ;;  %v15609_v25 = vld [vmem:[%s16271_s12 + $0x1000] sm:$0xff]   ;;  %v1115_v28 = vpack.c.bf16 %v633_v23, %v633_v23 }
 0x1f7   : > { %14197 = vmatprep.subr.bf16.mxu0 %v15574_v31  ;;  %14190 = vmatpush3.bf16.msra.mxu1 %v15573_v29 }
 0x1f8   : > { %14219 = vmatprep.subr.bf16.mxu1 %v15577_v35  ;;  %v15614_v35 = vld [vmem:[%s16271_s12 + $0x10c8] sm:$0xff]  }
 0x1f9   : > { %10722 = vmatmul.mubr.bf16.vlgmr.msra.gmra.mrb[56].mxu0 %v1110_v34  ;;  %v15613_v34 = vld [vmem:[%s16271_s12 + $0x1008] sm:$0xff]  }
 0x1fa   : > { %14198 = vmatpush3.bf16.msra.mxu0 %v15576_v38  ;;  %10762 = vmatmul.mubr.bf16.vlgmr.msra.gmra.mrb[56].mxu1 %v1112_v39  ;;  %v15617_v38 = vld [vmem:[%s16271_s12 + $0x1010] sm:$0xff]  }
 0x1fb   : > { %14199 = vmatprep.subr.bf16.mxu0 %v15579_v40  ;;  %14220 = vmatpush3.bf16.msra.mxu1 %v15578_v43  ;;  %v15618_v39 = vld [vmem:[%s16271_s12 + $0x10d0] sm:$0xff]   ;;  %v15621_v43 = vld [vmem:[%s16271_s12 + $0x1018] sm:$0xff]  }
 0x1fc   : > { %14221 = vmatprep.subr.bf16.mxu1 %v15581_v44  ;;  %10801 = vmatprep.mubr.bf16.mxu0 %v1115_v28  ;;  %v15619_v40 = vld [vmem:[%s16271_s12 + $0x1090] sm:$0xff]   ;;  %v15622_v44 = vld [vmem:[%s16271_s12 + $0x10d8] sm:$0xff]   ;;  %v15648_v28 = vld [vmem:[%s16271_s12 + $0x1188] sm:$0xff]  }
 0x1fe   : > { %14200 = vmatpush3.bf16.msra.mxu0 %v15580_v45  ;;  %v15623_v45 = vld [vmem:[%s16271_s12 + $0x1098] sm:$0xff]  }
 0x1ff   : > { %14201 = vmatprep.subr.bf16.mxu0 %v15583_v46  ;;  %14222 = vmatpush3.bf16.msra.mxu1 %v15582_v47  ;;  %v15624_v46 = vld [vmem:[%s16271_s12 + $0x1060] sm:$0xff]  }
 0x200   : > { %14223 = vmatprep.subr.bf16.mxu1 %v15585_v48  ;;  %v15625_v47 = vld [vmem:[%s16271_s12 + $0x1020] sm:$0xff]  }
 0x201   : > { %v15626_v48 = vld [vmem:[%s16271_s12 + $0x10e0] sm:$0xff]  }
 0x202   : > { %14202 = vmatpush3.bf16.msra.mxu0 %v15584_v49  ;;  %v15627_v49 = vld [vmem:[%s16271_s12 + $0x10a0] sm:$0xff]  }
 0x203   : > { %14203 = vmatprep.subr.bf16.mxu0 %v15587_v50  ;;  %14224 = vmatpush3.bf16.msra.mxu1 %v15586_v51  ;;  %v15628_v50 = vld [vmem:[%s16271_s12 + $0x1068] sm:$0xff]  }
 0x204   : > { %14225 = vmatprep.subr.bf16.mxu1 %v15589_v52 }
 0x206   : > { %14204 = vmatpush3.bf16.msra.mxu0 %v15588_v53  ;;  %v15629_v53 = vld [vmem:[%s16271_s12 + $0x1028] sm:$0xff]  }
 0x207   : > { %14205 = vmatprep.subr.bf16.mxu0 %v15591_v54  ;;  %14226 = vmatpush3.bf16.msra.mxu1 %v15590_v55  ;;  %v15630_v54 = vld [vmem:[%s16271_s12 + $0x10e8] sm:$0xff]  }
 0x208   : > { %14227 = vmatprep.subr.bf16.mxu1 %v15593_v56 }
 0x20a   : > { %14206 = vmatpush3.bf16.msra.mxu0 %v15592_v57 }
 0x20b   : > { %14207 = vmatprep.subr.bf16.mxu0 %v15595_v58  ;;  %14228 = vmatpush3.bf16.msra.mxu1 %v15594_v59 }
 0x20c   : > { %v13905_v60 = vpop.f32.mrb[32].mxu0  ;;  %14229 = vmatprep.subr.bf16.mxu1 %v15597_v63 }
 0x20d   : > { %v13927_v61 = vpop.f32.mrb[32].mxu1  ;;  %v13906_v0 = vpop.f32.mrb[33].mxu0 }
 0x20e   : > { %v13928_v1 = vpop.f32.mrb[33].mxu1  ;;  %v13907_v2 = vadd.f32 %v13906_v0, %v13905_v60  ;;  %v13908_v3 = vpop.f32.mrb[34].mxu0  ;;  %14208 = vmatpush3.bf16.msra.mxu0 %v15596_v62  ;;  %v15631_v60 = vld [vmem:[%s16271_s12 + $0x10a8] sm:$0xff]   ;;  %v15632_v62 = vld [vmem:[%s16271_s12 + $0x1070] sm:$0xff]  }
 0x20f   : > { %v13929_v4 = vadd.f32 %v13928_v1, %v13927_v61  ;;  %v13930_v6 = vpop.f32.mrb[34].mxu1  ;;  %v13909_v8 = vpop.f32.mrb[35].mxu0  ;;  %14209 = vmatprep.subr.bf16.mxu0 %v15599_v7  ;;  %14230 = vmatpush3.bf16.msra.mxu1 %v15598_v5  ;;  %v15634_v3 = vld [vmem:[%s16271_s12 + $0x10f0] sm:$0xff]   ;;  %v15637_v7 = vld [vmem:[%s16271_s12 + $0x1038] sm:$0xff]  }
 0x210   : > { %v13931_v9 = vpop.f32.mrb[35].mxu1  ;;  %v10244_v11 = vadd.f32 %v13907_v2, %v16816_v24  ;;  %14231 = vmatprep.subr.bf16.mxu1 %v15601_v12  ;;  %v632_v24 = vrot.slane %v618_v21, %v16309_v42  ;;  %v15633_v2 = vld [vmem:[%s16271_s12 + $0x1030] sm:$0xff]   ;;  %v15636_v6 = vld [vmem:[%s16271_s12 + $0x1078] sm:$0xff]  }
 0x211   : > { %v15635_v5 = vld [vmem:[%s16271_s12 + $0x10b0] sm:$0xff]   ;;  %v15638_v8 = vld [vmem:[%s16271_s12 + $0x10f8] sm:$0xff]   ;;  %v313_v9 = vld [vmem:[%s16266_s8 + $0x80] sm:$0xff] }
 0x212   : > { %v16853_v14 = vadd.f32 %v13929_v4, %v10244_v11  ;;  %14210 = vmatpush3.bf16.msra.mxu0 %v15600_v10  ;;  %v634_v29 = vcombine.high %v632_v24, %v632_v24  ;;  %v1116_v31 = vpack.c.bf16 %v632_v24, %v632_v24  ;;  %v642_v10 = vrot.slane %v313_v9, %v16309_v42  ;;  %v15639_v11 = vld [vmem:[%s16271_s12 + $0x10b8] sm:$0xff]   ;;  %v15644_v24 = vld [vmem:[%s16271_s12 + $0x1180] sm:$0xff]  }
 0x213   : > { %14211 = vmatprep.subr.bf16.mxu0 %v15603_v15  ;;  %14232 = vmatpush3.bf16.msra.mxu1 %v15602_v13  ;;  %v635_v12 = vcombine.high %v313_v9, %v313_v9  ;;  %v15640_v13 = vld [vmem:[%s16271_s12 + $0x1140] sm:$0xff]  }
 0x214   : > { %14233 = vmatprep.subr.bf16.mxu1 %v15605_v17  ;;  %v1117_v33 = vpack.c.bf16 %v634_v29, %v634_v29  ;;  %v15643_v17 = vld [vmem:[%s16271_s12 + $0x11c0] sm:$0xff]   ;;  %v15651_v29 = vld [vmem:[%s16271_s12 + $0x11d0] sm:$0xff]  }
 0x215   : > { %v649_v15 = vrot.slane %v635_v12, %v16309_v42  ;;  %v15676_v9 = vld [vmem:[%s16271_s12 + $0x12c0] sm:$0xff]  }
 0x216   : > { %14212 = vmatpush3.bf16.msra.mxu0 %v15604_v16  ;;  %10841 = vmatprep.mubr.bf16.mxu1 %v1117_v33  ;;  %v1118_v16 = vpack.c.bf16 %v642_v10, %v642_v10  ;;  %v15655_v33 = vld [vmem:[%s16271_s12 + $0x11d8] sm:$0xff]   ;;  %v15677_v12 = vld [vmem:[%s16271_s12 + $0x1280] sm:$0xff]  }
 0x217   : > { %14241 = vmatprep.subr.bf16.mxu0 %v15607_v22  ;;  %14234 = vmatpush3.bf16.msra.mxu1 %v15606_v20  ;;  %v651_v19 = vcombine.high %v649_v15, %v649_v15  ;;  %v15642_v20 = vld [vmem:[%s16271_s12 + $0x1100] sm:$0xff]   ;;  %v1120_v21 = vpack.c.bf16 %v649_v15, %v649_v15  ;;  %v15645_v22 = vld [vmem:[%s16271_s12 + $0x1148] sm:$0xff]  }
 0x218   : > { %14263 = vmatprep.subr.bf16.mxu1 %v15610_v27  ;;  %v15649_v27 = vld [vmem:[%s16271_s12 + $0x1150] sm:$0xff]  }
 0x219   : > { %10802 = vmatmul.mubr.bf16.vlgmr.msra.gmra.mrb[60].mxu0 %v1114_v26  ;;  %v1121_v23 = vpack.c.bf16 %v651_v19, %v651_v19  ;;  %v15646_v26 = vld [vmem:[%s16271_s12 + $0x1108] sm:$0xff]   ;;  %v15682_v19 = vld [vmem:[%s16271_s12 + $0x1250] sm:$0xff]  }
 0x21a   : > { %14242 = vmatpush3.bf16.msra.mxu0 %v15609_v25  ;;  %10842 = vmatmul.mubr.bf16.vlgmr.msra.gmra.mrb[60].mxu1 %v1116_v31  ;;  %v15647_v25 = vld [vmem:[%s16271_s12 + $0x11c8] sm:$0xff]   ;;  %v15653_v31 = vld [vmem:[%s16271_s12 + $0x1158] sm:$0xff]  }
 0x21b   : > { %14243 = vmatprep.subr.bf16.mxu0 %v15612_v32  ;;  %14264 = vmatpush3.bf16.msra.mxu1 %v15611_v30  ;;  %v15650_v30 = vld [vmem:[%s16271_s12 + $0x1110] sm:$0xff]  }
 0x21c   : > { %14265 = vmatprep.subr.bf16.mxu1 %v15614_v35  ;;  %10921 = vmatprep.mubr.bf16.mxu1 %v1121_v23  ;;  %v15652_v32 = vld [vmem:[%s16271_s12 + $0x1190] sm:$0xff]   ;;  %v15657_v35 = vld [vmem:[%s16271_s12 + $0x1160] sm:$0xff]   ;;  %v15686_v23 = vld [vmem:[%s16271_s12 + $0x1258] sm:$0xff]  }
 0x21e   : > { %14244 = vmatpush3.bf16.msra.mxu0 %v15613_v34  ;;  %v15654_v34 = vld [vmem:[%s16271_s12 + $0x1118] sm:$0xff]  }
 0x21f   : > { %14245 = vmatprep.subr.bf16.mxu0 %v15616_v37  ;;  %14266 = vmatpush3.bf16.msra.mxu1 %v15615_v36  ;;  %v15656_v36 = vld [vmem:[%s16271_s12 + $0x1198] sm:$0xff]   ;;  %v15659_v37 = vld [vmem:[%s16271_s12 + $0x11e0] sm:$0xff]  }
 0x220   : > { %14267 = vmatprep.subr.bf16.mxu1 %v15618_v39 }
 0x222   : > { %14246 = vmatpush3.bf16.msra.mxu0 %v15617_v38  ;;  %v15658_v38 = vld [vmem:[%s16271_s12 + $0x1120] sm:$0xff]  }
 0x223   : > { %14247 = vmatprep.subr.bf16.mxu0 %v15620_v41  ;;  %14268 = vmatpush3.bf16.msra.mxu1 %v15619_v40  ;;  %v15661_v40 = vld [vmem:[%s16271_s12 + $0x1168] sm:$0xff]   ;;  %v15660_v41 = vld [vmem:[%s16271_s12 + $0x11a0] sm:$0xff]  }
 0x224   : > { %14269 = vmatprep.subr.bf16.mxu1 %v15622_v44 }
 0x226   : > { %14248 = vmatpush3.bf16.msra.mxu0 %v15621_v43 }
 0x227   : > { %14249 = vmatprep.subr.bf16.mxu0 %v15624_v46  ;;  %14270 = vmatpush3.bf16.msra.mxu1 %v15623_v45  ;;  %v15663_v45 = vld [vmem:[%s16271_s12 + $0x11e8] sm:$0xff]  }
 0x228   : > { %14271 = vmatprep.subr.bf16.mxu1 %v15626_v48 }
 0x22a   : > { %14250 = vmatpush3.bf16.msra.mxu0 %v15625_v47 }
 0x22b   : > { %14251 = vmatprep.subr.bf16.mxu0 %v15628_v50  ;;  %14272 = vmatpush3.bf16.msra.mxu1 %v15627_v49  ;;  %v15662_v49 = vld [vmem:[%s16271_s12 + $0x1128] sm:$0xff]  }
 0x22c   : > { %v13949_v51 = vpop.f32.mrb[36].mxu0  ;;  %14273 = vmatprep.subr.bf16.mxu1 %v15630_v54 }
 0x22d   : > { %v13971_v52 = vpop.f32.mrb[36].mxu1  ;;  %v13950_v55 = vpop.f32.mrb[37].mxu0 }
 0x22e   : > { %v13972_v56 = vpop.f32.mrb[37].mxu1  ;;  %v13951_v57 = vadd.f32 %v13950_v55, %v13949_v51  ;;  %v13952_v58 = vpop.f32.mrb[38].mxu0  ;;  %14252 = vmatpush3.bf16.msra.mxu0 %v15629_v53  ;;  %v15665_v55 = vld [vmem:[%s16271_s12 + $0x1170] sm:$0xff]  }
 0x22f   : > { %v13973_v59 = vadd.f32 %v13972_v56, %v13971_v52  ;;  %v13974_v61 = vpop.f32.mrb[38].mxu1  ;;  %v13953_v63 = vpop.f32.mrb[39].mxu0  ;;  %14253 = vmatprep.subr.bf16.mxu0 %v15632_v62  ;;  %14274 = vmatpush3.bf16.msra.mxu1 %v15631_v60  ;;  %v15664_v52 = vld [vmem:[%s16271_s12 + $0x11a8] sm:$0xff]   ;;  %v15668_v60 = vld [vmem:[%s16271_s12 + $0x11b0] sm:$0xff]   ;;  %v15670_v62 = vld [vmem:[%s16271_s12 + $0x1138] sm:$0xff]  }
 0x230   : > { %v13975_v0 = vpop.f32.mrb[39].mxu1  ;;  %v10324_v1 = vadd.f32 %v13951_v57, %v16853_v14  ;;  %14275 = vmatprep.subr.bf16.mxu1 %v15634_v3  ;;  %v650_v14 = vcombine.high %v642_v10, %v642_v10  ;;  %v15666_v57 = vld [vmem:[%s16271_s12 + $0x1130] sm:$0xff]   ;;  %v15669_v61 = vld [vmem:[%s16271_s12 + $0x1178] sm:$0xff]  }
 0x231   : > { %v15671_v63 = vld [vmem:[%s16271_s12 + $0x11f8] sm:$0xff]   ;;  %v314_v0 = vld [vmem:[%s16266_s8 + $0x88] sm:$0xff] }
 0x232   : > { %v16890_v4 = vadd.f32 %v13973_v59, %v10324_v1  ;;  %14254 = vmatpush3.bf16.msra.mxu0 %v15633_v2  ;;  %v1119_v18 = vpack.c.bf16 %v650_v14, %v650_v14  ;;  %v15667_v59 = vld [vmem:[%s16271_s12 + $0x11f0] sm:$0xff]   ;;  %v659_v1 = vrot.slane %v314_v0, %v16309_v42  ;;  %v15672_v2 = vld [vmem:[%s16271_s12 + $0x11b8] sm:$0xff]   ;;  %v652_v3 = vcombine.high %v314_v0, %v314_v0  ;;  %v15678_v14 = vld [vmem:[%s16271_s12 + $0x1248] sm:$0xff]  }
 0x233   : > { %14255 = vmatprep.subr.bf16.mxu0 %v15636_v6  ;;  %14276 = vmatpush3.bf16.msra.mxu1 %v15635_v5 }
 0x234   : > { %14277 = vmatprep.subr.bf16.mxu1 %v15638_v8  ;;  %10881 = vmatprep.mubr.bf16.mxu0 %v1119_v18  ;;  %v667_v5 = vcombine.high %v659_v1, %v659_v1  ;;  %v666_v6 = vrot.slane %v652_v3, %v16309_v42  ;;  %v1122_v8 = vpack.c.bf16 %v659_v1, %v659_v1  ;;  %v15681_v18 = vld [vmem:[%s16271_s12 + $0x1288] sm:$0xff]  }
 0x236   : > { %14256 = vmatpush3.bf16.msra.mxu0 %v15637_v7  ;;  %v15675_v7 = vld [vmem:[%s16271_s12 + $0x1200] sm:$0xff]   ;;  %v1123_v10 = vpack.c.bf16 %v667_v5, %v667_v5 }
 0x237   : > { %14285 = vmatprep.subr.bf16.mxu0 %v15640_v13  ;;  %14278 = vmatpush3.bf16.msra.mxu1 %v15639_v11  ;;  %v668_v11 = vcombine.high %v666_v6, %v666_v6  ;;  %v1124_v13 = vpack.c.bf16 %v666_v6, %v666_v6  ;;  %v15710_v6 = vld [vmem:[%s16271_s12 + $0x1380] sm:$0xff]  }
 0x238   : > { %14307 = vmatprep.subr.bf16.mxu1 %v15643_v17  ;;  %v15680_v17 = vld [vmem:[%s16271_s12 + $0x12c8] sm:$0xff]  }
 0x239   : > { %10882 = vmatmul.mubr.bf16.vlgmr.msra.gmra.mrb[64].mxu0 %v1118_v16  ;;  %v1125_v15 = vpack.c.bf16 %v668_v11, %v668_v11  ;;  %v15679_v16 = vld [vmem:[%s16271_s12 + $0x1208] sm:$0xff]   ;;  %v15717_v11 = vld [vmem:[%s16271_s12 + $0x13d0] sm:$0xff]  }
 0x23a   : > { %14286 = vmatpush3.bf16.msra.mxu0 %v15642_v20  ;;  %10922 = vmatmul.mubr.bf16.vlgmr.msra.gmra.mrb[64].mxu1 %v1120_v21  ;;  %v15683_v20 = vld [vmem:[%s16271_s12 + $0x1210] sm:$0xff]  }
 0x23b   : > { %14287 = vmatprep.subr.bf16.mxu0 %v15645_v22  ;;  %14308 = vmatpush3.bf16.msra.mxu1 %v15644_v24  ;;  %v15684_v21 = vld [vmem:[%s16271_s12 + $0x12d0] sm:$0xff]   ;;  %v15687_v24 = vld [vmem:[%s16271_s12 + $0x1218] sm:$0xff]  }
 0x23c   : > { %14309 = vmatprep.subr.bf16.mxu1 %v15647_v25  ;;  %10961 = vmatprep.mubr.bf16.mxu0 %v1123_v10  ;;  %v15685_v22 = vld [vmem:[%s16271_s12 + $0x1290] sm:$0xff]   ;;  %v15688_v25 = vld [vmem:[%s16271_s12 + $0x12d8] sm:$0xff]   ;;  %v15714_v10 = vld [vmem:[%s16271_s12 + $0x1388] sm:$0xff]  }
 0x23d   : > { %11001 = vmatprep.mubr.bf16.mxu1 %v1125_v15  ;;  %v15721_v15 = vld [vmem:[%s16271_s12 + $0x13d8] sm:$0xff]  }
 0x23e   : > { %14288 = vmatpush3.bf16.msra.mxu0 %v15646_v26  ;;  %v15689_v26 = vld [vmem:[%s16271_s12 + $0x1298] sm:$0xff]  }
 0x23f   : > { %14289 = vmatprep.subr.bf16.mxu0 %v15649_v27  ;;  %14310 = vmatpush3.bf16.msra.mxu1 %v15648_v28  ;;  %v15690_v27 = vld [vmem:[%s16271_s12 + $0x1260] sm:$0xff]  }
 0x240   : > { %14311 = vmatprep.subr.bf16.mxu1 %v15651_v29  ;;  %v15691_v28 = vld [vmem:[%s16271_s12 + $0x1220] sm:$0xff]  }
 0x241   : > { %v15692_v29 = vld [vmem:[%s16271_s12 + $0x12e0] sm:$0xff]  }
 0x242   : > { %14290 = vmatpush3.bf16.msra.mxu0 %v15650_v30  ;;  %v15693_v30 = vld [vmem:[%s16271_s12 + $0x12a0] sm:$0xff]  }
 0x243   : > { %14291 = vmatprep.subr.bf16.mxu0 %v15653_v31  ;;  %14312 = vmatpush3.bf16.msra.mxu1 %v15652_v32  ;;  %v15694_v32 = vld [vmem:[%s16271_s12 + $0x1268] sm:$0xff]  }
 0x244   : > { %14313 = vmatprep.subr.bf16.mxu1 %v15655_v33 }
 0x246   : > { %14292 = vmatpush3.bf16.msra.mxu0 %v15654_v34  ;;  %v15695_v34 = vld [vmem:[%s16271_s12 + $0x1228] sm:$0xff]  }
 0x247   : > { %14293 = vmatprep.subr.bf16.mxu0 %v15657_v35  ;;  %14314 = vmatpush3.bf16.msra.mxu1 %v15656_v36 }
 0x248   : > { %14315 = vmatprep.subr.bf16.mxu1 %v15659_v37 }
 0x24a   : > { %14294 = vmatpush3.bf16.msra.mxu0 %v15658_v38 }
 0x24b   : > { %14295 = vmatprep.subr.bf16.mxu0 %v15661_v40  ;;  %14316 = vmatpush3.bf16.msra.mxu1 %v15660_v41  ;;  %v15696_v40 = vld [vmem:[%s16271_s12 + $0x12e8] sm:$0xff]  }
 0x24c   : > { %v13993_v39 = vpop.f32.mrb[40].mxu0  ;;  %14317 = vmatprep.subr.bf16.mxu1 %v15663_v45  ;;  %v15697_v41 = vld [vmem:[%s16271_s12 + $0x12a8] sm:$0xff]  }
 0x24d   : > { %v13994_v43 = vpop.f32.mrb[41].mxu0  ;;  %v14015_v44 = vpop.f32.mrb[40].mxu1 }
 0x24e   : > { %v13995_v46 = vadd.f32 %v13994_v43, %v13993_v39  ;;  %v13996_v47 = vpop.f32.mrb[42].mxu0  ;;  %v14016_v48 = vpop.f32.mrb[41].mxu1  ;;  %14296 = vmatpush3.bf16.msra.mxu0 %v15662_v49 }
 0x24f   : > { %v13997_v50 = vpop.f32.mrb[43].mxu0  ;;  %v14017_v51 = vadd.f32 %v14016_v48, %v14015_v44  ;;  %v14018_v53 = vpop.f32.mrb[42].mxu1  ;;  %14297 = vmatprep.subr.bf16.mxu0 %v15665_v55  ;;  %14318 = vmatpush3.bf16.msra.mxu1 %v15664_v52  ;;  %v15699_v48 = vld [vmem:[%s16271_s12 + $0x1230] sm:$0xff]   ;;  %v15702_v52 = vld [vmem:[%s16271_s12 + $0x1278] sm:$0xff]  }
 0x250   : > { %v10404_v54 = vadd.f32 %v13995_v46, %v16890_v4  ;;  %v14019_v56 = vpop.f32.mrb[43].mxu1  ;;  %14319 = vmatprep.subr.bf16.mxu1 %v15667_v59  ;;  %v15673_v4 = vld [vmem:[%s16271_s12 + $0x1240] sm:$0xff]   ;;  %v15698_v46 = vld [vmem:[%s16271_s12 + $0x1270] sm:$0xff]   ;;  %v15703_v53 = vld [vmem:[%s16271_s12 + $0x1238] sm:$0xff]  }
 0x251   : > { %v15700_v50 = vld [vmem:[%s16271_s12 + $0x12f0] sm:$0xff]   ;;  %v15706_v59 = vld [vmem:[%s16271_s12 + $0x1340] sm:$0xff]  }
 0x252   : > { %v16927_v58 = vadd.f32 %v14017_v51, %v10404_v54  ;;  %14298 = vmatpush3.bf16.msra.mxu0 %v15666_v57  ;;  %v15701_v51 = vld [vmem:[%s16271_s12 + $0x12b0] sm:$0xff]   ;;  %v15704_v54 = vld [vmem:[%s16271_s12 + $0x12f8] sm:$0xff]  }
 0x253   : > { %14299 = vmatprep.subr.bf16.mxu0 %v15669_v61  ;;  %14320 = vmatpush3.bf16.msra.mxu1 %v15668_v60  ;;  %v315_v55 = vld [vmem:[%s16266_s8 + $0x90] sm:$0xff]  ;;  %v15705_v57 = vld [vmem:[%s16271_s12 + $0x12b8] sm:$0xff]  }
 0x254   : > { %14321 = vmatprep.subr.bf16.mxu1 %v15671_v63  ;;  %v676_v56 = vrot.slane %v315_v55, %v16309_v42  ;;  %v15709_v63 = vld [vmem:[%s16271_s12 + $0x13c0] sm:$0xff]  }
 0x256   : > { %14300 = vmatpush3.bf16.msra.mxu0 %v15670_v62  ;;  %v684_v60 = vcombine.high %v676_v56, %v676_v56  ;;  %v1126_v62 = vpack.c.bf16 %v676_v56, %v676_v56 }
 0x257   : > { %14329 = vmatprep.subr.bf16.mxu0 %v15673_v4  ;;  %14322 = vmatpush3.bf16.msra.mxu1 %v15672_v2  ;;  %v15708_v2 = vld [vmem:[%s16271_s12 + $0x1300] sm:$0xff]   ;;  %v15711_v4 = vld [vmem:[%s16271_s12 + $0x1348] sm:$0xff]  }
 0x258   : > { %14351 = vmatprep.subr.bf16.mxu1 %v15676_v9  ;;  %v1127_v0 = vpack.c.bf16 %v684_v60, %v684_v60  ;;  %v15715_v9 = vld [vmem:[%s16271_s12 + $0x1350] sm:$0xff]  }
 0x259   : > { %10962 = vmatmul.mubr.bf16.vlgmr.msra.gmra.mrb[68].mxu0 %v1122_v8  ;;  %v15712_v8 = vld [vmem:[%s16271_s12 + $0x1308] sm:$0xff]  }
 0x25a   : > { %14330 = vmatpush3.bf16.msra.mxu0 %v15675_v7  ;;  %11002 = vmatmul.mubr.bf16.vlgmr.msra.gmra.mrb[68].mxu1 %v1124_v13  ;;  %v15713_v7 = vld [vmem:[%s16271_s12 + $0x13c8] sm:$0xff]   ;;  %v15719_v13 = vld [vmem:[%s16271_s12 + $0x1358] sm:$0xff]  }
 0x25b   : > { %14331 = vmatprep.subr.bf16.mxu0 %v15678_v14  ;;  %14352 = vmatpush3.bf16.msra.mxu1 %v15677_v12  ;;  %v15716_v12 = vld [vmem:[%s16271_s12 + $0x1310] sm:$0xff]  }
 0x25c   : > { %14353 = vmatprep.subr.bf16.mxu1 %v15680_v17  ;;  %11041 = vmatprep.mubr.bf16.mxu0 %v1127_v0  ;;  %v15718_v14 = vld [vmem:[%s16271_s12 + $0x1390] sm:$0xff]   ;;  %v15723_v17 = vld [vmem:[%s16271_s12 + $0x1360] sm:$0xff]  }
 0x25d   : > { %v15748_v0 = vld [vmem:[%s16271_s12 + $0x1450] sm:$0xff]  }
 0x25e   : > { %14332 = vmatpush3.bf16.msra.mxu0 %v15679_v16  ;;  %v15720_v16 = vld [vmem:[%s16271_s12 + $0x1318] sm:$0xff]  }
 0x25f   : > { %14333 = vmatprep.subr.bf16.mxu0 %v15682_v19  ;;  %14354 = vmatpush3.bf16.msra.mxu1 %v15681_v18  ;;  %v15722_v18 = vld [vmem:[%s16271_s12 + $0x1398] sm:$0xff]   ;;  %v15725_v19 = vld [vmem:[%s16271_s12 + $0x13e0] sm:$0xff]  }
 0x260   : > { %14355 = vmatprep.subr.bf16.mxu1 %v15684_v21 }
 0x262   : > { %14334 = vmatpush3.bf16.msra.mxu0 %v15683_v20  ;;  %v15724_v20 = vld [vmem:[%s16271_s12 + $0x1320] sm:$0xff]  }
 0x263   : > { %14335 = vmatprep.subr.bf16.mxu0 %v15686_v23  ;;  %14356 = vmatpush3.bf16.msra.mxu1 %v15685_v22  ;;  %v15727_v22 = vld [vmem:[%s16271_s12 + $0x1368] sm:$0xff]   ;;  %v15726_v23 = vld [vmem:[%s16271_s12 + $0x13a0] sm:$0xff]  }
 0x264   : > { %14357 = vmatprep.subr.bf16.mxu1 %v15688_v25 }
 0x266   : > { %14336 = vmatpush3.bf16.msra.mxu0 %v15687_v24 }
 0x267   : > { %14337 = vmatprep.subr.bf16.mxu0 %v15690_v27  ;;  %14358 = vmatpush3.bf16.msra.mxu1 %v15689_v26 }
 0x268   : > { %14359 = vmatprep.subr.bf16.mxu1 %v15692_v29  ;;  %v15729_v29 = vld [vmem:[%s16271_s12 + $0x13e8] sm:$0xff]  }
 0x26a   : > { %14338 = vmatpush3.bf16.msra.mxu0 %v15691_v28  ;;  %v15728_v28 = vld [vmem:[%s16271_s12 + $0x1328] sm:$0xff]  }
 0x26b   : > { %14339 = vmatprep.subr.bf16.mxu0 %v15694_v32  ;;  %14360 = vmatpush3.bf16.msra.mxu1 %v15693_v30  ;;  %v15730_v32 = vld [vmem:[%s16271_s12 + $0x13a8] sm:$0xff]  }
 0x26c   : > { %v14037_v31 = vpop.f32.mrb[44].mxu0  ;;  %14361 = vmatprep.subr.bf16.mxu1 %v15696_v40  ;;  %v15733_v40 = vld [vmem:[%s16271_s12 + $0x13f0] sm:$0xff]  }
 0x26d   : > { %v14038_v33 = vpop.f32.mrb[45].mxu0  ;;  %v14059_v37 = vpop.f32.mrb[44].mxu1 }
 0x26e   : > { %v14039_v35 = vadd.f32 %v14038_v33, %v14037_v31  ;;  %v14040_v36 = vpop.f32.mrb[46].mxu0  ;;  %v14060_v39 = vpop.f32.mrb[45].mxu1  ;;  %14340 = vmatpush3.bf16.msra.mxu0 %v15695_v34 }
 0x26f   : > { %v14041_v38 = vpop.f32.mrb[47].mxu0  ;;  %v14061_v44 = vadd.f32 %v14060_v39, %v14059_v37  ;;  %v14062_v45 = vpop.f32.mrb[46].mxu1  ;;  %14341 = vmatprep.subr.bf16.mxu0 %v15698_v46  ;;  %14362 = vmatpush3.bf16.msra.mxu1 %v15697_v41  ;;  %v15731_v36 = vld [vmem:[%s16271_s12 + $0x1370] sm:$0xff]   ;;  %v316_v46 = vld [vmem:[%s16266_s8 + $0x98] sm:$0xff] }
 0x270   : > { %v10484_v43 = vadd.f32 %v14039_v35, %v16927_v58  ;;  %v14063_v47 = vpop.f32.mrb[47].mxu1  ;;  %14363 = vmatprep.subr.bf16.mxu1 %v15700_v50  ;;  %v669_v58 = vcombine.high %v315_v55, %v315_v55  ;;  %v15732_v38 = vld [vmem:[%s16271_s12 + $0x1330] sm:$0xff]   ;;  %v15737_v45 = vld [vmem:[%s16271_s12 + $0x13f8] sm:$0xff]   ;;  %v15739_v50 = vld [vmem:[%s16271_s12 + $0x1440] sm:$0xff]  }
 0x271   : > { %v15734_v41 = vld [vmem:[%s16271_s12 + $0x13b0] sm:$0xff]   ;;  %v693_v47 = vrot.slane %v316_v46, %v16309_v42 }
 0x272   : > { %v16965_v49 = vadd.f32 %v14061_v44, %v10484_v43  ;;  %14342 = vmatpush3.bf16.msra.mxu0 %v15699_v48  ;;  %v683_v61 = vrot.slane %v669_v58, %v16309_v42  ;;  %v15735_v43 = vld [vmem:[%s16271_s12 + $0x1378] sm:$0xff]  }
 0x273   : > { %14343 = vmatprep.subr.bf16.mxu0 %v15702_v52  ;;  %14364 = vmatpush3.bf16.msra.mxu1 %v15701_v51  ;;  %v15736_v44 = vld [vmem:[%s16271_s12 + $0x1338] sm:$0xff]   ;;  %v701_v51 = vcombine.high %v693_v47, %v693_v47 }
 0x274   : > { %14365 = vmatprep.subr.bf16.mxu1 %v15704_v54  ;;  %v685_v1 = vcombine.high %v683_v61, %v683_v61  ;;  %v1128_v3 = vpack.c.bf16 %v683_v61, %v683_v61  ;;  %v15738_v48 = vld [vmem:[%s16271_s12 + $0x13b8] sm:$0xff]   ;;  %v15742_v54 = vld [vmem:[%s16271_s12 + $0x14c0] sm:$0xff]  }
 0x275   : > { %v1131_v55 = vpack.c.bf16 %v701_v51, %v701_v51  ;;  %v15743_v61 = vld [vmem:[%s16271_s12 + $0x1480] sm:$0xff]   ;;  %v15777_v51 = vld [vmem:[%s16271_s12 + $0x1548] sm:$0xff]  }
 0x276   : > { %14344 = vmatpush3.bf16.msra.mxu0 %v15703_v53  ;;  %v1129_v5 = vpack.c.bf16 %v685_v1, %v685_v1  ;;  %v1130_v53 = vpack.c.bf16 %v693_v47, %v693_v47  ;;  %v15747_v1 = vld [vmem:[%s16271_s12 + $0x1488] sm:$0xff]  }
 0x277   : > { %14373 = vmatprep.subr.bf16.mxu0 %v15706_v59  ;;  %14366 = vmatpush3.bf16.msra.mxu1 %v15705_v57  ;;  %v15741_v57 = vld [vmem:[%s16271_s12 + $0x1400] sm:$0xff]   ;;  %v15744_v59 = vld [vmem:[%s16271_s12 + $0x1448] sm:$0xff]  }
 0x278   : > { %14395 = vmatprep.subr.bf16.mxu1 %v15709_v63  ;;  %11081 = vmatprep.mubr.bf16.mxu1 %v1129_v5  ;;  %v15745_v63 = vld [vmem:[%s16271_s12 + $0x1408] sm:$0xff]   ;;  %v15751_v5 = vld [vmem:[%s16271_s12 + $0x1490] sm:$0xff]  }
 0x279   : > { %11042 = vmatmul.mubr.bf16.vlgmr.msra.gmra.mrb[72].mxu0 %v1126_v62  ;;  %v15746_v62 = vld [vmem:[%s16271_s12 + $0x14c8] sm:$0xff]  }
 0x27a   : > { %14374 = vmatpush3.bf16.msra.mxu0 %v15708_v2  ;;  %11082 = vmatmul.mubr.bf16.vlgmr.msra.gmra.mrb[72].mxu1 %v1128_v3  ;;  %v15750_v2 = vld [vmem:[%s16271_s12 + $0x14d0] sm:$0xff]  }
 0x27b   : > { %14375 = vmatprep.subr.bf16.mxu0 %v15711_v4  ;;  %14396 = vmatpush3.bf16.msra.mxu1 %v15710_v6  ;;  %v15749_v3 = vld [vmem:[%s16271_s12 + $0x1410] sm:$0xff]   ;;  %v15752_v4 = vld [vmem:[%s16271_s12 + $0x1458] sm:$0xff]  }
 0x27c   : > { %14397 = vmatprep.subr.bf16.mxu1 %v15713_v7  ;;  %11121 = vmatprep.mubr.bf16.mxu0 %v1131_v55  ;;  %v15754_v6 = vld [vmem:[%s16271_s12 + $0x14d8] sm:$0xff]   ;;  %v15780_v55 = vld [vmem:[%s16271_s12 + $0x1588] sm:$0xff]  }
 0x27d   : > { %v15753_v7 = vld [vmem:[%s16271_s12 + $0x1418] sm:$0xff]  }
 0x27e   : > { %14376 = vmatpush3.bf16.msra.mxu0 %v15712_v8  ;;  %v15756_v8 = vld [vmem:[%s16271_s12 + $0x1460] sm:$0xff]  }
 0x27f   : > { %14377 = vmatprep.subr.bf16.mxu0 %v15715_v9  ;;  %14398 = vmatpush3.bf16.msra.mxu1 %v15714_v10  ;;  %v15755_v9 = vld [vmem:[%s16271_s12 + $0x1498] sm:$0xff]   ;;  %v15758_v10 = vld [vmem:[%s16271_s12 + $0x14e0] sm:$0xff]  }
 0x280   : > { %14399 = vmatprep.subr.bf16.mxu1 %v15717_v11  ;;  %v15757_v11 = vld [vmem:[%s16271_s12 + $0x1420] sm:$0xff]  }
 0x282   : > { %14378 = vmatpush3.bf16.msra.mxu0 %v15716_v12 }
 0x283   : > { %14379 = vmatprep.subr.bf16.mxu0 %v15719_v13  ;;  %14400 = vmatpush3.bf16.msra.mxu1 %v15718_v14  ;;  %v15760_v13 = vld [vmem:[%s16271_s12 + $0x1468] sm:$0xff]   ;;  %v15759_v14 = vld [vmem:[%s16271_s12 + $0x14a0] sm:$0xff]  }
 0x284   : > { %14401 = vmatprep.subr.bf16.mxu1 %v15721_v15 }
 0x286   : > { %14380 = vmatpush3.bf16.msra.mxu0 %v15720_v16 }
 0x287   : > { %14381 = vmatprep.subr.bf16.mxu0 %v15723_v17  ;;  %14402 = vmatpush3.bf16.msra.mxu1 %v15722_v18 }
 0x288   : > { %14403 = vmatprep.subr.bf16.mxu1 %v15725_v19  ;;  %v15761_v19 = vld [vmem:[%s16271_s12 + $0x1428] sm:$0xff]  }
 0x28a   : > { %14382 = vmatpush3.bf16.msra.mxu0 %v15724_v20  ;;  %v15762_v20 = vld [vmem:[%s16271_s12 + $0x14e8] sm:$0xff]  }
 0x28b   : > { %14383 = vmatprep.subr.bf16.mxu0 %v15727_v22  ;;  %14404 = vmatpush3.bf16.msra.mxu1 %v15726_v23  ;;  %v15763_v23 = vld [vmem:[%s16271_s12 + $0x14a8] sm:$0xff]  }
 0x28c   : > { %v14081_v21 = vpop.f32.mrb[48].mxu0  ;;  %14405 = vmatprep.subr.bf16.mxu1 %v15729_v29  ;;  %v15765_v29 = vld [vmem:[%s16271_s12 + $0x1430] sm:$0xff]  }
 0x28d   : > { %v14082_v24 = vpop.f32.mrb[49].mxu0  ;;  %v14103_v27 = vpop.f32.mrb[48].mxu1 }
 0x28e   : > { %v14083_v25 = vadd.f32 %v14082_v24, %v14081_v21  ;;  %v14084_v26 = vpop.f32.mrb[50].mxu0  ;;  %v14104_v31 = vpop.f32.mrb[49].mxu1  ;;  %14384 = vmatpush3.bf16.msra.mxu0 %v15728_v28 }
 0x28f   : > { %v14085_v30 = vpop.f32.mrb[51].mxu0  ;;  %v14105_v34 = vadd.f32 %v14104_v31, %v14103_v27  ;;  %v14106_v35 = vpop.f32.mrb[50].mxu1  ;;  %14385 = vmatprep.subr.bf16.mxu0 %v15731_v36  ;;  %14406 = vmatpush3.bf16.msra.mxu1 %v15730_v32  ;;  %v15764_v27 = vld [vmem:[%s16271_s12 + $0x1470] sm:$0xff]   ;;  %v317_v36 = vld [vmem:[%s16266_s8 + $0xa0] sm:$0xff] }
 0x290   : > { %v10564_v33 = vadd.f32 %v14083_v25, %v16965_v49  ;;  %v14107_v37 = vpop.f32.mrb[51].mxu1  ;;  %14407 = vmatprep.subr.bf16.mxu1 %v15733_v40  ;;  %v686_v49 = vcombine.high %v316_v46, %v316_v46  ;;  %v15766_v31 = vld [vmem:[%s16271_s12 + $0x14f0] sm:$0xff]   ;;  %v15770_v35 = vld [vmem:[%s16271_s12 + $0x14f8] sm:$0xff]   ;;  %v15772_v40 = vld [vmem:[%s16271_s12 + $0x1540] sm:$0xff]  }
 0x291   : > { %v15767_v32 = vld [vmem:[%s16271_s12 + $0x14b0] sm:$0xff]   ;;  %v710_v37 = vrot.slane %v317_v36, %v16309_v42  ;;  %v15775_v46 = vld [vmem:[%s16271_s12 + $0x15c0] sm:$0xff]  }
 0x292   : > { %v17003_v39 = vadd.f32 %v14105_v34, %v10564_v33  ;;  %14386 = vmatpush3.bf16.msra.mxu0 %v15732_v38  ;;  %v700_v52 = vrot.slane %v686_v49, %v16309_v42  ;;  %v15768_v33 = vld [vmem:[%s16271_s12 + $0x1478] sm:$0xff]   ;;  %v15776_v49 = vld [vmem:[%s16271_s12 + $0x1580] sm:$0xff]  }
 0x293   : > { %14387 = vmatprep.subr.bf16.mxu0 %v15735_v43  ;;  %14408 = vmatpush3.bf16.msra.mxu1 %v15734_v41  ;;  %v15769_v34 = vld [vmem:[%s16271_s12 + $0x1438] sm:$0xff]   ;;  %v718_v41 = vcombine.high %v710_v37, %v710_v37 }
 0x294   : > { %14409 = vmatprep.subr.bf16.mxu1 %v15737_v45  ;;  %v702_v56 = vcombine.high %v700_v52, %v700_v52  ;;  %v1132_v58 = vpack.c.bf16 %v700_v52, %v700_v52  ;;  %v15771_v38 = vld [vmem:[%s16271_s12 + $0x14b8] sm:$0xff]   ;;  %v1134_v45 = vpack.c.bf16 %v710_v37, %v710_v37 }
 0x295   : > { %v1135_v47 = vpack.c.bf16 %v718_v41, %v718_v41  ;;  %v15810_v41 = vld [vmem:[%s16271_s12 + $0x1648] sm:$0xff]  }
 0x296   : > { %14388 = vmatpush3.bf16.msra.mxu0 %v15736_v44  ;;  %v1133_v60 = vpack.c.bf16 %v702_v56, %v702_v56  ;;  %v15774_v44 = vld [vmem:[%s16271_s12 + $0x1500] sm:$0xff]   ;;  %v15781_v56 = vld [vmem:[%s16271_s12 + $0x1550] sm:$0xff]  }
 0x297   : > { %14417 = vmatprep.subr.bf16.mxu0 %v15739_v50  ;;  %14410 = vmatpush3.bf16.msra.mxu1 %v15738_v48 }
 0x298   : > { %14439 = vmatprep.subr.bf16.mxu1 %v15742_v54  ;;  %11161 = vmatprep.mubr.bf16.mxu1 %v1133_v60  ;;  %v15779_v54 = vld [vmem:[%s16271_s12 + $0x15c8] sm:$0xff]   ;;  %v15785_v60 = vld [vmem:[%s16271_s12 + $0x1558] sm:$0xff]  }
 0x299   : > { %11122 = vmatmul.mubr.bf16.vlgmr.msra.gmra.mrb[76].mxu0 %v1130_v53  ;;  %v15778_v53 = vld [vmem:[%s16271_s12 + $0x1508] sm:$0xff]  }
 0x29a   : > { %14418 = vmatpush3.bf16.msra.mxu0 %v15741_v57  ;;  %11162 = vmatmul.mubr.bf16.vlgmr.msra.gmra.mrb[76].mxu1 %v1132_v58  ;;  %v15782_v57 = vld [vmem:[%s16271_s12 + $0x1510] sm:$0xff]  }
 0x29b   : > { %14419 = vmatprep.subr.bf16.mxu0 %v15744_v59  ;;  %14440 = vmatpush3.bf16.msra.mxu1 %v15743_v61  ;;  %v15783_v58 = vld [vmem:[%s16271_s12 + $0x15d0] sm:$0xff]   ;;  %v15786_v61 = vld [vmem:[%s16271_s12 + $0x1518] sm:$0xff]  }
 0x29c   : > { %14441 = vmatprep.subr.bf16.mxu1 %v15746_v62  ;;  %11201 = vmatprep.mubr.bf16.mxu0 %v1135_v47  ;;  %v15784_v59 = vld [vmem:[%s16271_s12 + $0x1590] sm:$0xff]   ;;  %v15787_v62 = vld [vmem:[%s16271_s12 + $0x15d8] sm:$0xff]  }
 0x29d   : > { %v15814_v47 = vld [vmem:[%s16271_s12 + $0x1650] sm:$0xff]  }
 0x29e   : > { %14420 = vmatpush3.bf16.msra.mxu0 %v15745_v63  ;;  %v15788_v63 = vld [vmem:[%s16271_s12 + $0x1598] sm:$0xff]  }
 0x29f   : > { %14421 = vmatprep.subr.bf16.mxu0 %v15748_v0  ;;  %14442 = vmatpush3.bf16.msra.mxu1 %v15747_v1  ;;  %v15789_v0 = vld [vmem:[%s16271_s12 + $0x1560] sm:$0xff]  }
 0x2a0   : > { %14443 = vmatprep.subr.bf16.mxu1 %v15750_v2  ;;  %v15790_v1 = vld [vmem:[%s16271_s12 + $0x1520] sm:$0xff]  }
 0x2a1   : > { %v15791_v2 = vld [vmem:[%s16271_s12 + $0x15e0] sm:$0xff]  }
 0x2a2   : > { %14422 = vmatpush3.bf16.msra.mxu0 %v15749_v3  ;;  %v15792_v3 = vld [vmem:[%s16271_s12 + $0x15a0] sm:$0xff]  }
 0x2a3   : > { %14423 = vmatprep.subr.bf16.mxu0 %v15752_v4  ;;  %14444 = vmatpush3.bf16.msra.mxu1 %v15751_v5  ;;  %v15793_v4 = vld [vmem:[%s16271_s12 + $0x1568] sm:$0xff]  }
 0x2a4   : > { %14445 = vmatprep.subr.bf16.mxu1 %v15754_v6  ;;  %v15794_v6 = vld [vmem:[%s16271_s12 + $0x1528] sm:$0xff]  }
 0x2a6   : > { %14424 = vmatpush3.bf16.msra.mxu0 %v15753_v7 }
 0x2a7   : > { %14425 = vmatprep.subr.bf16.mxu0 %v15756_v8  ;;  %14446 = vmatpush3.bf16.msra.mxu1 %v15755_v9  ;;  %v15795_v8 = vld [vmem:[%s16271_s12 + $0x15e8] sm:$0xff]  }
 0x2a8   : > { %14447 = vmatprep.subr.bf16.mxu1 %v15758_v10 }
 0x2aa   : > { %14426 = vmatpush3.bf16.msra.mxu0 %v15757_v11 }
 0x2ab   : > { %14427 = vmatprep.subr.bf16.mxu0 %v15760_v13  ;;  %14448 = vmatpush3.bf16.msra.mxu1 %v15759_v14  ;;  %v15796_v14 = vld [vmem:[%s16271_s12 + $0x15a8] sm:$0xff]  }
 0x2ac   : > { %v14125_v12 = vpop.f32.mrb[52].mxu0  ;;  %14449 = vmatprep.subr.bf16.mxu1 %v15762_v20 }
 0x2ad   : > { %v14126_v15 = vpop.f32.mrb[53].mxu0  ;;  %v14147_v18 = vpop.f32.mrb[52].mxu1 }
 0x2ae   : > { %v14127_v16 = vadd.f32 %v14126_v15, %v14125_v12  ;;  %v14128_v17 = vpop.f32.mrb[54].mxu0  ;;  %v14148_v22 = vpop.f32.mrb[53].mxu1  ;;  %14428 = vmatpush3.bf16.msra.mxu0 %v15761_v19  ;;  %v15797_v15 = vld [vmem:[%s16271_s12 + $0x1570] sm:$0xff]  }
 0x2af   : > { %v14129_v21 = vpop.f32.mrb[55].mxu0  ;;  %v14149_v25 = vadd.f32 %v14148_v22, %v14147_v18  ;;  %v14150_v26 = vpop.f32.mrb[54].mxu1  ;;  %14429 = vmatprep.subr.bf16.mxu0 %v15764_v27  ;;  %14450 = vmatpush3.bf16.msra.mxu1 %v15763_v23  ;;  %v15798_v19 = vld [vmem:[%s16271_s12 + $0x1530] sm:$0xff]   ;;  %v318_v27 = vld [vmem:[%s16266_s8 + $0xa8] sm:$0xff] }
 0x2b0   : > { %v10644_v24 = vadd.f32 %v14127_v16, %v17003_v39  ;;  %v14151_v28 = vpop.f32.mrb[55].mxu1  ;;  %14451 = vmatprep.subr.bf16.mxu1 %v15766_v31  ;;  %v703_v39 = vcombine.high %v317_v36, %v317_v36  ;;  %v15799_v21 = vld [vmem:[%s16271_s12 + $0x15f0] sm:$0xff]   ;;  %v15803_v26 = vld [vmem:[%s16271_s12 + $0x15f8] sm:$0xff]   ;;  %v15805_v31 = vld [vmem:[%s16271_s12 + $0x1640] sm:$0xff]  }
 0x2b1   : > { %v15800_v23 = vld [vmem:[%s16271_s12 + $0x15b0] sm:$0xff]   ;;  %v727_v28 = vrot.slane %v318_v27, %v16309_v42  ;;  %v15808_v36 = vld [vmem:[%s16271_s12 + $0x16c0] sm:$0xff]  }
 0x2b2   : > { %v17041_v30 = vadd.f32 %v14149_v25, %v10644_v24  ;;  %14430 = vmatpush3.bf16.msra.mxu0 %v15765_v29  ;;  %v717_v43 = vrot.slane %v703_v39, %v16309_v42  ;;  %v15801_v24 = vld [vmem:[%s16271_s12 + $0x1578] sm:$0xff]   ;;  %v15809_v39 = vld [vmem:[%s16271_s12 + $0x1680] sm:$0xff]  }
 0x2b3   : > { %14431 = vmatprep.subr.bf16.mxu0 %v15768_v33  ;;  %14452 = vmatpush3.bf16.msra.mxu1 %v15767_v32  ;;  %v15802_v25 = vld [vmem:[%s16271_s12 + $0x1538] sm:$0xff]   ;;  %v735_v32 = vcombine.high %v727_v28, %v727_v28 }
 0x2b4   : > { %14453 = vmatprep.subr.bf16.mxu1 %v15770_v35  ;;  %v719_v48 = vcombine.high %v717_v43, %v717_v43  ;;  %v1136_v50 = vpack.c.bf16 %v717_v43, %v717_v43  ;;  %v15804_v29 = vld [vmem:[%s16271_s12 + $0x15b8] sm:$0xff]   ;;  %v1138_v35 = vpack.c.bf16 %v727_v28, %v727_v28 }
 0x2b5   : > { %v1139_v37 = vpack.c.bf16 %v735_v32, %v735_v32  ;;  %v15843_v32 = vld [vmem:[%s16271_s12 + $0x1748] sm:$0xff]  }
 0x2b6   : > { %14432 = vmatpush3.bf16.msra.mxu0 %v15769_v34  ;;  %v1137_v52 = vpack.c.bf16 %v719_v48, %v719_v48  ;;  %v15807_v34 = vld [vmem:[%s16271_s12 + $0x1600] sm:$0xff]   ;;  %v15815_v48 = vld [vmem:[%s16271_s12 + $0x1610] sm:$0xff]  }
 0x2b7   : > { %14461 = vmatprep.subr.bf16.mxu0 %v15772_v40  ;;  %14454 = vmatpush3.bf16.msra.mxu1 %v15771_v38 }
 0x2b8   : > { %14483 = vmatprep.subr.bf16.mxu1 %v15775_v46  ;;  %11241 = vmatprep.mubr.bf16.mxu1 %v1137_v52  ;;  %v15813_v46 = vld [vmem:[%s16271_s12 + $0x1688] sm:$0xff]   ;;  %v15819_v52 = vld [vmem:[%s16271_s12 + $0x1618] sm:$0xff]  }
 0x2b9   : > { %11202 = vmatmul.mubr.bf16.vlgmr.msra.gmra.mrb[80].mxu0 %v1134_v45  ;;  %v15812_v45 = vld [vmem:[%s16271_s12 + $0x16c8] sm:$0xff]  }
 0x2ba   : > { %14462 = vmatpush3.bf16.msra.mxu0 %v15774_v44  ;;  %11242 = vmatmul.mubr.bf16.vlgmr.msra.gmra.mrb[80].mxu1 %v1136_v50  ;;  %v15811_v44 = vld [vmem:[%s16271_s12 + $0x1608] sm:$0xff]   ;;  %v15817_v50 = vld [vmem:[%s16271_s12 + $0x1690] sm:$0xff]  }
 0x2bb   : > { %14463 = vmatprep.subr.bf16.mxu0 %v15777_v51  ;;  %14484 = vmatpush3.bf16.msra.mxu1 %v15776_v49  ;;  %v15816_v49 = vld [vmem:[%s16271_s12 + $0x16d0] sm:$0xff]   ;;  %v15818_v51 = vld [vmem:[%s16271_s12 + $0x1658] sm:$0xff]  }
 0x2bc   : > { %14485 = vmatprep.subr.bf16.mxu1 %v15779_v54  ;;  %11281 = vmatprep.mubr.bf16.mxu0 %v1139_v37  ;;  %v15821_v54 = vld [vmem:[%s16271_s12 + $0x1698] sm:$0xff]   ;;  %v15847_v37 = vld [vmem:[%s16271_s12 + $0x1750] sm:$0xff]  }
 0x2be   : > { %14464 = vmatpush3.bf16.msra.mxu0 %v15778_v53  ;;  %v15820_v53 = vld [vmem:[%s16271_s12 + $0x16d8] sm:$0xff]  }
 0x2bf   : > { %14465 = vmatprep.subr.bf16.mxu0 %v15781_v56  ;;  %14486 = vmatpush3.bf16.msra.mxu1 %v15780_v55  ;;  %v15822_v55 = vld [vmem:[%s16271_s12 + $0x1660] sm:$0xff]  }
 0x2c0   : > { %14487 = vmatprep.subr.bf16.mxu1 %v15783_v58  ;;  %v15823_v56 = vld [vmem:[%s16271_s12 + $0x1620] sm:$0xff]  }
 0x2c1   : > { %v15825_v58 = vld [vmem:[%s16271_s12 + $0x16a0] sm:$0xff]  }
 0x2c2   : > { %14466 = vmatpush3.bf16.msra.mxu0 %v15782_v57  ;;  %v15824_v57 = vld [vmem:[%s16271_s12 + $0x16e0] sm:$0xff]  }
 0x2c3   : > { %14467 = vmatprep.subr.bf16.mxu0 %v15785_v60  ;;  %14488 = vmatpush3.bf16.msra.mxu1 %v15784_v59  ;;  %v15826_v59 = vld [vmem:[%s16271_s12 + $0x1668] sm:$0xff]  }
 0x2c4   : > { %14489 = vmatprep.subr.bf16.mxu1 %v15787_v62 }
 0x2c6   : > { %14468 = vmatpush3.bf16.msra.mxu0 %v15786_v61  ;;  %v15827_v61 = vld [vmem:[%s16271_s12 + $0x1628] sm:$0xff]  }
 0x2c7   : > { %14469 = vmatprep.subr.bf16.mxu0 %v15789_v0  ;;  %14490 = vmatpush3.bf16.msra.mxu1 %v15788_v63  ;;  %v15828_v63 = vld [vmem:[%s16271_s12 + $0x16e8] sm:$0xff]  }
 0x2c8   : > { %14491 = vmatprep.subr.bf16.mxu1 %v15791_v2 }
 0x2ca   : > { %14470 = vmatpush3.bf16.msra.mxu0 %v15790_v1 }
 0x2cb   : > { %14471 = vmatprep.subr.bf16.mxu0 %v15793_v4  ;;  %14492 = vmatpush3.bf16.msra.mxu1 %v15792_v3  ;;  %v15829_v3 = vld [vmem:[%s16271_s12 + $0x16a8] sm:$0xff]   ;;  %v15830_v4 = vld [vmem:[%s16271_s12 + $0x1670] sm:$0xff]  }
 0x2cc   : > { %v14169_v5 = vpop.f32.mrb[56].mxu0  ;;  %14493 = vmatprep.subr.bf16.mxu1 %v15795_v8 }
 0x2cd   : > { %v14170_v7 = vpop.f32.mrb[57].mxu0  ;;  %v14191_v11 = vpop.f32.mrb[56].mxu1 }
 0x2ce   : > { %v14171_v9 = vadd.f32 %v14170_v7, %v14169_v5  ;;  %v14172_v10 = vpop.f32.mrb[58].mxu0  ;;  %v14192_v13 = vpop.f32.mrb[57].mxu1  ;;  %14472 = vmatpush3.bf16.msra.mxu0 %v15794_v6 }
 0x2cf   : > { %v14173_v12 = vpop.f32.mrb[59].mxu0  ;;  %v14193_v17 = vadd.f32 %v14192_v13, %v14191_v11  ;;  %v14194_v18 = vpop.f32.mrb[58].mxu1  ;;  %14473 = vmatprep.subr.bf16.mxu0 %v15797_v15  ;;  %14494 = vmatpush3.bf16.msra.mxu1 %v15796_v14  ;;  %v15831_v10 = vld [vmem:[%s16271_s12 + $0x1630] sm:$0xff]   ;;  %v15834_v15 = vld [vmem:[%s16271_s12 + $0x1678] sm:$0xff]  }
 0x2d0   : > { %v10724_v16 = vadd.f32 %v14171_v9, %v17041_v30  ;;  %v14195_v20 = vpop.f32.mrb[59].mxu1  ;;  %14495 = vmatprep.subr.bf16.mxu1 %v15799_v21  ;;  %v720_v30 = vcombine.high %v318_v27, %v318_v27  ;;  %v15832_v12 = vld [vmem:[%s16271_s12 + $0x16f0] sm:$0xff]   ;;  %v15841_v27 = vld [vmem:[%s16271_s12 + $0x17c0] sm:$0xff]  }
 0x2d1   : > { %v15833_v14 = vld [vmem:[%s16271_s12 + $0x16b0] sm:$0xff]   ;;  %v15837_v20 = vld [vmem:[%s16271_s12 + $0x16b8] sm:$0xff]  }
 0x2d2   : > { %v17080_v22 = vadd.f32 %v14193_v17, %v10724_v16  ;;  %14474 = vmatpush3.bf16.msra.mxu0 %v15798_v19  ;;  %v734_v33 = vrot.slane %v720_v30, %v16309_v42  ;;  %v15835_v16 = vld [vmem:[%s16271_s12 + $0x1638] sm:$0xff]   ;;  %v319_v18 = vld [vmem:[%s16266_s8 + $0xb0] sm:$0xff]  ;;  %v15842_v30 = vld [vmem:[%s16271_s12 + $0x1780] sm:$0xff]  }
 0x2d3   : > { %14475 = vmatprep.subr.bf16.mxu0 %v15801_v24  ;;  %14496 = vmatpush3.bf16.msra.mxu1 %v15800_v23  ;;  %v15836_v17 = vld [vmem:[%s16271_s12 + $0x16f8] sm:$0xff]   ;;  %v744_v19 = vrot.slane %v319_v18, %v16309_v42  ;;  %v737_v21 = vcombine.high %v319_v18, %v319_v18  ;;  %v15874_v18 = vld [vmem:[%s16271_s12 + $0x18c0] sm:$0xff]  }
 0x2d4   : > { %14497 = vmatprep.subr.bf16.mxu1 %v15803_v26  ;;  %v736_v38 = vcombine.high %v734_v33, %v734_v33  ;;  %v1140_v40 = vpack.c.bf16 %v734_v33, %v734_v33 }
 0x2d5   : > { %v752_v23 = vcombine.high %v744_v19, %v744_v19  ;;  %v751_v24 = vrot.slane %v737_v21, %v16309_v42  ;;  %v1142_v26 = vpack.c.bf16 %v744_v19, %v744_v19  ;;  %v15875_v21 = vld [vmem:[%s16271_s12 + $0x1880] sm:$0xff]  }
 0x2d6   : > { %14476 = vmatpush3.bf16.msra.mxu0 %v15802_v25  ;;  %v1141_v43 = vpack.c.bf16 %v736_v38, %v736_v38  ;;  %v15840_v25 = vld [vmem:[%s16271_s12 + $0x1700] sm:$0xff]   ;;  %v15848_v38 = vld [vmem:[%s16271_s12 + $0x1710] sm:$0xff]  }
 0x2d7   : > { %14505 = vmatprep.subr.bf16.mxu0 %v15805_v31  ;;  %14498 = vmatpush3.bf16.msra.mxu1 %v15804_v29  ;;  %v1143_v28 = vpack.c.bf16 %v752_v23, %v752_v23  ;;  %v753_v29 = vcombine.high %v751_v24, %v751_v24  ;;  %v1144_v31 = vpack.c.bf16 %v751_v24, %v751_v24  ;;  %v15876_v23 = vld [vmem:[%s16271_s12 + $0x1848] sm:$0xff]  }
 0x2d8   : > { %14527 = vmatprep.subr.bf16.mxu1 %v15808_v36  ;;  %11321 = vmatprep.mubr.bf16.mxu1 %v1141_v43  ;;  %v15846_v36 = vld [vmem:[%s16271_s12 + $0x1788] sm:$0xff]   ;;  %v15852_v43 = vld [vmem:[%s16271_s12 + $0x1718] sm:$0xff]  }
 0x2d9   : > { %11282 = vmatmul.mubr.bf16.vlgmr.msra.gmra.mrb[84].mxu0 %v1138_v35  ;;  %v1145_v33 = vpack.c.bf16 %v753_v29, %v753_v29  ;;  %v15845_v35 = vld [vmem:[%s16271_s12 + $0x17c8] sm:$0xff]   ;;  %v15881_v29 = vld [vmem:[%s16271_s12 + $0x1810] sm:$0xff]  }
 0x2da   : > { %14506 = vmatpush3.bf16.msra.mxu0 %v15807_v34  ;;  %11322 = vmatmul.mubr.bf16.vlgmr.msra.gmra.mrb[84].mxu1 %v1140_v40  ;;  %v15844_v34 = vld [vmem:[%s16271_s12 + $0x1708] sm:$0xff]   ;;  %v15850_v40 = vld [vmem:[%s16271_s12 + $0x1790] sm:$0xff]  }
 0x2db   : > { %14507 = vmatprep.subr.bf16.mxu0 %v15810_v41  ;;  %14528 = vmatpush3.bf16.msra.mxu1 %v15809_v39  ;;  %v15849_v39 = vld [vmem:[%s16271_s12 + $0x17d0] sm:$0xff]   ;;  %v15851_v41 = vld [vmem:[%s16271_s12 + $0x1758] sm:$0xff]  }
 0x2dc   : > { %14529 = vmatprep.subr.bf16.mxu1 %v15812_v45  ;;  %11361 = vmatprep.mubr.bf16.mxu0 %v1143_v28  ;;  %v15854_v45 = vld [vmem:[%s16271_s12 + $0x1798] sm:$0xff]   ;;  %v15880_v28 = vld [vmem:[%s16271_s12 + $0x1850] sm:$0xff]  }
 0x2dd   : > { %11401 = vmatprep.mubr.bf16.mxu1 %v1145_v33  ;;  %v15885_v33 = vld [vmem:[%s16271_s12 + $0x1818] sm:$0xff]  }
 0x2de   : > { %14508 = vmatpush3.bf16.msra.mxu0 %v15811_v44  ;;  %v15853_v44 = vld [vmem:[%s16271_s12 + $0x17d8] sm:$0xff]  }
 0x2df   : > { %14509 = vmatprep.subr.bf16.mxu0 %v15814_v47  ;;  %14530 = vmatpush3.bf16.msra.mxu1 %v15813_v46  ;;  %v15855_v46 = vld [vmem:[%s16271_s12 + $0x1760] sm:$0xff]  }
 0x2e0   : > { %14531 = vmatprep.subr.bf16.mxu1 %v15816_v49  ;;  %v15856_v47 = vld [vmem:[%s16271_s12 + $0x1720] sm:$0xff]  }
 0x2e1   : > { %v15858_v49 = vld [vmem:[%s16271_s12 + $0x17a0] sm:$0xff]  }
 0x2e2   : > { %14510 = vmatpush3.bf16.msra.mxu0 %v15815_v48  ;;  %v15857_v48 = vld [vmem:[%s16271_s12 + $0x17e0] sm:$0xff]  }
 0x2e3   : > { %14511 = vmatprep.subr.bf16.mxu0 %v15818_v51  ;;  %14532 = vmatpush3.bf16.msra.mxu1 %v15817_v50  ;;  %v15859_v50 = vld [vmem:[%s16271_s12 + $0x1768] sm:$0xff]  }
 0x2e4   : > { %14533 = vmatprep.subr.bf16.mxu1 %v15820_v53 }
 0x2e6   : > { %14512 = vmatpush3.bf16.msra.mxu0 %v15819_v52  ;;  %v15860_v52 = vld [vmem:[%s16271_s12 + $0x1728] sm:$0xff]  }
 0x2e7   : > { %14513 = vmatprep.subr.bf16.mxu0 %v15822_v55  ;;  %14534 = vmatpush3.bf16.msra.mxu1 %v15821_v54  ;;  %v15861_v54 = vld [vmem:[%s16271_s12 + $0x17e8] sm:$0xff]  }
 0x2e8   : > { %14535 = vmatprep.subr.bf16.mxu1 %v15824_v57 }
 0x2ea   : > { %14514 = vmatpush3.bf16.msra.mxu0 %v15823_v56 }
 0x2eb   : > { %14515 = vmatprep.subr.bf16.mxu0 %v15826_v59  ;;  %14536 = vmatpush3.bf16.msra.mxu1 %v15825_v58  ;;  %v15862_v58 = vld [vmem:[%s16271_s12 + $0x17a8] sm:$0xff]   ;;  %v15863_v59 = vld [vmem:[%s16271_s12 + $0x1770] sm:$0xff]  }
 0x2ec   : > { %v14213_v60 = vpop.f32.mrb[60].mxu0  ;;  %14537 = vmatprep.subr.bf16.mxu1 %v15828_v63 }
 0x2ed   : > { %v14214_v62 = vpop.f32.mrb[61].mxu0  ;;  %v14235_v2 = vpop.f32.mrb[60].mxu1 }
 0x2ee   : > { %v14215_v0 = vadd.f32 %v14214_v62, %v14213_v60  ;;  %v14216_v1 = vpop.f32.mrb[62].mxu0  ;;  %v14236_v6 = vpop.f32.mrb[61].mxu1  ;;  %14516 = vmatpush3.bf16.msra.mxu0 %v15827_v61 }
 0x2ef   : > { %v14217_v5 = vpop.f32.mrb[63].mxu0  ;;  %v14237_v8 = vadd.f32 %v14236_v6, %v14235_v2  ;;  %v14238_v9 = vpop.f32.mrb[62].mxu1  ;;  %14517 = vmatprep.subr.bf16.mxu0 %v15830_v4  ;;  %14538 = vmatpush3.bf16.msra.mxu1 %v15829_v3  ;;  %v15864_v1 = vld [vmem:[%s16271_s12 + $0x1730] sm:$0xff]   ;;  %v15867_v6 = vld [vmem:[%s16271_s12 + $0x1778] sm:$0xff]  }
 0x2f0   : > { %v10804_v7 = vadd.f32 %v14215_v0, %v17080_v22  ;;  %v14239_v11 = vpop.f32.mrb[63].mxu1  ;;  %14539 = vmatprep.subr.bf16.mxu1 %v15832_v12  ;;  %v15838_v22 = vld [vmem:[%s16271_s12 + $0x1740] sm:$0xff]   ;;  %v15865_v3 = vld [vmem:[%s16271_s12 + $0x17f0] sm:$0xff]   ;;  %v320_v9 = vld [vmem:[%s16266_s8 + $0xb8] sm:$0xff] }
 0x2f1   : > { %v15866_v5 = vld [vmem:[%s16271_s12 + $0x17b0] sm:$0xff]   ;;  %v15870_v11 = vld [vmem:[%s16271_s12 + $0x17b8] sm:$0xff]   ;;  %v754_v12 = vcombine.high %v320_v9, %v320_v9 }
 0x2f2   : > { %v17118_v13 = vadd.f32 %v14237_v8, %v10804_v7  ;;  %14518 = vmatpush3.bf16.msra.mxu0 %v15831_v10  ;;  %v15868_v7 = vld [vmem:[%s16271_s12 + $0x1738] sm:$0xff]   ;;  %v761_v10 = vrot.slane %v320_v9, %v16309_v42  ;;  %v15907_v9 = vld [vmem:[%s16271_s12 + $0x19c0] sm:$0xff]  }
 0x2f3   : > { %14519 = vmatprep.subr.bf16.mxu0 %v15834_v15  ;;  %14540 = vmatpush3.bf16.msra.mxu1 %v15833_v14  ;;  %v15869_v8 = vld [vmem:[%s16271_s12 + $0x17f8] sm:$0xff]   ;;  %v768_v15 = vrot.slane %v754_v12, %v16309_v42  ;;  %v15908_v12 = vld [vmem:[%s16271_s12 + $0x1980] sm:$0xff]  }
 0x2f4   : > { %14541 = vmatprep.subr.bf16.mxu1 %v15836_v17  ;;  %v769_v14 = vcombine.high %v761_v10, %v761_v10  ;;  %v1146_v17 = vpack.c.bf16 %v761_v10, %v761_v10 }
 0x2f6   : > { %14520 = vmatpush3.bf16.msra.mxu0 %v15835_v16  ;;  %v15873_v16 = vld [vmem:[%s16271_s12 + $0x1800] sm:$0xff]   ;;  %v1147_v19 = vpack.c.bf16 %v769_v14, %v769_v14  ;;  %v15909_v14 = vld [vmem:[%s16271_s12 + $0x1948] sm:$0xff]  }
 0x2f7   : > { %14549 = vmatprep.subr.bf16.mxu0 %v15838_v22  ;;  %14542 = vmatpush3.bf16.msra.mxu1 %v15837_v20  ;;  %v770_v20 = vcombine.high %v768_v15, %v768_v15  ;;  %v1148_v22 = vpack.c.bf16 %v768_v15, %v768_v15 }
 0x2f8   : > { %14571 = vmatprep.subr.bf16.mxu1 %v15841_v27  ;;  %v15879_v27 = vld [vmem:[%s16271_s12 + $0x1888] sm:$0xff]  }
 0x2f9   : > { %11362 = vmatmul.mubr.bf16.vlgmr.msra.gmra.mrb[88].mxu0 %v1142_v26  ;;  %v1149_v24 = vpack.c.bf16 %v770_v20, %v770_v20  ;;  %v15878_v26 = vld [vmem:[%s16271_s12 + $0x18c8] sm:$0xff]   ;;  %v15914_v20 = vld [vmem:[%s16271_s12 + $0x1910] sm:$0xff]  }
 0x2fa   : > { %14550 = vmatpush3.bf16.msra.mxu0 %v15840_v25  ;;  %11402 = vmatmul.mubr.bf16.vlgmr.msra.gmra.mrb[88].mxu1 %v1144_v31  ;;  %v15877_v25 = vld [vmem:[%s16271_s12 + $0x1808] sm:$0xff]   ;;  %v15883_v31 = vld [vmem:[%s16271_s12 + $0x1890] sm:$0xff]  }
 0x2fb   : > { %14551 = vmatprep.subr.bf16.mxu0 %v15843_v32  ;;  %14572 = vmatpush3.bf16.msra.mxu1 %v15842_v30  ;;  %v15882_v30 = vld [vmem:[%s16271_s12 + $0x18d0] sm:$0xff]   ;;  %v15884_v32 = vld [vmem:[%s16271_s12 + $0x1858] sm:$0xff]  }
 0x2fc   : > { %14573 = vmatprep.subr.bf16.mxu1 %v15845_v35  ;;  %11441 = vmatprep.mubr.bf16.mxu0 %v1147_v19  ;;  %v15887_v35 = vld [vmem:[%s16271_s12 + $0x1898] sm:$0xff]   ;;  %v15913_v19 = vld [vmem:[%s16271_s12 + $0x1950] sm:$0xff]  }
 0x2fd   : > { %11481 = vmatprep.mubr.bf16.mxu1 %v1149_v24  ;;  %v15918_v24 = vld [vmem:[%s16271_s12 + $0x1918] sm:$0xff]  }
 0x2fe   : > { %14552 = vmatpush3.bf16.msra.mxu0 %v15844_v34  ;;  %v15886_v34 = vld [vmem:[%s16271_s12 + $0x18d8] sm:$0xff]  }
 0x2ff   : > { %14553 = vmatprep.subr.bf16.mxu0 %v15847_v37  ;;  %14574 = vmatpush3.bf16.msra.mxu1 %v15846_v36  ;;  %v15888_v36 = vld [vmem:[%s16271_s12 + $0x1860] sm:$0xff]  }
 0x300   : > { %14575 = vmatprep.subr.bf16.mxu1 %v15849_v39  ;;  %v15889_v37 = vld [vmem:[%s16271_s12 + $0x1820] sm:$0xff]  }
 0x301   : > { %v15891_v39 = vld [vmem:[%s16271_s12 + $0x18a0] sm:$0xff]  }
 0x302   : > { %14554 = vmatpush3.bf16.msra.mxu0 %v15848_v38  ;;  %v15890_v38 = vld [vmem:[%s16271_s12 + $0x18e0] sm:$0xff]  }
 0x303   : > { %14555 = vmatprep.subr.bf16.mxu0 %v15851_v41  ;;  %14576 = vmatpush3.bf16.msra.mxu1 %v15850_v40  ;;  %v15892_v40 = vld [vmem:[%s16271_s12 + $0x1868] sm:$0xff]  }
 0x304   : > { %14577 = vmatprep.subr.bf16.mxu1 %v15853_v44 }
 0x306   : > { %14556 = vmatpush3.bf16.msra.mxu0 %v15852_v43  ;;  %v15893_v43 = vld [vmem:[%s16271_s12 + $0x1828] sm:$0xff]  }
 0x307   : > { %14557 = vmatprep.subr.bf16.mxu0 %v15855_v46  ;;  %14578 = vmatpush3.bf16.msra.mxu1 %v15854_v45  ;;  %v15894_v45 = vld [vmem:[%s16271_s12 + $0x18e8] sm:$0xff]  }
 0x308   : > { %14579 = vmatprep.subr.bf16.mxu1 %v15857_v48 }
 0x30a   : > { %14558 = vmatpush3.bf16.msra.mxu0 %v15856_v47 }
 0x30b   : > { %14559 = vmatprep.subr.bf16.mxu0 %v15859_v50  ;;  %14580 = vmatpush3.bf16.msra.mxu1 %v15858_v49 }
 0x30c   : > { %v14257_v51 = vpop.f32.mrb[64].mxu0  ;;  %14581 = vmatprep.subr.bf16.mxu1 %v15861_v54 }
 0x30d   : > { %v14258_v53 = vpop.f32.mrb[65].mxu0  ;;  %v14279_v57 = vpop.f32.mrb[64].mxu1 }
 0x30e   : > { %v14259_v55 = vadd.f32 %v14258_v53, %v14257_v51  ;;  %v14260_v56 = vpop.f32.mrb[66].mxu0  ;;  %v14280_v61 = vpop.f32.mrb[65].mxu1  ;;  %14560 = vmatpush3.bf16.msra.mxu0 %v15860_v52  ;;  %v15895_v51 = vld [vmem:[%s16271_s12 + $0x18a8] sm:$0xff]   ;;  %v15896_v52 = vld [vmem:[%s16271_s12 + $0x1870] sm:$0xff]  }
 0x30f   : > { %v14261_v60 = vpop.f32.mrb[67].mxu0  ;;  %v14281_v63 = vadd.f32 %v14280_v61, %v14279_v57  ;;  %v14282_v0 = vpop.f32.mrb[66].mxu1  ;;  %14561 = vmatprep.subr.bf16.mxu0 %v15863_v59  ;;  %14582 = vmatpush3.bf16.msra.mxu1 %v15862_v58  ;;  %v15897_v56 = vld [vmem:[%s16271_s12 + $0x1830] sm:$0xff]   ;;  %v15900_v61 = vld [vmem:[%s16271_s12 + $0x1878] sm:$0xff]  }
 0x310   : > { %v10884_v62 = vadd.f32 %v14259_v55, %v17118_v13  ;;  %v14283_v2 = vpop.f32.mrb[67].mxu1  ;;  %14583 = vmatprep.subr.bf16.mxu1 %v15865_v3  ;;  %v15871_v13 = vld [vmem:[%s16271_s12 + $0x1840] sm:$0xff]   ;;  %v15898_v58 = vld [vmem:[%s16271_s12 + $0x18f0] sm:$0xff]  }
 0x311   : > { %v15899_v60 = vld [vmem:[%s16271_s12 + $0x18b0] sm:$0xff]   ;;  %v321_v0 = vld [vmem:[%s16266_s8 + $0xc0] sm:$0xff]  ;;  %v15903_v2 = vld [vmem:[%s16271_s12 + $0x18b8] sm:$0xff]  }
 0x312   : > { %v17156_v4 = vadd.f32 %v14281_v63, %v10884_v62  ;;  %14562 = vmatpush3.bf16.msra.mxu0 %v15864_v1  ;;  %v15901_v62 = vld [vmem:[%s16271_s12 + $0x1838] sm:$0xff]   ;;  %v778_v1 = vrot.slane %v321_v0, %v16309_v42  ;;  %v771_v3 = vcombine.high %v321_v0, %v321_v0  ;;  %v15940_v0 = vld [vmem:[%s16271_s12 + $0x1ac0] sm:$0xff]  }
 0x313   : > { %14563 = vmatprep.subr.bf16.mxu0 %v15867_v6  ;;  %14584 = vmatpush3.bf16.msra.mxu1 %v15866_v5  ;;  %v15902_v63 = vld [vmem:[%s16271_s12 + $0x18f8] sm:$0xff]  }
 0x314   : > { %14585 = vmatprep.subr.bf16.mxu1 %v15869_v8  ;;  %v786_v5 = vcombine.high %v778_v1, %v778_v1  ;;  %v785_v6 = vrot.slane %v771_v3, %v16309_v42  ;;  %v1150_v8 = vpack.c.bf16 %v778_v1, %v778_v1  ;;  %v15941_v3 = vld [vmem:[%s16271_s12 + $0x1a80] sm:$0xff]  }
 0x316   : > { %14564 = vmatpush3.bf16.msra.mxu0 %v15868_v7  ;;  %v15906_v7 = vld [vmem:[%s16271_s12 + $0x1900] sm:$0xff]   ;;  %v1151_v10 = vpack.c.bf16 %v786_v5, %v786_v5  ;;  %v15942_v5 = vld [vmem:[%s16271_s12 + $0x1a48] sm:$0xff]  }
 0x317   : > { %14593 = vmatprep.subr.bf16.mxu0 %v15871_v13  ;;  %14586 = vmatpush3.bf16.msra.mxu1 %v15870_v11  ;;  %v787_v11 = vcombine.high %v785_v6, %v785_v6  ;;  %v1152_v13 = vpack.c.bf16 %v785_v6, %v785_v6 }
 0x318   : > { %14615 = vmatprep.subr.bf16.mxu1 %v15874_v18  ;;  %v15912_v18 = vld [vmem:[%s16271_s12 + $0x1988] sm:$0xff]  }
 0x319   : > { %11442 = vmatmul.mubr.bf16.vlgmr.msra.gmra.mrb[92].mxu0 %v1146_v17  ;;  %v1153_v15 = vpack.c.bf16 %v787_v11, %v787_v11  ;;  %v15911_v17 = vld [vmem:[%s16271_s12 + $0x19c8] sm:$0xff]   ;;  %v15947_v11 = vld [vmem:[%s16271_s12 + $0x1a10] sm:$0xff]  }
 0x31a   : > { %14594 = vmatpush3.bf16.msra.mxu0 %v15873_v16  ;;  %11482 = vmatmul.mubr.bf16.vlgmr.msra.gmra.mrb[92].mxu1 %v1148_v22  ;;  %v15910_v16 = vld [vmem:[%s16271_s12 + $0x1908] sm:$0xff]   ;;  %v15916_v22 = vld [vmem:[%s16271_s12 + $0x1990] sm:$0xff]  }
 0x31b   : > { %14595 = vmatprep.subr.bf16.mxu0 %v15876_v23  ;;  %14616 = vmatpush3.bf16.msra.mxu1 %v15875_v21  ;;  %v15915_v21 = vld [vmem:[%s16271_s12 + $0x19d0] sm:$0xff]   ;;  %v15917_v23 = vld [vmem:[%s16271_s12 + $0x1958] sm:$0xff]  }
 0x31c   : > { %14617 = vmatprep.subr.bf16.mxu1 %v15878_v26  ;;  %11521 = vmatprep.mubr.bf16.mxu0 %v1151_v10  ;;  %v15920_v26 = vld [vmem:[%s16271_s12 + $0x1998] sm:$0xff]   ;;  %v15946_v10 = vld [vmem:[%s16271_s12 + $0x1a50] sm:$0xff]  }
 0x31d   : > { %11561 = vmatprep.mubr.bf16.mxu1 %v1153_v15  ;;  %v15951_v15 = vld [vmem:[%s16271_s12 + $0x1a18] sm:$0xff]  }
 0x31e   : > { %14596 = vmatpush3.bf16.msra.mxu0 %v15877_v25  ;;  %v15919_v25 = vld [vmem:[%s16271_s12 + $0x19d8] sm:$0xff]  }
 0x31f   : > { %14597 = vmatprep.subr.bf16.mxu0 %v15880_v28  ;;  %14618 = vmatpush3.bf16.msra.mxu1 %v15879_v27  ;;  %v15921_v27 = vld [vmem:[%s16271_s12 + $0x1960] sm:$0xff]  }
 0x320   : > { %14619 = vmatprep.subr.bf16.mxu1 %v15882_v30  ;;  %v15922_v28 = vld [vmem:[%s16271_s12 + $0x1920] sm:$0xff]  }
 0x321   : > { %v15924_v30 = vld [vmem:[%s16271_s12 + $0x19a0] sm:$0xff]  }
 0x322   : > { %14598 = vmatpush3.bf16.msra.mxu0 %v15881_v29  ;;  %v15923_v29 = vld [vmem:[%s16271_s12 + $0x19e0] sm:$0xff]  }
 0x323   : > { %14599 = vmatprep.subr.bf16.mxu0 %v15884_v32  ;;  %14620 = vmatpush3.bf16.msra.mxu1 %v15883_v31  ;;  %v15925_v31 = vld [vmem:[%s16271_s12 + $0x1968] sm:$0xff]  }
 0x324   : > { %14621 = vmatprep.subr.bf16.mxu1 %v15886_v34 }
 0x326   : > { %14600 = vmatpush3.bf16.msra.mxu0 %v15885_v33  ;;  %v15926_v33 = vld [vmem:[%s16271_s12 + $0x1928] sm:$0xff]  }
 0x327   : > { %14601 = vmatprep.subr.bf16.mxu0 %v15888_v36  ;;  %14622 = vmatpush3.bf16.msra.mxu1 %v15887_v35  ;;  %v15927_v35 = vld [vmem:[%s16271_s12 + $0x19e8] sm:$0xff]  }
 0x328   : > { %14623 = vmatprep.subr.bf16.mxu1 %v15890_v38 }
 0x32a   : > { %14602 = vmatpush3.bf16.msra.mxu0 %v15889_v37 }
 0x32b   : > { %14603 = vmatprep.subr.bf16.mxu0 %v15892_v40  ;;  %14624 = vmatpush3.bf16.msra.mxu1 %v15891_v39  ;;  %v15928_v39 = vld [vmem:[%s16271_s12 + $0x19a8] sm:$0xff]   ;;  %v15929_v40 = vld [vmem:[%s16271_s12 + $0x1970] sm:$0xff]  }
 0x32c   : > { %v14301_v41 = vpop.f32.mrb[68].mxu0  ;;  %14625 = vmatprep.subr.bf16.mxu1 %v15894_v45 }
 0x32d   : > { %v14302_v44 = vpop.f32.mrb[69].mxu0  ;;  %v14323_v48 = vpop.f32.mrb[68].mxu1 }
 0x32e   : > { %v14303_v46 = vadd.f32 %v14302_v44, %v14301_v41  ;;  %v14304_v47 = vpop.f32.mrb[70].mxu0  ;;  %v14324_v50 = vpop.f32.mrb[69].mxu1  ;;  %14604 = vmatpush3.bf16.msra.mxu0 %v15893_v43 }
 0x32f   : > { %v14305_v49 = vpop.f32.mrb[71].mxu0  ;;  %v14325_v54 = vadd.f32 %v14324_v50, %v14323_v48  ;;  %v14326_v55 = vpop.f32.mrb[70].mxu1  ;;  %14605 = vmatprep.subr.bf16.mxu0 %v15896_v52  ;;  %14626 = vmatpush3.bf16.msra.mxu1 %v15895_v51  ;;  %v15930_v47 = vld [vmem:[%s16271_s12 + $0x1930] sm:$0xff]   ;;  %v15933_v52 = vld [vmem:[%s16271_s12 + $0x1978] sm:$0xff]  }
 0x330   : > { %v10964_v53 = vadd.f32 %v14303_v46, %v17156_v4  ;;  %v14327_v57 = vpop.f32.mrb[71].mxu1  ;;  %14627 = vmatprep.subr.bf16.mxu1 %v15898_v58  ;;  %v15904_v4 = vld [vmem:[%s16271_s12 + $0x1940] sm:$0xff]   ;;  %v15931_v49 = vld [vmem:[%s16271_s12 + $0x19f0] sm:$0xff]   ;;  %v322_v55 = vld [vmem:[%s16266_s8 + $0xc8] sm:$0xff] }
 0x331   : > { %v15932_v51 = vld [vmem:[%s16271_s12 + $0x19b0] sm:$0xff]   ;;  %v15936_v57 = vld [vmem:[%s16271_s12 + $0x19b8] sm:$0xff]   ;;  %v788_v58 = vcombine.high %v322_v55, %v322_v55 }
 0x332   : > { %v17194_v59 = vadd.f32 %v14325_v54, %v10964_v53  ;;  %14606 = vmatpush3.bf16.msra.mxu0 %v15897_v56  ;;  %v15934_v53 = vld [vmem:[%s16271_s12 + $0x1938] sm:$0xff]   ;;  %v795_v56 = vrot.slane %v322_v55, %v16309_v42  ;;  %v15973_v55 = vld [vmem:[%s16271_s12 + $0x1bc0] sm:$0xff]  }
 0x333   : > { %14607 = vmatprep.subr.bf16.mxu0 %v15900_v61  ;;  %14628 = vmatpush3.bf16.msra.mxu1 %v15899_v60  ;;  %v15935_v54 = vld [vmem:[%s16271_s12 + $0x19f8] sm:$0xff]   ;;  %v802_v61 = vrot.slane %v788_v58, %v16309_v42  ;;  %v15974_v58 = vld [vmem:[%s16271_s12 + $0x1b80] sm:$0xff]  }
 0x334   : > { %14629 = vmatprep.subr.bf16.mxu1 %v15902_v63  ;;  %v803_v60 = vcombine.high %v795_v56, %v795_v56  ;;  %v1154_v63 = vpack.c.bf16 %v795_v56, %v795_v56 }
 0x336   : > { %14608 = vmatpush3.bf16.msra.mxu0 %v15901_v62  ;;  %v15939_v62 = vld [vmem:[%s16271_s12 + $0x1a00] sm:$0xff]   ;;  %v1155_v1 = vpack.c.bf16 %v803_v60, %v803_v60  ;;  %v15975_v60 = vld [vmem:[%s16271_s12 + $0x1b48] sm:$0xff]  }
 0x337   : > { %14637 = vmatprep.subr.bf16.mxu0 %v15904_v4  ;;  %14630 = vmatpush3.bf16.msra.mxu1 %v15903_v2  ;;  %v804_v2 = vcombine.high %v802_v61, %v802_v61  ;;  %v1156_v4 = vpack.c.bf16 %v802_v61, %v802_v61 }
 0x338   : > { %14659 = vmatprep.subr.bf16.mxu1 %v15907_v9  ;;  %v15945_v9 = vld [vmem:[%s16271_s12 + $0x1a88] sm:$0xff]  }
 0x339   : > { %11522 = vmatmul.mubr.bf16.vlgmr.msra.gmra.mrb[96].mxu0 %v1150_v8  ;;  %v1157_v6 = vpack.c.bf16 %v804_v2, %v804_v2  ;;  %v15944_v8 = vld [vmem:[%s16271_s12 + $0x1ac8] sm:$0xff]   ;;  %v15980_v2 = vld [vmem:[%s16271_s12 + $0x1b10] sm:$0xff]  }
 0x33a   : > { %14638 = vmatpush3.bf16.msra.mxu0 %v15906_v7  ;;  %11562 = vmatmul.mubr.bf16.vlgmr.msra.gmra.mrb[96].mxu1 %v1152_v13  ;;  %v15943_v7 = vld [vmem:[%s16271_s12 + $0x1a08] sm:$0xff]   ;;  %v15949_v13 = vld [vmem:[%s16271_s12 + $0x1a90] sm:$0xff]  }
 0x33b   : > { %14639 = vmatprep.subr.bf16.mxu0 %v15909_v14  ;;  %14660 = vmatpush3.bf16.msra.mxu1 %v15908_v12  ;;  %v15948_v12 = vld [vmem:[%s16271_s12 + $0x1ad0] sm:$0xff]   ;;  %v15950_v14 = vld [vmem:[%s16271_s12 + $0x1a58] sm:$0xff]  }
 0x33c   : > { %14661 = vmatprep.subr.bf16.mxu1 %v15911_v17  ;;  %11601 = vmatprep.mubr.bf16.mxu0 %v1155_v1  ;;  %v15953_v17 = vld [vmem:[%s16271_s12 + $0x1a98] sm:$0xff]   ;;  %v15979_v1 = vld [vmem:[%s16271_s12 + $0x1b50] sm:$0xff]  }
 0x33d   : > { %11641 = vmatprep.mubr.bf16.mxu1 %v1157_v6  ;;  %v15984_v6 = vld [vmem:[%s16271_s12 + $0x1b18] sm:$0xff]  }
 0x33e   : > { %14640 = vmatpush3.bf16.msra.mxu0 %v15910_v16  ;;  %v15952_v16 = vld [vmem:[%s16271_s12 + $0x1ad8] sm:$0xff]  }
 0x33f   : > { %14641 = vmatprep.subr.bf16.mxu0 %v15913_v19  ;;  %14662 = vmatpush3.bf16.msra.mxu1 %v15912_v18  ;;  %v15954_v18 = vld [vmem:[%s16271_s12 + $0x1a60] sm:$0xff]  }
 0x340   : > { %14663 = vmatprep.subr.bf16.mxu1 %v15915_v21  ;;  %v15955_v19 = vld [vmem:[%s16271_s12 + $0x1a20] sm:$0xff]  }
 0x341   : > { %v15957_v21 = vld [vmem:[%s16271_s12 + $0x1aa0] sm:$0xff]  }
 0x342   : > { %14642 = vmatpush3.bf16.msra.mxu0 %v15914_v20  ;;  %v15956_v20 = vld [vmem:[%s16271_s12 + $0x1ae0] sm:$0xff]  }
 0x343   : > { %14643 = vmatprep.subr.bf16.mxu0 %v15917_v23  ;;  %14664 = vmatpush3.bf16.msra.mxu1 %v15916_v22  ;;  %v15958_v22 = vld [vmem:[%s16271_s12 + $0x1a68] sm:$0xff]  }
 0x344   : > { %14665 = vmatprep.subr.bf16.mxu1 %v15919_v25 }
 0x346   : > { %14644 = vmatpush3.bf16.msra.mxu0 %v15918_v24  ;;  %v15959_v24 = vld [vmem:[%s16271_s12 + $0x1a28] sm:$0xff]  }
 0x347   : > { %14645 = vmatprep.subr.bf16.mxu0 %v15921_v27  ;;  %14666 = vmatpush3.bf16.msra.mxu1 %v15920_v26  ;;  %v15960_v26 = vld [vmem:[%s16271_s12 + $0x1ae8] sm:$0xff]  }
 0x348   : > { %14667 = vmatprep.subr.bf16.mxu1 %v15923_v29 }
 0x34a   : > { %14646 = vmatpush3.bf16.msra.mxu0 %v15922_v28 }
 0x34b   : > { %14647 = vmatprep.subr.bf16.mxu0 %v15925_v31  ;;  %14668 = vmatpush3.bf16.msra.mxu1 %v15924_v30  ;;  %v15961_v30 = vld [vmem:[%s16271_s12 + $0x1aa8] sm:$0xff]   ;;  %v15962_v31 = vld [vmem:[%s16271_s12 + $0x1a70] sm:$0xff]  }
 0x34c   : > { %v14345_v32 = vpop.f32.mrb[72].mxu0  ;;  %14669 = vmatprep.subr.bf16.mxu1 %v15927_v35 }
 0x34d   : > { %v14346_v34 = vpop.f32.mrb[73].mxu0  ;;  %v14367_v38 = vpop.f32.mrb[72].mxu1 }
 0x34e   : > { %v14347_v36 = vadd.f32 %v14346_v34, %v14345_v32  ;;  %v14348_v37 = vpop.f32.mrb[74].mxu0  ;;  %v14368_v43 = vpop.f32.mrb[73].mxu1  ;;  %14648 = vmatpush3.bf16.msra.mxu0 %v15926_v33 }
 0x34f   : > { %v14349_v41 = vpop.f32.mrb[75].mxu0  ;;  %v14369_v45 = vadd.f32 %v14368_v43, %v14367_v38  ;;  %v14370_v46 = vpop.f32.mrb[74].mxu1  ;;  %14649 = vmatprep.subr.bf16.mxu0 %v15929_v40  ;;  %14670 = vmatpush3.bf16.msra.mxu1 %v15928_v39  ;;  %v15963_v37 = vld [vmem:[%s16271_s12 + $0x1a30] sm:$0xff]   ;;  %v15966_v43 = vld [vmem:[%s16271_s12 + $0x1a78] sm:$0xff]  }
 0x350   : > { %v11044_v44 = vadd.f32 %v14347_v36, %v17194_v59  ;;  %v14371_v48 = vpop.f32.mrb[75].mxu1  ;;  %14671 = vmatprep.subr.bf16.mxu1 %v15931_v49  ;;  %v15937_v59 = vld [vmem:[%s16271_s12 + $0x1a40] sm:$0xff]   ;;  %v15964_v39 = vld [vmem:[%s16271_s12 + $0x1af0] sm:$0xff]  }
 0x351   : > { %v15965_v41 = vld [vmem:[%s16271_s12 + $0x1ab0] sm:$0xff]   ;;  %v15969_v48 = vld [vmem:[%s16271_s12 + $0x1ab8] sm:$0xff]  }
 0x352   : > { %v17232_v50 = vadd.f32 %v14369_v45, %v11044_v44  ;;  %14650 = vmatpush3.bf16.msra.mxu0 %v15930_v47  ;;  %v15967_v44 = vld [vmem:[%s16271_s12 + $0x1a38] sm:$0xff]   ;;  %v323_v46 = vld [vmem:[%s16266_s8 + $0xd0] sm:$0xff] }
 0x353   : > { %14651 = vmatprep.subr.bf16.mxu0 %v15933_v52  ;;  %14672 = vmatpush3.bf16.msra.mxu1 %v15932_v51  ;;  %v15968_v45 = vld [vmem:[%s16271_s12 + $0x1af8] sm:$0xff]   ;;  %v812_v47 = vrot.slane %v323_v46, %v16309_v42  ;;  %v805_v49 = vcombine.high %v323_v46, %v323_v46  ;;  %v16006_v46 = vld [vmem:[%s16271_s12 + $0x1cc0] sm:$0xff]  }
 0x354   : > { %14673 = vmatprep.subr.bf16.mxu1 %v15935_v54 }
 0x355   : > { %v820_v51 = vcombine.high %v812_v47, %v812_v47  ;;  %v819_v52 = vrot.slane %v805_v49, %v16309_v42  ;;  %v1158_v54 = vpack.c.bf16 %v812_v47, %v812_v47  ;;  %v16007_v49 = vld [vmem:[%s16271_s12 + $0x1c80] sm:$0xff]  }
 0x356   : > { %14652 = vmatpush3.bf16.msra.mxu0 %v15934_v53  ;;  %v15972_v53 = vld [vmem:[%s16271_s12 + $0x1b00] sm:$0xff]  }
 0x357   : > { %14681 = vmatprep.subr.bf16.mxu0 %v15937_v59  ;;  %14674 = vmatpush3.bf16.msra.mxu1 %v15936_v57  ;;  %v1159_v56 = vpack.c.bf16 %v820_v51, %v820_v51  ;;  %v821_v57 = vcombine.high %v819_v52, %v819_v52  ;;  %v1160_v59 = vpack.c.bf16 %v819_v52, %v819_v52  ;;  %v16008_v51 = vld [vmem:[%s16271_s12 + $0x1c48] sm:$0xff]  }
 0x358   : > { %14703 = vmatprep.subr.bf16.mxu1 %v15940_v0  ;;  %v15978_v0 = vld [vmem:[%s16271_s12 + $0x1b88] sm:$0xff]  }
 0x359   : > { %11602 = vmatmul.mubr.bf16.vlgmr.msra.gmra.mrb[100].mxu0 %v1154_v63  ;;  %v1161_v61 = vpack.c.bf16 %v821_v57, %v821_v57  ;;  %v15977_v63 = vld [vmem:[%s16271_s12 + $0x1bc8] sm:$0xff]   ;;  %v16013_v57 = vld [vmem:[%s16271_s12 + $0x1c10] sm:$0xff]  }
 0x35a   : > { %14682 = vmatpush3.bf16.msra.mxu0 %v15939_v62  ;;  %11642 = vmatmul.mubr.bf16.vlgmr.msra.gmra.mrb[100].mxu1 %v1156_v4  ;;  %v15976_v62 = vld [vmem:[%s16271_s12 + $0x1b08] sm:$0xff]   ;;  %v15982_v4 = vld [vmem:[%s16271_s12 + $0x1b90] sm:$0xff]  }
 0x35b   : > { %14683 = vmatprep.subr.bf16.mxu0 %v15942_v5  ;;  %14704 = vmatpush3.bf16.msra.mxu1 %v15941_v3  ;;  %v15981_v3 = vld [vmem:[%s16271_s12 + $0x1bd0] sm:$0xff]   ;;  %v15983_v5 = vld [vmem:[%s16271_s12 + $0x1b58] sm:$0xff]  }
 0x35c   : > { %14705 = vmatprep.subr.bf16.mxu1 %v15944_v8  ;;  %11681 = vmatprep.mubr.bf16.mxu0 %v1159_v56  ;;  %v15986_v8 = vld [vmem:[%s16271_s12 + $0x1b98] sm:$0xff]   ;;  %v16012_v56 = vld [vmem:[%s16271_s12 + $0x1c50] sm:$0xff]  }
 0x35d   : > { %11721 = vmatprep.mubr.bf16.mxu1 %v1161_v61  ;;  %v16017_v61 = vld [vmem:[%s16271_s12 + $0x1c18] sm:$0xff]  }
 0x35e   : > { %14684 = vmatpush3.bf16.msra.mxu0 %v15943_v7  ;;  %v15985_v7 = vld [vmem:[%s16271_s12 + $0x1bd8] sm:$0xff]  }
 0x35f   : > { %14685 = vmatprep.subr.bf16.mxu0 %v15946_v10  ;;  %14706 = vmatpush3.bf16.msra.mxu1 %v15945_v9  ;;  %v15987_v9 = vld [vmem:[%s16271_s12 + $0x1b60] sm:$0xff]  }
 0x360   : > { %14707 = vmatprep.subr.bf16.mxu1 %v15948_v12  ;;  %v15988_v10 = vld [vmem:[%s16271_s12 + $0x1b20] sm:$0xff]  }
 0x361   : > { %v15990_v12 = vld [vmem:[%s16271_s12 + $0x1ba0] sm:$0xff]  }
 0x362   : > { %14686 = vmatpush3.bf16.msra.mxu0 %v15947_v11  ;;  %v15989_v11 = vld [vmem:[%s16271_s12 + $0x1be0] sm:$0xff]  }
 0x363   : > { %14687 = vmatprep.subr.bf16.mxu0 %v15950_v14  ;;  %14708 = vmatpush3.bf16.msra.mxu1 %v15949_v13  ;;  %v15991_v13 = vld [vmem:[%s16271_s12 + $0x1b68] sm:$0xff]  }
 0x364   : > { %14709 = vmatprep.subr.bf16.mxu1 %v15952_v16 }
 0x366   : > { %14688 = vmatpush3.bf16.msra.mxu0 %v15951_v15  ;;  %v15992_v15 = vld [vmem:[%s16271_s12 + $0x1b28] sm:$0xff]  }
 0x367   : > { %14689 = vmatprep.subr.bf16.mxu0 %v15954_v18  ;;  %14710 = vmatpush3.bf16.msra.mxu1 %v15953_v17  ;;  %v15993_v17 = vld [vmem:[%s16271_s12 + $0x1be8] sm:$0xff]  }
 0x368   : > { %14711 = vmatprep.subr.bf16.mxu1 %v15956_v20 }
 0x36a   : > { %14690 = vmatpush3.bf16.msra.mxu0 %v15955_v19 }
 0x36b   : > { %14691 = vmatprep.subr.bf16.mxu0 %v15958_v22  ;;  %14712 = vmatpush3.bf16.msra.mxu1 %v15957_v21 }
 0x36c   : > { %v14389_v23 = vpop.f32.mrb[76].mxu0  ;;  %14713 = vmatprep.subr.bf16.mxu1 %v15960_v26 }
 0x36d   : > { %v14390_v25 = vpop.f32.mrb[77].mxu0  ;;  %v14411_v29 = vpop.f32.mrb[76].mxu1 }
 0x36e   : > { %v14391_v27 = vadd.f32 %v14390_v25, %v14389_v23  ;;  %v14392_v28 = vpop.f32.mrb[78].mxu0  ;;  %v14412_v33 = vpop.f32.mrb[77].mxu1  ;;  %14692 = vmatpush3.bf16.msra.mxu0 %v15959_v24  ;;  %v15994_v23 = vld [vmem:[%s16271_s12 + $0x1ba8] sm:$0xff]   ;;  %v15995_v24 = vld [vmem:[%s16271_s12 + $0x1b70] sm:$0xff]  }
 0x36f   : > { %v14393_v32 = vpop.f32.mrb[79].mxu0  ;;  %v14413_v35 = vadd.f32 %v14412_v33, %v14411_v29  ;;  %v14414_v36 = vpop.f32.mrb[78].mxu1  ;;  %14693 = vmatprep.subr.bf16.mxu0 %v15962_v31  ;;  %14714 = vmatpush3.bf16.msra.mxu1 %v15961_v30  ;;  %v15996_v28 = vld [vmem:[%s16271_s12 + $0x1b30] sm:$0xff]   ;;  %v15999_v33 = vld [vmem:[%s16271_s12 + $0x1b78] sm:$0xff]  }
 0x370   : > { %v11124_v34 = vadd.f32 %v14391_v27, %v17232_v50  ;;  %v14415_v38 = vpop.f32.mrb[79].mxu1  ;;  %14715 = vmatprep.subr.bf16.mxu1 %v15964_v39  ;;  %v15970_v50 = vld [vmem:[%s16271_s12 + $0x1b40] sm:$0xff]   ;;  %v15997_v30 = vld [vmem:[%s16271_s12 + $0x1bf0] sm:$0xff]   ;;  %v324_v36 = vld [vmem:[%s16266_s8 + $0xd8] sm:$0xff] }
 0x371   : > { %v15998_v32 = vld [vmem:[%s16271_s12 + $0x1bb0] sm:$0xff]   ;;  %v16002_v38 = vld [vmem:[%s16271_s12 + $0x1bb8] sm:$0xff]   ;;  %v822_v39 = vcombine.high %v324_v36, %v324_v36 }
 0x372   : > { %v17270_v40 = vadd.f32 %v14413_v35, %v11124_v34  ;;  %14694 = vmatpush3.bf16.msra.mxu0 %v15963_v37  ;;  %v16000_v34 = vld [vmem:[%s16271_s12 + $0x1b38] sm:$0xff]   ;;  %v829_v37 = vrot.slane %v324_v36, %v16309_v42  ;;  %v16039_v36 = vld [vmem:[%s16271_s12 + $0x1dc0] sm:$0xff]  }
 0x373   : > { %14695 = vmatprep.subr.bf16.mxu0 %v15966_v43  ;;  %14716 = vmatpush3.bf16.msra.mxu1 %v15965_v41  ;;  %v16001_v35 = vld [vmem:[%s16271_s12 + $0x1bf8] sm:$0xff]   ;;  %v836_v43 = vrot.slane %v822_v39, %v16309_v42  ;;  %v16040_v39 = vld [vmem:[%s16271_s12 + $0x1d80] sm:$0xff]  }
 0x374   : > { %14717 = vmatprep.subr.bf16.mxu1 %v15968_v45  ;;  %v837_v41 = vcombine.high %v829_v37, %v829_v37  ;;  %v1162_v45 = vpack.c.bf16 %v829_v37, %v829_v37 }
 0x376   : > { %14696 = vmatpush3.bf16.msra.mxu0 %v15967_v44  ;;  %v16005_v44 = vld [vmem:[%s16271_s12 + $0x1c00] sm:$0xff]   ;;  %v1163_v47 = vpack.c.bf16 %v837_v41, %v837_v41  ;;  %v16041_v41 = vld [vmem:[%s16271_s12 + $0x1d48] sm:$0xff]  }
 0x377   : > { %14725 = vmatprep.subr.bf16.mxu0 %v15970_v50  ;;  %14718 = vmatpush3.bf16.msra.mxu1 %v15969_v48  ;;  %v838_v48 = vcombine.high %v836_v43, %v836_v43  ;;  %v1164_v50 = vpack.c.bf16 %v836_v43, %v836_v43 }
 0x378   : > { %14747 = vmatprep.subr.bf16.mxu1 %v15973_v55  ;;  %v16011_v55 = vld [vmem:[%s16271_s12 + $0x1c88] sm:$0xff]  }
 0x379   : > { %11682 = vmatmul.mubr.bf16.vlgmr.msra.gmra.mrb[104].mxu0 %v1158_v54  ;;  %v1165_v52 = vpack.c.bf16 %v838_v48, %v838_v48  ;;  %v16010_v54 = vld [vmem:[%s16271_s12 + $0x1cc8] sm:$0xff]   ;;  %v16046_v48 = vld [vmem:[%s16271_s12 + $0x1d10] sm:$0xff]  }
 0x37a   : > { %14726 = vmatpush3.bf16.msra.mxu0 %v15972_v53  ;;  %11722 = vmatmul.mubr.bf16.vlgmr.msra.gmra.mrb[104].mxu1 %v1160_v59  ;;  %v16009_v53 = vld [vmem:[%s16271_s12 + $0x1c08] sm:$0xff]   ;;  %v16015_v59 = vld [vmem:[%s16271_s12 + $0x1c90] sm:$0xff]  }
 0x37b   : > { %14727 = vmatprep.subr.bf16.mxu0 %v15975_v60  ;;  %14748 = vmatpush3.bf16.msra.mxu1 %v15974_v58  ;;  %v16014_v58 = vld [vmem:[%s16271_s12 + $0x1cd0] sm:$0xff]   ;;  %v16016_v60 = vld [vmem:[%s16271_s12 + $0x1c58] sm:$0xff]  }
 0x37c   : > { %14749 = vmatprep.subr.bf16.mxu1 %v15977_v63  ;;  %11761 = vmatprep.mubr.bf16.mxu0 %v1163_v47  ;;  %v16019_v63 = vld [vmem:[%s16271_s12 + $0x1c98] sm:$0xff]   ;;  %v16045_v47 = vld [vmem:[%s16271_s12 + $0x1d50] sm:$0xff]  }
 0x37d   : > { %11801 = vmatprep.mubr.bf16.mxu1 %v1165_v52  ;;  %v16050_v52 = vld [vmem:[%s16271_s12 + $0x1d18] sm:$0xff]  }
 0x37e   : > { %14728 = vmatpush3.bf16.msra.mxu0 %v15976_v62  ;;  %v16018_v62 = vld [vmem:[%s16271_s12 + $0x1cd8] sm:$0xff]  }
 0x37f   : > { %14729 = vmatprep.subr.bf16.mxu0 %v15979_v1  ;;  %14750 = vmatpush3.bf16.msra.mxu1 %v15978_v0  ;;  %v16020_v0 = vld [vmem:[%s16271_s12 + $0x1c60] sm:$0xff]  }
 0x380   : > { %14751 = vmatprep.subr.bf16.mxu1 %v15981_v3  ;;  %v16021_v1 = vld [vmem:[%s16271_s12 + $0x1c20] sm:$0xff]  }
 0x381   : > { %v16023_v3 = vld [vmem:[%s16271_s12 + $0x1ca0] sm:$0xff]  }
 0x382   : > { %14730 = vmatpush3.bf16.msra.mxu0 %v15980_v2  ;;  %v16022_v2 = vld [vmem:[%s16271_s12 + $0x1ce0] sm:$0xff]  }
 0x383   : > { %14731 = vmatprep.subr.bf16.mxu0 %v15983_v5  ;;  %14752 = vmatpush3.bf16.msra.mxu1 %v15982_v4  ;;  %v16024_v4 = vld [vmem:[%s16271_s12 + $0x1c68] sm:$0xff]  }
 0x384   : > { %14753 = vmatprep.subr.bf16.mxu1 %v15985_v7 }
 0x386   : > { %14732 = vmatpush3.bf16.msra.mxu0 %v15984_v6  ;;  %v16025_v6 = vld [vmem:[%s16271_s12 + $0x1c28] sm:$0xff]  }
 0x387   : > { %14733 = vmatprep.subr.bf16.mxu0 %v15987_v9  ;;  %14754 = vmatpush3.bf16.msra.mxu1 %v15986_v8  ;;  %v16026_v8 = vld [vmem:[%s16271_s12 + $0x1ce8] sm:$0xff]  }
 0x388   : > { %14755 = vmatprep.subr.bf16.mxu1 %v15989_v11 }
 0x38a   : > { %14734 = vmatpush3.bf16.msra.mxu0 %v15988_v10 }
 0x38b   : > { %14735 = vmatprep.subr.bf16.mxu0 %v15991_v13  ;;  %14756 = vmatpush3.bf16.msra.mxu1 %v15990_v12  ;;  %v16027_v12 = vld [vmem:[%s16271_s12 + $0x1ca8] sm:$0xff]   ;;  %v16028_v13 = vld [vmem:[%s16271_s12 + $0x1c70] sm:$0xff]  }
 0x38c   : > { %v14433_v14 = vpop.f32.mrb[80].mxu0  ;;  %14757 = vmatprep.subr.bf16.mxu1 %v15993_v17 }
 0x38d   : > { %v14434_v16 = vpop.f32.mrb[81].mxu0  ;;  %v14455_v20 = vpop.f32.mrb[80].mxu1 }
 0x38e   : > { %v14435_v18 = vadd.f32 %v14434_v16, %v14433_v14  ;;  %v14436_v19 = vpop.f32.mrb[82].mxu0  ;;  %v14456_v22 = vpop.f32.mrb[81].mxu1  ;;  %14736 = vmatpush3.bf16.msra.mxu0 %v15992_v15 }
 0x38f   : > { %v14437_v21 = vpop.f32.mrb[83].mxu0  ;;  %v14457_v26 = vadd.f32 %v14456_v22, %v14455_v20  ;;  %v14458_v27 = vpop.f32.mrb[82].mxu1  ;;  %14737 = vmatprep.subr.bf16.mxu0 %v15995_v24  ;;  %14758 = vmatpush3.bf16.msra.mxu1 %v15994_v23  ;;  %v16029_v19 = vld [vmem:[%s16271_s12 + $0x1c30] sm:$0xff]   ;;  %v16032_v24 = vld [vmem:[%s16271_s12 + $0x1c78] sm:$0xff]  }
 0x390   : > { %v11204_v25 = vadd.f32 %v14435_v18, %v17270_v40  ;;  %v14459_v29 = vpop.f32.mrb[83].mxu1  ;;  %14759 = vmatprep.subr.bf16.mxu1 %v15997_v30  ;;  %v16003_v40 = vld [vmem:[%s16271_s12 + $0x1c40] sm:$0xff]   ;;  %v16030_v21 = vld [vmem:[%s16271_s12 + $0x1cf0] sm:$0xff]  }
 0x391   : > { %v16031_v23 = vld [vmem:[%s16271_s12 + $0x1cb0] sm:$0xff]   ;;  %v325_v27 = vld [vmem:[%s16266_s8 + $0xe0] sm:$0xff]  ;;  %v16035_v29 = vld [vmem:[%s16271_s12 + $0x1cb8] sm:$0xff]  }
 0x392   : > { %v17308_v31 = vadd.f32 %v14457_v26, %v11204_v25  ;;  %14738 = vmatpush3.bf16.msra.mxu0 %v15996_v28  ;;  %v16033_v25 = vld [vmem:[%s16271_s12 + $0x1c38] sm:$0xff]   ;;  %v846_v28 = vrot.slane %v325_v27, %v16309_v42  ;;  %v839_v30 = vcombine.high %v325_v27, %v325_v27  ;;  %v16072_v27 = vld [vmem:[%s16271_s12 + $0x1ec0] sm:$0xff]  }
 0x393   : > { %14739 = vmatprep.subr.bf16.mxu0 %v15999_v33  ;;  %14760 = vmatpush3.bf16.msra.mxu1 %v15998_v32  ;;  %v16034_v26 = vld [vmem:[%s16271_s12 + $0x1cf8] sm:$0xff]  }
 0x394   : > { %14761 = vmatprep.subr.bf16.mxu1 %v16001_v35  ;;  %v854_v32 = vcombine.high %v846_v28, %v846_v28  ;;  %v853_v33 = vrot.slane %v839_v30, %v16309_v42  ;;  %v1166_v35 = vpack.c.bf16 %v846_v28, %v846_v28  ;;  %v16073_v30 = vld [vmem:[%s16271_s12 + $0x1e80] sm:$0xff]  }
 0x396   : > { %14740 = vmatpush3.bf16.msra.mxu0 %v16000_v34  ;;  %v16038_v34 = vld [vmem:[%s16271_s12 + $0x1d00] sm:$0xff]   ;;  %v1167_v37 = vpack.c.bf16 %v854_v32, %v854_v32  ;;  %v16074_v32 = vld [vmem:[%s16271_s12 + $0x1e48] sm:$0xff]  }
 0x397   : > { %14769 = vmatprep.subr.bf16.mxu0 %v16003_v40  ;;  %14762 = vmatpush3.bf16.msra.mxu1 %v16002_v38  ;;  %v855_v38 = vcombine.high %v853_v33, %v853_v33  ;;  %v1168_v40 = vpack.c.bf16 %v853_v33, %v853_v33 }
 0x398   : > { %14791 = vmatprep.subr.bf16.mxu1 %v16006_v46  ;;  %v16044_v46 = vld [vmem:[%s16271_s12 + $0x1d88] sm:$0xff]  }
 0x399   : > { %11762 = vmatmul.mubr.bf16.vlgmr.msra.gmra.mrb[108].mxu0 %v1162_v45  ;;  %v1169_v43 = vpack.c.bf16 %v855_v38, %v855_v38  ;;  %v16043_v45 = vld [vmem:[%s16271_s12 + $0x1dc8] sm:$0xff]   ;;  %v16079_v38 = vld [vmem:[%s16271_s12 + $0x1e10] sm:$0xff]  }
 0x39a   : > { %14770 = vmatpush3.bf16.msra.mxu0 %v16005_v44  ;;  %11802 = vmatmul.mubr.bf16.vlgmr.msra.gmra.mrb[108].mxu1 %v1164_v50  ;;  %v16042_v44 = vld [vmem:[%s16271_s12 + $0x1d08] sm:$0xff]   ;;  %v16048_v50 = vld [vmem:[%s16271_s12 + $0x1d90] sm:$0xff]  }
 0x39b   : > { %14771 = vmatprep.subr.bf16.mxu0 %v16008_v51  ;;  %14792 = vmatpush3.bf16.msra.mxu1 %v16007_v49  ;;  %v16047_v49 = vld [vmem:[%s16271_s12 + $0x1dd0] sm:$0xff]   ;;  %v16049_v51 = vld [vmem:[%s16271_s12 + $0x1d58] sm:$0xff]  }
 0x39c   : > { %14793 = vmatprep.subr.bf16.mxu1 %v16010_v54  ;;  %11841 = vmatprep.mubr.bf16.mxu0 %v1167_v37  ;;  %v16052_v54 = vld [vmem:[%s16271_s12 + $0x1d98] sm:$0xff]   ;;  %v16078_v37 = vld [vmem:[%s16271_s12 + $0x1e50] sm:$0xff]  }
 0x39d   : > { %11881 = vmatprep.mubr.bf16.mxu1 %v1169_v43  ;;  %v16083_v43 = vld [vmem:[%s16271_s12 + $0x1e18] sm:$0xff]  }
 0x39e   : > { %14772 = vmatpush3.bf16.msra.mxu0 %v16009_v53  ;;  %v16051_v53 = vld [vmem:[%s16271_s12 + $0x1dd8] sm:$0xff]  }
 0x39f   : > { %14773 = vmatprep.subr.bf16.mxu0 %v16012_v56  ;;  %14794 = vmatpush3.bf16.msra.mxu1 %v16011_v55  ;;  %v16053_v55 = vld [vmem:[%s16271_s12 + $0x1d60] sm:$0xff]  }
 0x3a0   : > { %14795 = vmatprep.subr.bf16.mxu1 %v16014_v58  ;;  %v16054_v56 = vld [vmem:[%s16271_s12 + $0x1d20] sm:$0xff]  }
 0x3a1   : > { %v16056_v58 = vld [vmem:[%s16271_s12 + $0x1da0] sm:$0xff]  }
 0x3a2   : > { %14774 = vmatpush3.bf16.msra.mxu0 %v16013_v57  ;;  %v16055_v57 = vld [vmem:[%s16271_s12 + $0x1de0] sm:$0xff]  }
 0x3a3   : > { %14775 = vmatprep.subr.bf16.mxu0 %v16016_v60  ;;  %14796 = vmatpush3.bf16.msra.mxu1 %v16015_v59  ;;  %v16057_v59 = vld [vmem:[%s16271_s12 + $0x1d68] sm:$0xff]  }
 0x3a4   : > { %14797 = vmatprep.subr.bf16.mxu1 %v16018_v62 }
 0x3a6   : > { %14776 = vmatpush3.bf16.msra.mxu0 %v16017_v61  ;;  %v16058_v61 = vld [vmem:[%s16271_s12 + $0x1d28] sm:$0xff]  }
 0x3a7   : > { %14777 = vmatprep.subr.bf16.mxu0 %v16020_v0  ;;  %14798 = vmatpush3.bf16.msra.mxu1 %v16019_v63  ;;  %v16059_v63 = vld [vmem:[%s16271_s12 + $0x1de8] sm:$0xff]  }
 0x3a8   : > { %14799 = vmatprep.subr.bf16.mxu1 %v16022_v2 }
 0x3aa   : > { %14778 = vmatpush3.bf16.msra.mxu0 %v16021_v1 }
 0x3ab   : > { %14779 = vmatprep.subr.bf16.mxu0 %v16024_v4  ;;  %14800 = vmatpush3.bf16.msra.mxu1 %v16023_v3  ;;  %v16060_v3 = vld [vmem:[%s16271_s12 + $0x1da8] sm:$0xff]   ;;  %v16061_v4 = vld [vmem:[%s16271_s12 + $0x1d70] sm:$0xff]  }
 0x3ac   : > { %v14477_v5 = vpop.f32.mrb[84].mxu0  ;;  %14801 = vmatprep.subr.bf16.mxu1 %v16026_v8 }
 0x3ad   : > { %v14478_v7 = vpop.f32.mrb[85].mxu0  ;;  %v14499_v11 = vpop.f32.mrb[84].mxu1 }
 0x3ae   : > { %v14479_v9 = vadd.f32 %v14478_v7, %v14477_v5  ;;  %v14480_v10 = vpop.f32.mrb[86].mxu0  ;;  %v14500_v15 = vpop.f32.mrb[85].mxu1  ;;  %14780 = vmatpush3.bf16.msra.mxu0 %v16025_v6 }
 0x3af   : > { %v14481_v14 = vpop.f32.mrb[87].mxu0  ;;  %v14501_v17 = vadd.f32 %v14500_v15, %v14499_v11  ;;  %v14502_v18 = vpop.f32.mrb[86].mxu1  ;;  %14781 = vmatprep.subr.bf16.mxu0 %v16028_v13  ;;  %14802 = vmatpush3.bf16.msra.mxu1 %v16027_v12  ;;  %v16062_v10 = vld [vmem:[%s16271_s12 + $0x1d30] sm:$0xff]   ;;  %v16065_v15 = vld [vmem:[%s16271_s12 + $0x1d78] sm:$0xff]  }
 0x3b0   : > { %v11284_v16 = vadd.f32 %v14479_v9, %v17308_v31  ;;  %v14503_v20 = vpop.f32.mrb[87].mxu1  ;;  %14803 = vmatprep.subr.bf16.mxu1 %v16030_v21  ;;  %v16036_v31 = vld [vmem:[%s16271_s12 + $0x1d40] sm:$0xff]   ;;  %v16063_v12 = vld [vmem:[%s16271_s12 + $0x1df0] sm:$0xff]   ;;  %v326_v18 = vld [vmem:[%s16266_s8 + $0xe8] sm:$0xff] }
 0x3b1   : > { %v16064_v14 = vld [vmem:[%s16271_s12 + $0x1db0] sm:$0xff]   ;;  %v16068_v20 = vld [vmem:[%s16271_s12 + $0x1db8] sm:$0xff]   ;;  %v856_v21 = vcombine.high %v326_v18, %v326_v18 }
 0x3b2   : > { %v17346_v22 = vadd.f32 %v14501_v17, %v11284_v16  ;;  %14782 = vmatpush3.bf16.msra.mxu0 %v16029_v19  ;;  %v16066_v16 = vld [vmem:[%s16271_s12 + $0x1d38] sm:$0xff]   ;;  %v863_v19 = vrot.slane %v326_v18, %v16309_v42  ;;  %v16105_v18 = vld [vmem:[%s16271_s12 + $0x1fc0] sm:$0xff]  }
 0x3b3   : > { %14783 = vmatprep.subr.bf16.mxu0 %v16032_v24  ;;  %14804 = vmatpush3.bf16.msra.mxu1 %v16031_v23  ;;  %v16067_v17 = vld [vmem:[%s16271_s12 + $0x1df8] sm:$0xff]   ;;  %v870_v24 = vrot.slane %v856_v21, %v16309_v42  ;;  %v16106_v21 = vld [vmem:[%s16271_s12 + $0x1f80] sm:$0xff]  }
 0x3b4   : > { %14805 = vmatprep.subr.bf16.mxu1 %v16034_v26  ;;  %v871_v23 = vcombine.high %v863_v19, %v863_v19  ;;  %v1170_v26 = vpack.c.bf16 %v863_v19, %v863_v19 }
 0x3b6   : > { %14784 = vmatpush3.bf16.msra.mxu0 %v16033_v25  ;;  %v16071_v25 = vld [vmem:[%s16271_s12 + $0x1e00] sm:$0xff]   ;;  %v1171_v28 = vpack.c.bf16 %v871_v23, %v871_v23  ;;  %v16107_v23 = vld [vmem:[%s16271_s12 + $0x1f48] sm:$0xff]  }
 0x3b7   : > { %14813 = vmatprep.subr.bf16.mxu0 %v16036_v31  ;;  %14806 = vmatpush3.bf16.msra.mxu1 %v16035_v29  ;;  %v872_v29 = vcombine.high %v870_v24, %v870_v24  ;;  %v1172_v31 = vpack.c.bf16 %v870_v24, %v870_v24 }
 0x3b8   : > { %14835 = vmatprep.subr.bf16.mxu1 %v16039_v36  ;;  %v16077_v36 = vld [vmem:[%s16271_s12 + $0x1e88] sm:$0xff]  }
 0x3b9   : > { %11842 = vmatmul.mubr.bf16.vlgmr.msra.gmra.mrb[112].mxu0 %v1166_v35  ;;  %v1173_v33 = vpack.c.bf16 %v872_v29, %v872_v29  ;;  %v16076_v35 = vld [vmem:[%s16271_s12 + $0x1ec8] sm:$0xff]   ;;  %v16112_v29 = vld [vmem:[%s16271_s12 + $0x1f10] sm:$0xff]  }
 0x3ba   : > { %14814 = vmatpush3.bf16.msra.mxu0 %v16038_v34  ;;  %11882 = vmatmul.mubr.bf16.vlgmr.msra.gmra.mrb[112].mxu1 %v1168_v40  ;;  %v16075_v34 = vld [vmem:[%s16271_s12 + $0x1e08] sm:$0xff]   ;;  %v16081_v40 = vld [vmem:[%s16271_s12 + $0x1e90] sm:$0xff]  }
 0x3bb   : > { %14815 = vmatprep.subr.bf16.mxu0 %v16041_v41  ;;  %14836 = vmatpush3.bf16.msra.mxu1 %v16040_v39  ;;  %v16080_v39 = vld [vmem:[%s16271_s12 + $0x1ed0] sm:$0xff]   ;;  %v16082_v41 = vld [vmem:[%s16271_s12 + $0x1e58] sm:$0xff]  }
 0x3bc   : > { %14837 = vmatprep.subr.bf16.mxu1 %v16043_v45  ;;  %11921 = vmatprep.mubr.bf16.mxu0 %v1171_v28  ;;  %v16085_v45 = vld [vmem:[%s16271_s12 + $0x1e98] sm:$0xff]   ;;  %v16111_v28 = vld [vmem:[%s16271_s12 + $0x1f50] sm:$0xff]  }
 0x3bd   : > { %11961 = vmatprep.mubr.bf16.mxu1 %v1173_v33  ;;  %v16116_v33 = vld [vmem:[%s16271_s12 + $0x1f18] sm:$0xff]  }
 0x3be   : > { %14816 = vmatpush3.bf16.msra.mxu0 %v16042_v44  ;;  %v16084_v44 = vld [vmem:[%s16271_s12 + $0x1ed8] sm:$0xff]  }
 0x3bf   : > { %14817 = vmatprep.subr.bf16.mxu0 %v16045_v47  ;;  %14838 = vmatpush3.bf16.msra.mxu1 %v16044_v46  ;;  %v16086_v46 = vld [vmem:[%s16271_s12 + $0x1e60] sm:$0xff]  }
 0x3c0   : > { %14839 = vmatprep.subr.bf16.mxu1 %v16047_v49  ;;  %v16087_v47 = vld [vmem:[%s16271_s12 + $0x1e20] sm:$0xff]  }
 0x3c1   : > { %v16089_v49 = vld [vmem:[%s16271_s12 + $0x1ea0] sm:$0xff]  }
 0x3c2   : > { %14818 = vmatpush3.bf16.msra.mxu0 %v16046_v48  ;;  %v16088_v48 = vld [vmem:[%s16271_s12 + $0x1ee0] sm:$0xff]  }
 0x3c3   : > { %14819 = vmatprep.subr.bf16.mxu0 %v16049_v51  ;;  %14840 = vmatpush3.bf16.msra.mxu1 %v16048_v50  ;;  %v16090_v50 = vld [vmem:[%s16271_s12 + $0x1e68] sm:$0xff]  }
 0x3c4   : > { %14841 = vmatprep.subr.bf16.mxu1 %v16051_v53 }
 0x3c6   : > { %14820 = vmatpush3.bf16.msra.mxu0 %v16050_v52  ;;  %v16091_v52 = vld [vmem:[%s16271_s12 + $0x1e28] sm:$0xff]  }
 0x3c7   : > { %14821 = vmatprep.subr.bf16.mxu0 %v16053_v55  ;;  %14842 = vmatpush3.bf16.msra.mxu1 %v16052_v54  ;;  %v16092_v54 = vld [vmem:[%s16271_s12 + $0x1ee8] sm:$0xff]  }
 0x3c8   : > { %14843 = vmatprep.subr.bf16.mxu1 %v16055_v57 }
 0x3ca   : > { %14822 = vmatpush3.bf16.msra.mxu0 %v16054_v56 }
 0x3cb   : > { %14823 = vmatprep.subr.bf16.mxu0 %v16057_v59  ;;  %14844 = vmatpush3.bf16.msra.mxu1 %v16056_v58 }
 0x3cc   : > { %v14521_v60 = vpop.f32.mrb[88].mxu0  ;;  %14845 = vmatprep.subr.bf16.mxu1 %v16059_v63 }
 0x3cd   : > { %v14522_v62 = vpop.f32.mrb[89].mxu0  ;;  %v14543_v2 = vpop.f32.mrb[88].mxu1 }
 0x3ce   : > { %v14523_v0 = vadd.f32 %v14522_v62, %v14521_v60  ;;  %v14524_v1 = vpop.f32.mrb[90].mxu0  ;;  %v14544_v6 = vpop.f32.mrb[89].mxu1  ;;  %14824 = vmatpush3.bf16.msra.mxu0 %v16058_v61  ;;  %v16093_v60 = vld [vmem:[%s16271_s12 + $0x1ea8] sm:$0xff]   ;;  %v16094_v61 = vld [vmem:[%s16271_s12 + $0x1e70] sm:$0xff]  }
 0x3cf   : > { %v14525_v5 = vpop.f32.mrb[91].mxu0  ;;  %v14545_v8 = vadd.f32 %v14544_v6, %v14543_v2  ;;  %v14546_v9 = vpop.f32.mrb[90].mxu1  ;;  %14825 = vmatprep.subr.bf16.mxu0 %v16061_v4  ;;  %14846 = vmatpush3.bf16.msra.mxu1 %v16060_v3  ;;  %v16095_v1 = vld [vmem:[%s16271_s12 + $0x1e30] sm:$0xff]   ;;  %v16098_v6 = vld [vmem:[%s16271_s12 + $0x1e78] sm:$0xff]  }
 0x3d0   : > { %v11364_v7 = vadd.f32 %v14523_v0, %v17346_v22  ;;  %v14547_v11 = vpop.f32.mrb[91].mxu1  ;;  %14847 = vmatprep.subr.bf16.mxu1 %v16063_v12  ;;  %v16069_v22 = vld [vmem:[%s16271_s12 + $0x1e40] sm:$0xff]   ;;  %v16096_v3 = vld [vmem:[%s16271_s12 + $0x1ef0] sm:$0xff]  }
 0x3d1   : > { %v16097_v5 = vld [vmem:[%s16271_s12 + $0x1eb0] sm:$0xff]   ;;  %v16101_v11 = vld [vmem:[%s16271_s12 + $0x1eb8] sm:$0xff]  }
 0x3d2   : > { %v17384_v13 = vadd.f32 %v14545_v8, %v11364_v7  ;;  %14826 = vmatpush3.bf16.msra.mxu0 %v16062_v10  ;;  %v16099_v7 = vld [vmem:[%s16271_s12 + $0x1e38] sm:$0xff]   ;;  %v327_v9 = vld [vmem:[%s16266_s8 + $0xf0] sm:$0xff] }
 0x3d3   : > { %14827 = vmatprep.subr.bf16.mxu0 %v16065_v15  ;;  %14848 = vmatpush3.bf16.msra.mxu1 %v16064_v14  ;;  %v16100_v8 = vld [vmem:[%s16271_s12 + $0x1ef8] sm:$0xff]   ;;  %v880_v10 = vrot.slane %v327_v9, %v16309_v42  ;;  %v873_v12 = vcombine.high %v327_v9, %v327_v9 }
 0x3d4   : > { %14849 = vmatprep.subr.bf16.mxu1 %v16067_v17 }
 0x3d5   : > { %v888_v14 = vcombine.high %v880_v10, %v880_v10  ;;  %v887_v15 = vrot.slane %v873_v12, %v16309_v42  ;;  %v1174_v17 = vpack.c.bf16 %v880_v10, %v880_v10  ;;  %v16137_v10 = vld [vmem:[%s16271_s12 + $0x2000] sm:$0xff]   ;;  %v16139_v12 = vld [vmem:[%s16271_s12 + $0x2048] sm:$0xff]  }
 0x3d6   : > { %14828 = vmatpush3.bf16.msra.mxu0 %v16066_v16  ;;  %v16104_v16 = vld [vmem:[%s16271_s12 + $0x1f00] sm:$0xff]  }
 0x3d7   : > { %14857 = vmatprep.subr.bf16.mxu0 %v16069_v22  ;;  %14850 = vmatpush3.bf16.msra.mxu1 %v16068_v20  ;;  %v1175_v19 = vpack.c.bf16 %v888_v14, %v888_v14  ;;  %v889_v20 = vcombine.high %v887_v15, %v887_v15  ;;  %v1176_v22 = vpack.c.bf16 %v887_v15, %v887_v15  ;;  %v16205_v14 = vmov 0.0   ;;  %v16138_v15 = vld [vmem:[%s16271_s12 + $0x2080] sm:$0xff]  }
 0x3d8   : > { %14879 = vmatprep.subr.bf16.mxu1 %v16072_v27  ;;  %v16110_v27 = vld [vmem:[%s16271_s12 + $0x1f88] sm:$0xff]  }
 0x3d9   : > { %11922 = vmatmul.mubr.bf16.vlgmr.msra.gmra.mrb[116].mxu0 %v1170_v26  ;;  %v1177_v24 = vpack.c.bf16 %v889_v20, %v889_v20  ;;  %v16109_v26 = vld [vmem:[%s16271_s12 + $0x1fc8] sm:$0xff]   ;;  %v16145_v20 = vld [vmem:[%s16271_s12 + $0x2058] sm:$0xff]  }
 0x3da   : > { %14858 = vmatpush3.bf16.msra.mxu0 %v16071_v25  ;;  %11962 = vmatmul.mubr.bf16.vlgmr.msra.gmra.mrb[116].mxu1 %v1172_v31  ;;  %v16108_v25 = vld [vmem:[%s16271_s12 + $0x1f08] sm:$0xff]   ;;  %v16114_v31 = vld [vmem:[%s16271_s12 + $0x1f90] sm:$0xff]  }
 0x3db   : > { %14859 = vmatprep.subr.bf16.mxu0 %v16074_v32  ;;  %14880 = vmatpush3.bf16.msra.mxu1 %v16073_v30  ;;  %v16113_v30 = vld [vmem:[%s16271_s12 + $0x1fd0] sm:$0xff]   ;;  %v16115_v32 = vld [vmem:[%s16271_s12 + $0x1f58] sm:$0xff]  }
 0x3dc   : > { %14881 = vmatprep.subr.bf16.mxu1 %v16076_v35  ;;  %12001 = vmatprep.mubr.bf16.mxu0 %v1175_v19  ;;  %v16118_v35 = vld [vmem:[%s16271_s12 + $0x1f98] sm:$0xff]   ;;  %v16143_v19 = vld [vmem:[%s16271_s12 + $0x2010] sm:$0xff]  }
 0x3dd   : > { %12041 = vmatprep.mubr.bf16.mxu1 %v1177_v24  ;;  %v16147_v24 = vld [vmem:[%s16271_s12 + $0x2098] sm:$0xff]  }
 0x3de   : > { %14860 = vmatpush3.bf16.msra.mxu0 %v16075_v34  ;;  %v16117_v34 = vld [vmem:[%s16271_s12 + $0x1fd8] sm:$0xff]  }
 0x3df   : > { %14861 = vmatprep.subr.bf16.mxu0 %v16078_v37  ;;  %14882 = vmatpush3.bf16.msra.mxu1 %v16077_v36  ;;  %v16119_v36 = vld [vmem:[%s16271_s12 + $0x1f60] sm:$0xff]  }
 0x3e0   : > { %14883 = vmatprep.subr.bf16.mxu1 %v16080_v39  ;;  %v16120_v37 = vld [vmem:[%s16271_s12 + $0x1f20] sm:$0xff]  }
 0x3e1   : > { %v16122_v39 = vld [vmem:[%s16271_s12 + $0x1fa0] sm:$0xff]  }
 0x3e2   : > { %14862 = vmatpush3.bf16.msra.mxu0 %v16079_v38  ;;  %v16121_v38 = vld [vmem:[%s16271_s12 + $0x1fe0] sm:$0xff]  }
 0x3e3   : > { %14863 = vmatprep.subr.bf16.mxu0 %v16082_v41  ;;  %14884 = vmatpush3.bf16.msra.mxu1 %v16081_v40  ;;  %v16123_v40 = vld [vmem:[%s16271_s12 + $0x1f68] sm:$0xff]  }
 0x3e4   : > { %14885 = vmatprep.subr.bf16.mxu1 %v16084_v44 }
 0x3e6   : > { %14864 = vmatpush3.bf16.msra.mxu0 %v16083_v43  ;;  %v16124_v43 = vld [vmem:[%s16271_s12 + $0x1f28] sm:$0xff]  }
 0x3e7   : > { %14865 = vmatprep.subr.bf16.mxu0 %v16086_v46  ;;  %14886 = vmatpush3.bf16.msra.mxu1 %v16085_v45  ;;  %v16125_v45 = vld [vmem:[%s16271_s12 + $0x1fe8] sm:$0xff]  }
 0x3e8   : > { %14887 = vmatprep.subr.bf16.mxu1 %v16088_v48 }
 0x3ea   : > { %14866 = vmatpush3.bf16.msra.mxu0 %v16087_v47 }
 0x3eb   : > { %14867 = vmatprep.subr.bf16.mxu0 %v16090_v50  ;;  %14888 = vmatpush3.bf16.msra.mxu1 %v16089_v49  ;;  %v16126_v49 = vld [vmem:[%s16271_s12 + $0x1fa8] sm:$0xff]   ;;  %v16127_v50 = vld [vmem:[%s16271_s12 + $0x1f70] sm:$0xff]  }
 0x3ec   : > { %v14565_v51 = vpop.f32.mrb[92].mxu0  ;;  %14889 = vmatprep.subr.bf16.mxu1 %v16092_v54 }
 0x3ed   : > { %v14566_v53 = vpop.f32.mrb[93].mxu0  ;;  %v14587_v57 = vpop.f32.mrb[92].mxu1 }
 0x3ee   : > { %v14567_v55 = vadd.f32 %v14566_v53, %v14565_v51  ;;  %v14568_v56 = vpop.f32.mrb[94].mxu0  ;;  %v14588_v59 = vpop.f32.mrb[93].mxu1  ;;  %14868 = vmatpush3.bf16.msra.mxu0 %v16091_v52 }
 0x3ef   : > { %v14569_v58 = vpop.f32.mrb[95].mxu0  ;;  %v14589_v63 = vadd.f32 %v14588_v59, %v14587_v57  ;;  %v14590_v0 = vpop.f32.mrb[94].mxu1  ;;  %14869 = vmatprep.subr.bf16.mxu0 %v16094_v61  ;;  %14890 = vmatpush3.bf16.msra.mxu1 %v16093_v60  ;;  %v16128_v56 = vld [vmem:[%s16271_s12 + $0x1f30] sm:$0xff]   ;;  %v16131_v61 = vld [vmem:[%s16271_s12 + $0x1f78] sm:$0xff]  }
 0x3f0   : > { %v11444_v62 = vadd.f32 %v14567_v55, %v17384_v13  ;;  %v14591_v2 = vpop.f32.mrb[95].mxu1  ;;  %14891 = vmatprep.subr.bf16.mxu1 %v16096_v3  ;;  %v16102_v13 = vld [vmem:[%s16271_s12 + $0x1f40] sm:$0xff]   ;;  %v16129_v58 = vld [vmem:[%s16271_s12 + $0x1ff0] sm:$0xff]   ;;  %v328_v0 = vld [vmem:[%s16266_s8 + $0xf8] sm:$0xff] }
 0x3f1   : > { %v16130_v60 = vld [vmem:[%s16271_s12 + $0x1fb0] sm:$0xff]   ;;  %v16134_v2 = vld [vmem:[%s16271_s12 + $0x1fb8] sm:$0xff]   ;;  %v890_v3 = vcombine.high %v328_v0, %v328_v0 }
 0x3f2   : > { %v17422_v4 = vadd.f32 %v14589_v63, %v11444_v62  ;;  %14870 = vmatpush3.bf16.msra.mxu0 %v16095_v1  ;;  %v16132_v62 = vld [vmem:[%s16271_s12 + $0x1f38] sm:$0xff]   ;;  %v897_v1 = vrot.slane %v328_v0, %v16309_v42 }
 0x3f3   : > { %14871 = vmatprep.subr.bf16.mxu0 %v16098_v6  ;;  %14892 = vmatpush3.bf16.msra.mxu1 %v16097_v5  ;;  %v16133_v63 = vld [vmem:[%s16271_s12 + $0x1ff8] sm:$0xff]   ;;  %v904_v6 = vrot.slane %v890_v3, %v16309_v42 }
 0x3f4   : > { %14893 = vmatprep.subr.bf16.mxu1 %v16100_v8  ;;  %v905_v5 = vcombine.high %v897_v1, %v897_v1 }
 0x3f5   : > { %v906_v9 = vcombine.high %v904_v6, %v904_v6 }
 0x3f6   : > { %14872 = vmatpush3.bf16.msra.mxu0 %v16099_v7  ;;  %v1178_v7 = vpack.c.bf16 %v897_v1, %v897_v1  ;;  %v1179_v8 = vpack.c.bf16 %v905_v5, %v905_v5 }
 0x3f7   : > { %14901 = vmatprep.subr.bf16.mxu0 %v16102_v13  ;;  %14894 = vmatpush3.bf16.msra.mxu1 %v16101_v11  ;;  %v1180_v11 = vpack.c.bf16 %v904_v6, %v904_v6  ;;  %v1181_v13 = vpack.c.bf16 %v906_v9, %v906_v9 }
 0x3f8   : > { %14923 = vmatprep.subr.bf16.mxu1 %v16105_v18  ;;  %v16141_v18 = vld [vmem:[%s16271_s12 + $0x2088] sm:$0xff]  }
 0x3f9   : > { %12002 = vmatmul.mubr.bf16.vlgmr.msra.gmra.mrb[120].mxu0 %v1174_v17  ;;  %v16142_v17 = vld [vmem:[%s16271_s12 + $0x2050] sm:$0xff]  }
 0x3fa   : > { %14902 = vmatpush3.bf16.msra.mxu0 %v16104_v16  ;;  %12042 = vmatmul.mubr.bf16.vlgmr.msra.gmra.mrb[120].mxu1 %v1176_v22  ;;  %v16140_v16 = vld [vmem:[%s16271_s12 + $0x2008] sm:$0xff]   ;;  %v16146_v22 = vld [vmem:[%s16271_s12 + $0x2018] sm:$0xff]  }
 0x3fb   : > { %14903 = vmatprep.subr.bf16.mxu0 %v16107_v23  ;;  %14924 = vmatpush3.bf16.msra.mxu1 %v16106_v21  ;;  %v16144_v21 = vld [vmem:[%s16271_s12 + $0x2090] sm:$0xff]   ;;  %v16148_v23 = vld [vmem:[%s16271_s12 + $0x2060] sm:$0xff]  }
 0x3fc   : > { %14925 = vmatprep.subr.bf16.mxu1 %v16109_v26  ;;  %12081 = vmatprep.mubr.bf16.mxu0 %v1179_v8  ;;  %v16151_v26 = vld [vmem:[%s16271_s12 + $0x2068] sm:$0xff]  }
 0x3fd   : > { %12121 = vmatprep.mubr.bf16.mxu1 %v1181_v13 }
 0x3fe   : > { %14904 = vmatpush3.bf16.msra.mxu0 %v16108_v25  ;;  %v16149_v25 = vld [vmem:[%s16271_s12 + $0x2020] sm:$0xff]  }
 0x3ff   : > { %14905 = vmatprep.subr.bf16.mxu0 %v16111_v28  ;;  %14926 = vmatpush3.bf16.msra.mxu1 %v16110_v27  ;;  %v16150_v28 = vld [vmem:[%s16271_s12 + $0x20a0] sm:$0xff]  }
 0x400   : > { %14927 = vmatprep.subr.bf16.mxu1 %v16113_v30  ;;  %v329_v30 = vld [vmem:[%s16266_s8 + $0x100] sm:$0x3f] }
 0x402   : > { %14906 = vmatpush3.bf16.msra.mxu0 %v16112_v29 }
 0x403   : > { %14907 = vmatprep.subr.bf16.mxu0 %v16115_v32  ;;  %14928 = vmatpush3.bf16.msra.mxu1 %v16114_v31 }
 0x404   : > { %14929 = vmatprep.subr.bf16.mxu1 %v16117_v34  ;;  %v16152_v34 = vld [vmem:[%s16271_s12 + $0x2028] sm:$0xff]  }
 0x406   : > { %14908 = vmatpush3.bf16.msra.mxu0 %v16116_v33 }
 0x407   : > { %14909 = vmatprep.subr.bf16.mxu0 %v16119_v36  ;;  %14930 = vmatpush3.bf16.msra.mxu1 %v16118_v35  ;;  %v914_v35 = vrot.slane %v329_v30, %v16309_v42 }
 0x408   : > { %14931 = vmatprep.subr.bf16.mxu1 %v16121_v38  ;;  %v16154_v38 = vld [vmem:[%s16271_s12 + $0x2070] sm:$0xff]  }
 0x40a   : > { %14910 = vmatpush3.bf16.msra.mxu0 %v16120_v37 }
 0x40b   : > { %14911 = vmatprep.subr.bf16.mxu0 %v16123_v40  ;;  %14932 = vmatpush3.bf16.msra.mxu1 %v16122_v39 }
 0x40c   : > { %v14609_v41 = vpop.f32.mrb[96].mxu0  ;;  %14933 = vmatprep.subr.bf16.mxu1 %v16125_v45 }
 0x40d   : > { %v14610_v44 = vpop.f32.mrb[97].mxu0  ;;  %v14631_v48 = vpop.f32.mrb[96].mxu1 }
 0x40e   : > { %v14611_v46 = vadd.f32 %v14610_v44, %v14609_v41  ;;  %v14612_v47 = vpop.f32.mrb[98].mxu0  ;;  %v14632_v52 = vpop.f32.mrb[97].mxu1  ;;  %14912 = vmatpush3.bf16.msra.mxu0 %v16124_v43  ;;  %v16153_v41 = vld [vmem:[%s16271_s12 + $0x20a8] sm:$0xff]   ;;  %v922_v44 = vcombine.high %v914_v35, %v914_v35 }
 0x40f   : > { %v14613_v51 = vpop.f32.mrb[99].mxu0  ;;  %v14633_v54 = vadd.f32 %v14632_v52, %v14631_v48  ;;  %v14634_v55 = vpop.f32.mrb[98].mxu1  ;;  %14913 = vmatprep.subr.bf16.mxu0 %v16127_v50  ;;  %14934 = vmatpush3.bf16.msra.mxu1 %v16126_v49  ;;  %v16155_v47 = vld [vmem:[%s16271_s12 + $0x2030] sm:$0xff]   ;;  %v16157_v49 = vld [vmem:[%s16271_s12 + $0x2078] sm:$0xff]   ;;  %v907_v50 = vcombine.high %v329_v30, %v329_v30 }
 0x410   : > { %v11524_v53 = vadd.f32 %v14611_v46, %v17422_v4  ;;  %v14635_v57 = vpop.f32.mrb[99].mxu1  ;;  %14935 = vmatprep.subr.bf16.mxu1 %v16129_v58  ;;  %v16135_v4 = vld [vmem:[%s16271_s12 + $0x2040] sm:$0xff]   ;;  %v1183_v48 = vpack.c.bf16 %v922_v44, %v922_v44  ;;  %v16156_v51 = vld [vmem:[%s16271_s12 + $0x20b0] sm:$0xff]   ;;  %v16158_v52 = vld [vmem:[%s16271_s12 + $0x2038] sm:$0xff]   ;;  %v1182_v55 = vpack.c.bf16 %v914_v35, %v914_v35 }
 0x412   : > { %v17460_v59 = vadd.f32 %v14633_v54, %v11524_v53  ;;  %14914 = vmatpush3.bf16.msra.mxu0 %v16128_v56  ;;  %v921_v53 = vrot.slane %v907_v50, %v16309_v42  ;;  %v16160_v54 = vld [vmem:[%s16271_s12 + $0x20b8] sm:$0xff]  }
 0x413   : > { %14915 = vmatprep.subr.bf16.mxu0 %v16131_v61  ;;  %14936 = vmatpush3.bf16.msra.mxu1 %v16130_v60 }
 0x414   : > { %14937 = vmatprep.subr.bf16.mxu1 %v16133_v63  ;;  %v1184_v56 = vpack.c.bf16 %v921_v53, %v921_v53 }
 0x416   : > { %14916 = vmatpush3.bf16.msra.mxu0 %v16132_v62 }
 0x417   : > { %14945 = vmatprep.subr.bf16.mxu0 %v16135_v4  ;;  %14938 = vmatpush3.bf16.msra.mxu1 %v16134_v2 }
 0x418   : > { %14990 = vmatprep.subr.bf16.mxu1 %v16205_v14 }
 0x419   : > { %12082 = vmatmul.mubr.bf16.vlgmr.msra.gmra.mrb[124].mxu0 %v1178_v7 }
 0x41a   : > { %14946 = vmatpush3.bf16.msra.mxu0 %v16137_v10  ;;  %12122 = vmatmul.mubr.bf16.vlgmr.msra.gmra.mrb[124].mxu1 %v1180_v11 }
 0x41b   : > { %14947 = vmatprep.subr.bf16.mxu0 %v16139_v12  ;;  %14991 = vmatpush3.bf16.msra.mxu1 %v16138_v15 }
 0x41c   : > { %15006 = vmatprep.mubr.msk.bf16.mxu1 %vm16206_vm1, %v16205_v14  ;;  %14992 = vmatprep.subr.bf16.mxu1 %v16205_v14 }
 0x41d   : > { %12161 = vmatprep.mubr.bf16.mxu0 %v1183_v48 }
 0x41e   : > { %14948 = vmatpush3.bf16.msra.mxu0 %v16140_v16 }
 0x41f   : > { %14949 = vmatprep.subr.bf16.mxu0 %v16142_v17  ;;  %14993 = vmatpush3.bf16.msra.mxu1 %v16141_v18 }
 0x420   : > { %14994 = vmatprep.subr.bf16.mxu1 %v16205_v14 }
 0x422   : > { %14950 = vmatpush3.bf16.msra.mxu0 %v16143_v19 }
 0x423   : > { %14951 = vmatprep.subr.bf16.mxu0 %v16145_v20  ;;  %14995 = vmatpush3.bf16.msra.mxu1 %v16144_v21 }
 0x424   : > { %14996 = vmatprep.subr.bf16.mxu1 %v16205_v14 }
 0x426   : > { %14952 = vmatpush3.bf16.msra.mxu0 %v16146_v22 }
 0x427   : > { %14953 = vmatprep.subr.bf16.mxu0 %v16148_v23  ;;  %14997 = vmatpush3.bf16.msra.mxu1 %v16147_v24 }
 0x428   : > { %14998 = vmatprep.subr.bf16.mxu1 %v16205_v14 }
 0x42a   : > { %14954 = vmatpush3.bf16.msra.mxu0 %v16149_v25 }
 0x42b   : > { %14955 = vmatprep.subr.bf16.mxu0 %v16151_v26  ;;  %14999 = vmatpush3.bf16.msra.mxu1 %v16150_v28 }
 0x42c   : > { %v14653_v27 = vpop.f32.mrb[100].mxu0  ;;  %15000 = vmatprep.subr.bf16.mxu1 %v16205_v14 }
 0x42d   : > { %v14654_v29 = vpop.f32.mrb[101].mxu0  ;;  %v14675_v33 = vpop.f32.mrb[100].mxu1 }
 0x42e   : > { %v14655_v31 = vadd.f32 %v14654_v29, %v14653_v27  ;;  %v14656_v32 = vpop.f32.mrb[102].mxu0  ;;  %v14676_v37 = vpop.f32.mrb[101].mxu1  ;;  %14956 = vmatpush3.bf16.msra.mxu0 %v16152_v34 }
 0x42f   : > { %v14657_v36 = vpop.f32.mrb[103].mxu0  ;;  %v14677_v40 = vadd.f32 %v14676_v37, %v14675_v33  ;;  %v14678_v43 = vpop.f32.mrb[102].mxu1  ;;  %14957 = vmatprep.subr.bf16.mxu0 %v16154_v38  ;;  %15001 = vmatpush3.bf16.msra.mxu1 %v16153_v41 }
 0x430   : > { %v11604_v39 = vadd.f32 %v14655_v31, %v17460_v59  ;;  %v14679_v45 = vpop.f32.mrb[103].mxu1  ;;  %15002 = vmatprep.subr.bf16.mxu1 %v16205_v14 }
 0x432   : > { %v11644_v46 = vadd.f32 %v14677_v40, %v11604_v39  ;;  %14958 = vmatpush3.bf16.msra.mxu0 %v16155_v47 }
 0x433   : > { %14959 = vmatprep.subr.bf16.mxu0 %v16157_v49  ;;  %15003 = vmatpush3.bf16.msra.mxu1 %v16156_v51 }
 0x434   : > { %15004 = vmatprep.subr.bf16.mxu1 %v16205_v14 }
 0x436   : > { %14960 = vmatpush3.bf16.msra.mxu0 %v16158_v52 }
 0x437   : > { %15005 = vmatpush3.bf16.msra.mxu1 %v16160_v54 }
 0x439   : > { %12162 = vmatmul.mubr.bf16.vlgmr.msra.gmra.mrb[128].mxu0 %v1182_v55 }
 0x43a   : > { %15007 = vmatmul.mubr.bf16.vlgmr.msra.gmra.mrb[128].mxu1 %v1184_v56 }
 0x44c   : > { %v14697_v57 = vpop.f32.mrb[104].mxu0 }
 0x44d   : > { %v14698_v58 = vpop.f32.mrb[105].mxu0  ;;  %v14719_v61 = vpop.f32.mrb[104].mxu1 }
 0x44e   : > { %v14699_v59 = vadd.f32 %v14698_v58, %v14697_v57  ;;  %v14700_v60 = vpop.f32.mrb[106].mxu0  ;;  %v14720_v63 = vpop.f32.mrb[105].mxu1 }
 0x44f   : > { %v14701_v62 = vpop.f32.mrb[107].mxu0  ;;  %v14721_v1 = vadd.f32 %v14720_v63, %v14719_v61  ;;  %v14722_v42 = vpop.f32.mrb[106].mxu1 }
 0x450   : > { %v11684_v0 = vadd.f32 %v14699_v59, %v11644_v46  ;;  %v14723_v2 = vpop.f32.mrb[107].mxu1 }
 0x452   : > { %v11724_v3 = vadd.f32 %v14721_v1, %v11684_v0 }
 0x46c   : > { %v14741_v4 = vpop.f32.mrb[108].mxu0 }
 0x46d   : > { %v14742_v5 = vpop.f32.mrb[109].mxu0  ;;  %v14763_v8 = vpop.f32.mrb[108].mxu1 }
 0x46e   : > { %v14743_v6 = vadd.f32 %v14742_v5, %v14741_v4  ;;  %v14744_v7 = vpop.f32.mrb[110].mxu0  ;;  %v14764_v10 = vpop.f32.mrb[109].mxu1 }
 0x46f   : > { %v14745_v9 = vpop.f32.mrb[111].mxu0  ;;  %v14765_v12 = vadd.f32 %v14764_v10, %v14763_v8  ;;  %v14766_v13 = vpop.f32.mrb[110].mxu1 }
 0x470   : > { %v11764_v11 = vadd.f32 %v14743_v6, %v11724_v3  ;;  %v14767_v14 = vpop.f32.mrb[111].mxu1  ;;  %v296_v9 = vld [vmem:[#allocation2] sm:$0x3] }
 0x471   : > { %v12226_v13 = vld [vmem:[%s17585_s3] sm:$0xff] (!%p13527_p6)  ;;  %v12227_v14 = vld [vmem:[%s17585_s3 + $0x8] sm:$0xff] (!%p13527_p6) }
 0x472   : > { %v11804_v15 = vadd.f32 %v14765_v12, %v11764_v11 }
 0x48c   : > { %v14785_v16 = vpop.f32.mrb[112].mxu0 }
 0x48d   : > { %v14786_v17 = vpop.f32.mrb[113].mxu0  ;;  %v14807_v20 = vpop.f32.mrb[112].mxu1 }
 0x48e   : > { %v14787_v18 = vadd.f32 %v14786_v17, %v14785_v16  ;;  %v14788_v19 = vpop.f32.mrb[114].mxu0  ;;  %v14808_v22 = vpop.f32.mrb[113].mxu1  ;;  %v16207_v16 = vmov (!%p13527_p6), 0.0|0.0   ;;  %v15041_v17 = vpack.c.bf16 (!%p13527_p6), %v12227_v14, %v12226_v13 }
 0x48f   : > { %v14789_v21 = vpop.f32.mrb[115].mxu0  ;;  %v14809_v24 = vadd.f32 %v14808_v22, %v14807_v20  ;;  %v14810_v25 = vpop.f32.mrb[114].mxu1  ;;  %15040 = vmatprep.subr.bf16.mxu0 (!%p13527_p6), %v16207_v16  ;;  %v16209_v19 = vmov (!%p13527_p6), 0.0   ;;  %15052 = vmatprep.subr.bf16.mxu1 (!%p13527_p6), %v16207_v16  ;;  %v12317_v22 = vld [vmem:[%s17587_s5 + $0x8] sm:$0xff] (!%p13527_p6) }
 0x490   : > { %v11844_v23 = vadd.f32 %v14787_v18, %v11804_v15  ;;  %v14811_v26 = vpop.f32.mrb[115].mxu1  ;;  %v12228_v15 = vld [vmem:[%s17585_s3 + $0x10] sm:$0xff] (!%p13527_p6)  ;;  %v12229_v18 = vld [vmem:[%s17585_s3 + $0x18] sm:$0xff] (!%p13527_p6)  ;;  %15026 = vmatprep.mubr.msk.f32.mxu0 (!%p13527_p6), %vm16208_vm3, %v16209_v19  ;;  %15037 = vmatprep.mubr.msk.f32.mxu1 (!%p13527_p6), %vm16208_vm3, %v16209_v19  ;;  %v12316_v21 = vld [vmem:[%s17587_s5] sm:$0xff] (!%p13527_p6) }
 0x491   : > { %15042 = vmatpush3.bf16.msra.mxu0 (!%p13527_p6), %v15041_v17  ;;  %v15044_v20 = vpack.c.bf16 (!%p13527_p6), %v12229_v18, %v12228_v15  ;;  %v15053_v25 = vpack.c.bf16 (!%p13527_p6), %v12317_v22, %v12316_v21 }
 0x492   : > { %v11884_v27 = vadd.f32 %v14809_v24, %v11844_v23  ;;  %15043 = vmatprep.subr.bf16.mxu0 (!%p13527_p6), %v16207_v16  ;;  %v12230_v23 = vld [vmem:[%s17585_s3 + $0x20] sm:$0xff] (!%p13527_p6)  ;;  %v12231_v24 = vld [vmem:[%s17585_s3 + $0x28] sm:$0xff] (!%p13527_p6) }
 0x493   : > { %15054 = vmatpush3.bf16.msra.mxu1 (!%p13527_p6), %v15053_v25  ;;  %v15047_v26 = vpack.c.bf16 (!%p13527_p6), %v12231_v24, %v12230_v23 }
 0x494   : > { %15055 = vmatprep.subr.bf16.mxu1 (!%p13527_p6), %v16207_v16 }
 0x495   : > { %15045 = vmatpush3.bf16.msra.mxu0 (!%p13527_p6), %v15044_v20 }
 0x496   : > { %15046 = vmatprep.subr.bf16.mxu0 (!%p13527_p6), %v16207_v16 }
 0x499   : > { %15048 = vmatpush3.bf16.msra.mxu0 (!%p13527_p6), %v15047_v26 }
 0x49a   : > { %15049 = vmatprep.subr.bf16.mxu0 (!%p13527_p6), %v16207_v16 }
 0x4ac   : > { %v14829_v28 = vpop.f32.mrb[116].mxu0 }
 0x4ad   : > { %v14830_v29 = vpop.f32.mrb[117].mxu0  ;;  %v14851_v32 = vpop.f32.mrb[116].mxu1 }
 0x4ae   : > { %v14831_v30 = vadd.f32 %v14830_v29, %v14829_v28  ;;  %v14832_v31 = vpop.f32.mrb[118].mxu0  ;;  %v14852_v34 = vpop.f32.mrb[117].mxu1  ;;  %v13528_v28 = vld [vmem:[%s17584_s2] ss:$0 sm:$0xff] (!%p13527_p6)  ;;  %v12232_v29 = vld [vmem:[%s17585_s3 + $0x30] sm:$0xff] (!%p13527_p6) }
 0x4af   : > { %v14833_v33 = vpop.f32.mrb[119].mxu0  ;;  %v14853_v36 = vadd.f32 %v14852_v34, %v14851_v32  ;;  %v14854_v37 = vpop.f32.mrb[118].mxu1  ;;  %v12318_v34 = vld [vmem:[%s17587_s5 + $0x10] sm:$0xff] (!%p13527_p6) }
 0x4b0   : > { %v11924_v35 = vadd.f32 %v14831_v30, %v11884_v27  ;;  %v14855_v38 = vpop.f32.mrb[119].mxu1  ;;  %v12233_v30 = vld [vmem:[%s17585_s3 + $0x38] sm:$0xff] (!%p13527_p6)  ;;  %v13529_v37 = vld [vmem:[%s17586_s4] ss:$0 sm:$0xff] (!%p13527_p6) }
 0x4b1   : > { %v15050_v32 = vpack.c.bf16 (!%p13527_p6), %v12233_v30, %v12232_v29 }
 0x4b2   : > { %v11964_v39 = vadd.f32 %v14853_v36, %v11924_v35  ;;  %v12319_v35 = vld [vmem:[%s17587_s5 + $0x18] sm:$0xff] (!%p13527_p6) }
 0x4b3   : > { %15051 = vmatpush3.bf16.msra.mxu0 (!%p13527_p6), %v15050_v32  ;;  %v15056_v36 = vpack.c.bf16 (!%p13527_p6), %v12319_v35, %v12318_v34 }
 0x4b5   : > { %15057 = vmatpush3.bf16.msra.mxu1 (!%p13527_p6), %v15056_v36 }
 0x4cc   : > { %v14873_v40 = vpop.f32.mrb[120].mxu0 }
 0x4cd   : > { %v14874_v41 = vpop.f32.mrb[121].mxu0  ;;  %v14895_v45 = vpop.f32.mrb[120].mxu1 }
 0x4ce   : > { %v14875_v43 = vadd.f32 %v14874_v41, %v14873_v40  ;;  %v14876_v44 = vpop.f32.mrb[122].mxu0  ;;  %v14896_v47 = vpop.f32.mrb[121].mxu1 }
 0x4cf   : > { %v14877_v46 = vpop.f32.mrb[123].mxu0  ;;  %v14897_v49 = vadd.f32 %v14896_v47, %v14895_v45  ;;  %v14898_v50 = vpop.f32.mrb[122].mxu1 }
 0x4d0   : > { %v12004_v48 = vadd.f32 %v14875_v43, %v11964_v39  ;;  %v14899_v51 = vpop.f32.mrb[123].mxu1  ;;  %v13531_v43 = vld [vmem:[%s17588_s6] ss:$0 sm:$0xff] (!%p13527_p6) }
 0x4d2   : > { %v12044_v52 = vadd.f32 %v14897_v49, %v12004_v48 }
 0x4ec   : > { %v14917_v53 = vpop.f32.mrb[124].mxu0 }
 0x4ed   : > { %v14918_v54 = vpop.f32.mrb[125].mxu0  ;;  %v14939_v57 = vpop.f32.mrb[124].mxu1 }
 0x4ee   : > { %v14919_v55 = vadd.f32 %v14918_v54, %v14917_v53  ;;  %v14920_v56 = vpop.f32.mrb[126].mxu0  ;;  %v14940_v59 = vpop.f32.mrb[125].mxu1 }
 0x4ef   : > { %v14921_v58 = vpop.f32.mrb[127].mxu0  ;;  %v14941_v61 = vadd.f32 %v14940_v59, %v14939_v57  ;;  %v14942_v62 = vpop.f32.mrb[126].mxu1 }
 0x4f0   : > { %v12084_v60 = vadd.f32 %v14919_v55, %v12044_v52  ;;  %v14943_v63 = vpop.f32.mrb[127].mxu1 }
 0x4f2   : > { %v12124_v0 = vadd.f32 %v14941_v61, %v12084_v60 }
 0x50c   : > { %v14961_v1 = vpop.f32.mrb[128].mxu0 }
 0x50d   : > { %v14962_v42 = vpop.f32.mrb[129].mxu0  ;;  %v12203_v4 = vpop.f32.mrb[128].mxu1 }
 0x50e   : > { %v14963_v2 = vadd.f32 %v14962_v42, %v14961_v1  ;;  %v14964_v3 = vpop.f32.mrb[130].mxu0  ;;  %v15008_v6 = vpop.f32.mrb[129].mxu1 }
 0x50f   : > { %v14965_v5 = vpop.f32.mrb[131].mxu0  ;;  %v12206_v8 = vpop.f32.mrb[130].mxu1 }
 0x510   : > { %v12164_v7 = vadd.f32 %v14963_v2, %v12124_v0  ;;  %v15009_v10 = vpop.f32.mrb[131].mxu1  ;;  %12215 = sbr.rel (%p13527_p6) target bundleno = 2059 (0x80b), region = 56 }
 0x512   : > { %v12204_v11 = vadd.f32 %v12203_v4, %v12164_v7 }
 0x514   : > { %v12209_v12 = vadd.f32 %v12204_v11, %v296_v9 }
 0x516   : > { %12211 = vst.msk [vmem:[#allocation2] sm:$0x3] %vm12210_vm2, %v12209_v12 }
 0x51d   : > { %v12216_v27 = vld [vmem:[#allocation2] sm:$0x3] }
 0x51e   : > { %v12224_v31 = vadd.f32 %v13528_v28, %v12216_v27 }
 0x520   : > { %v12225_v33 = vmax.f32 %v12224_v31, 0.0 }
 0x522   : > { %15027 = vmatmul.mubr.msk.f32.vlgmr.msra.gmra.mrb[0].mxu0 %vm12241_vm4, %v12225_v33 }
 0x5f5   : > { %v12311_v38 = vpop.f32.mrb[0].mxu0 }
 0x5f6   : > { %v12312_v39 = vadd.f32 %v13529_v37, %v12311_v38  ;;  %v15028_v40 = vpop.f32.mrb[1].mxu0 }
 0x5f8   : > { %v12315_v41 = vmax.f32 %v12312_v39, 0.0 }
 0x5fa   : > { %15038 = vmatmul.mubr.msk.f32.vlgmr.msra.gmra.mrb[0].mxu1 %vm12327_vm5, %v12315_v41 }
 0x6cd   : > { %v12397_v44 = vpop.f32.mrb[0].mxu1 }
 0x6ce   : > { %v12398_v45 = vadd.f32 %v13531_v43, %v12397_v44  ;;  %v15039_v46 = vpop.f32.mrb[1].mxu1 }
 0x6d0   : > { %v12402_v47 = vsel %vm12401_vm6, %v12398_v45, -inf }
 0x6d1   : > { %12403 = vmax.xlane.f32.xlu0 %v12402_v47 }
 0x75e   : > { %v12404_v48 = vpop.xlane.xlu0 %12403 }
 0x75f   : > { %v12405_v49 = vsub.f32 %v12398_v45, %v12404_v48 }
 0x761   : > { %v12406_v50 = vmul.f32 1.442695, %v12405_v49 }
 0x763   : > { %16161 = vpow2.f32 %v12406_v50 }
 0x76d   : > { %v16162_v51 = vpop.eup %16161 }
 0x76e   : > { %v12408_v52 = vsel %vm12401_vm6, %v16162_v51, 0.0 }
 0x76f   : > { %12409 = vadd.xlane.f32.xlu0 %v12408_v52 }
 0x7fc   : > { %v12410_v53 = vpop.xlane.xlu0 %12409 }
 0x7fd   : > { %16163 = vrcp.f32 %v12410_v53 }
 0x807   : > { %v16164_v54 = vpop.eup %16163 }
 0x808   : > { %v12412_v55 = vmul.f32 %v16164_v54, %v16162_v51 }
 0x80a   : > { %12413 = vst.msk [vmem:[#allocation3] sm:$0x3] %vm12401_vm6, %v12412_v55 }
 0x80b PF: > { %p15062_p7 = scmp.eq.s32.totalorder %s16257_s25, 5  ;;  %s16210_s22 = smov [#allocation3]  }
 0x80c   : > { %s12421_s23 = sshll.u32 %s16210_s22, 4  ;;  %s12422_s23 = int_to_ptr.vmem [resolvable:$true] %s12421_s23 }
 0x80d   : > { %s16165_s26 = scalar_lea.vmem %s12422_s23, 32  ;;  %p16172_p11 = scmp.lt.s32.totalorder %s12422_s23, %s12422_s23 }
 0x80e   : > { %p16166_p8 = scmp.ne.s32.totalorder %s12422_s23, %s16165_s26  ;;  %p16173_p12 = scmp.lt.s32.totalorder %s16165_s26, %s16165_s26 }
 0x810   : > { %p16167_p9 = pnand %p16166_p8, %p15062_p7  ;;  %p16174_p13 = por %p16173_p12, %p16172_p11 }
 0x812   : > { %p16168_p10 = pneg %p16167_p9 }
 0x814   : > { %p16175_p0 = pnand %p16174_p13, %p16168_p10 }
 0x816   : > { %16178 = shalt.err (!%p16175_p0)
}
 0x817   : > { %s16179_s29 = scalar_lea.hbm %s17589_s7, 32 }
 0x818   : > { %p16180_p1 = scmp.ne.s32.totalorder %s17589_s7, %s16179_s29  ;;  %p16185_p4 = scmp.lt.u32.totalorder %s16179_s29, %s17589_s7 }
 0x81a   : > { %p16181_p2 = pnand %p16180_p1, %p15062_p7 }
 0x81c   : > { %p16182_p3 = pneg %p16181_p2 }
 0x81e   : > { %p16187_p5 = pnand %p16185_p4, %p16182_p3 }
 0x820   : > { %16190 = shalt.err (!%p16187_p5)
}
 0x821   : > { %15059 = dma.vmem_to_hbm [thread:$0]  (%p15062_p7), %s12422_s23, 32, %s17589_s7, [#allocation4]  }
 0x822   : > { %16196 = dma.done.wait (%p15062_p7), [#allocation4], 32  }
 0x823   : > { %16198 = vsyncadd (%p15062_p7), [#allocation4], 4294967264 }
 0x824 PF: > { %s18_s24 = sadd.s32 1, %s16201_s24  }
 0x825   : > { %p15_p6 = scmp.ge.s32.totalorder %s18_s24, 8  }
 0x827   :  { %17 = sbr.rel (!%p15_p6) target bundleno = 1 (0x1), region = 86 }
 0x82e   :  { %12434 = vsyncpa [#allocation4], 1 }
 0x82f   :  { %12436 = vsyncpa [#allocation4 + $0x1], 1 }

</bundles_post_ra>
